<compile_context>
chip_gen: v6e
topology: v6e:2x2x1
jax: 0.10.0
libtpu: 0.0.40
codegen_flags: <defaults>
</compile_context>

<pallas_src>
import functools

import jax
import jax.numpy as jnp
from jax import lax
from jax.experimental import pallas as pl
from jax.experimental.pallas import tpu as pltpu

LEAKY_SLOPE = 0.2
BN_EPS = 1e-5


# ----------------------------------------------------------------------------
# Pallas kernel: matmul + bias + (BatchNorm) + activation, fully fused
# ----------------------------------------------------------------------------
def _fused_conv_kernel(*refs, act, use_bn):
    """y = act(BN(X @ W + b)) with training-mode BN (batch stats, biased var).

    X, W are bf16 tiles; accumulation and all elementwise math are f32.
    BN statistics are two-pass (mean, then centered sum of squares) over the
    whole M = N*Ho*Wo rows resident in VMEM.
    """
    if use_bn:
        x_ref, w_ref, b_ref, g_ref, bt_ref, o_ref = refs
    else:
        x_ref, w_ref, b_ref, o_ref = refs

    acc = jnp.dot(x_ref[...], w_ref[...], preferred_element_type=jnp.float32)
    acc = acc + b_ref[...]                      # (M, C) + (1, C)

    if use_bn:
        m = acc.shape[0]                        # static: N*Ho*Wo
        mean = jnp.sum(acc, axis=0, keepdims=True) * (1.0 / m)
        cen = acc - mean
        var = jnp.sum(cen * cen, axis=0, keepdims=True) * (1.0 / m)   # biased
        scale = g_ref[...] * lax.rsqrt(var + BN_EPS)
        acc = cen * scale + bt_ref[...]

    if act == "leaky":
        acc = jnp.where(acc >= 0, acc, LEAKY_SLOPE * acc)
    elif act == "sigmoid":
        acc = jax.nn.sigmoid(acc)

    o_ref[...] = acc.astype(o_ref.dtype)


def fused_conv(cols, wmat, bias, gamma=None, beta=None, act="leaky",
               out_dtype=jnp.bfloat16):
    """cols: [M, K], wmat: [K, C], bias/gamma/beta: [C] -> [M, C]."""
    M, K = cols.shape
    C = wmat.shape[1]
    use_bn = gamma is not None

    ins = [cols.astype(jnp.bfloat16),
           wmat.astype(jnp.bfloat16),
           bias.reshape(1, C).astype(jnp.float32)]
    specs = [pl.BlockSpec((M, K), lambda i: (0, 0)),
             pl.BlockSpec((K, C), lambda i: (0, 0)),
             pl.BlockSpec((1, C), lambda i: (0, 0))]
    if use_bn:
        ins += [gamma.reshape(1, C).astype(jnp.float32),
                beta.reshape(1, C).astype(jnp.float32)]
        specs += [pl.BlockSpec((1, C), lambda i: (0, 0)),
                  pl.BlockSpec((1, C), lambda i: (0, 0))]

    return pl.pallas_call(
        functools.partial(_fused_conv_kernel, act=act, use_bn=use_bn),
        out_shape=jax.ShapeDtypeStruct((M, C), out_dtype),
        grid=(1,),
        in_specs=specs,
        out_specs=pl.BlockSpec((M, C), lambda i: (0, 0)),
        compiler_params=pltpu.CompilerParams(
            dimension_semantics=("arbitrary",)),
    )(*ins)


# ----------------------------------------------------------------------------
# JAX glue: NHWC im2col + layer composition (no transposes between layers)
# ----------------------------------------------------------------------------
def im2col_nhwc(x, k, stride, pad):
    """x: [N, H, W, C] -> ([N*Ho*Wo, k*k*C], Ho, Wo); columns ordered (kh, kw, C)."""
    N, H, W, C = x.shape
    xp = jnp.pad(x, ((0, 0), (pad, pad), (pad, pad), (0, 0)))
    Ho = (H + 2 * pad - k) // stride + 1
    Wo = (W + 2 * pad - k) // stride + 1
    patches = []
    for kh in range(k):
        for kw in range(k):
            patches.append(lax.slice(
                xp, (0, kh, kw, 0),
                (N, kh + (Ho - 1) * stride + 1, kw + (Wo - 1) * stride + 1, C),
                (1, stride, stride, 1)))            # [N, Ho, Wo, C]
    pt = jnp.stack(patches, axis=3)                 # [N, Ho, Wo, k*k, C]
    return pt.reshape(N * Ho * Wo, k * k * C), Ho, Wo


def conv_layer(x_nhwc, weight, bias, stride, gamma=None, beta=None,
               act="leaky", out_dtype=jnp.bfloat16, pad_cout_to=None):
    Cout, Cin, k, _ = weight.shape
    N = x_nhwc.shape[0]
    cols, Ho, Wo = im2col_nhwc(x_nhwc, k, stride, 1)
    # OIHW -> (kh, kw, Cin, Cout) to match (kh, kw, C) im2col column order.
    wmat = weight.transpose(2, 3, 1, 0).reshape(k * k * Cin, Cout)
    bvec = bias
    if pad_cout_to is not None and pad_cout_to > Cout:
        wmat = jnp.pad(wmat, ((0, 0), (0, pad_cout_to - Cout)))
        bvec = jnp.pad(bvec, (0, pad_cout_to - Cout))
    y = fused_conv(cols, wmat, bvec, gamma, beta, act, out_dtype)
    if y.shape[1] != Cout:
        y = y[:, :Cout]
    return y, (N, Ho, Wo, Cout)


@jax.jit
def discriminator_forward(params, inp, label):
    # Single NCHW -> NHWC transpose at the boundary; channels-last thereafter.
    x = jnp.concatenate([inp, label], axis=1).transpose(0, 2, 3, 1)

    y, (N, H, W, C) = conv_layer(x, params["w1"], params["b1"], 2, act="leaky")
    x = y.reshape(N, H, W, C)
    y, (N, H, W, C) = conv_layer(x, params["w2"], params["b2"], 2,
                                 params["g2"], params["be2"], act="leaky")
    x = y.reshape(N, H, W, C)
    y, (N, H, W, C) = conv_layer(x, params["w3"], params["b3"], 2,
                                 params["g3"], params["be3"], act="leaky")
    x = y.reshape(N, H, W, C)
    y, (N, H, W, C) = conv_layer(x, params["w4"], params["b4"], 1,
                                 params["g4"], params["be4"], act="leaky")
    x = y.reshape(N, H, W, C)
    y, (N, H, W, C) = conv_layer(x, params["w5"], params["b5"], 1,
                                 act="sigmoid", out_dtype=jnp.float32,
                                 pad_cout_to=128)
    return y.reshape(N, H, W, 1).transpose(0, 3, 1, 2)      # NCHW like PyTorch


# ----------------------------------------------------------------------------
# Reference (pure JAX, f32, HIGHEST precision) for validation
# ----------------------------------------------------------------------------
def reference_forward(params, inp, label):
    def conv(x, w, b, s):
        y = lax.conv_general_dilated(
            x, w, (s, s), ((1, 1), (1, 1)),
            dimension_numbers=("NCHW", "OIHW", "NCHW"),
            precision=lax.Precision.HIGHEST)
        return y + b.reshape(1, -1, 1, 1)

    def bn(x, gamma, beta):
        mean = jnp.mean(x, axis=(0, 2, 3), keepdims=True)
        var = jnp.mean((x - mean) ** 2, axis=(0, 2, 3), keepdims=True)
        xn = (x - mean) / jnp.sqrt(var + BN_EPS)
        return xn * gamma.reshape(1, -1, 1, 1) + beta.reshape(1, -1, 1, 1)

    def lrelu(x):
        return jnp.where(x >= 0, x, LEAKY_SLOPE * x)

    x = jnp.concatenate([inp, label], axis=1)
    x = lrelu(conv(x, params["w1"], params["b1"], 2))
    x = lrelu(bn(conv(x, params["w2"], params["b2"], 2), params["g2"], params["be2"]))
    x = lrelu(bn(conv(x, params["w3"], params["b3"], 2), params["g3"], params["be3"]))
    x = lrelu(bn(conv(x, params["w4"], params["b4"], 1), params["g4"], params["be4"]))
    return jax.nn.sigmoid(conv(x, params["w5"], params["b5"], 1))


# ----------------------------------------------------------------------------
# Deterministic parameter init (mirrors nn.Conv2d / BatchNorm2d shapes)
# ----------------------------------------------------------------------------
def init_params(key, in_channels, d):
    ks = jax.random.split(key, 10)
    chans = [(in_channels, d), (d, 2 * d), (2 * d, 4 * d), (4 * d, 8 * d), (8 * d, 1)]
    p = {}
    for idx, (ci, co) in enumerate(chans, start=1):
        p[f"w{idx}"] = (0.02 * jax.random.normal(ks[2 * idx - 2], (co, ci, 4, 4))).astype(jnp.float32)
        p[f"b{idx}"] = (0.01 * jax.random.normal(ks[2 * idx - 1], (co,))).astype(jnp.float32)
    for idx, co in [(2, 2 * d), (3, 4 * d), (4, 8 * d)]:
        p[f"g{idx}"] = jnp.ones((co,), jnp.float32)    # BatchNorm2d weight
        p[f"be{idx}"] = jnp.zeros((co,), jnp.float32)  # BatchNorm2d bias
    return p


if __name__ == "__main__":
    key = jax.random.PRNGKey(0)
    k_par, k_in, k_lab = jax.random.split(key, 3)

    N, H, W = 2, 32, 32
    img_ch, label_ch, d = 3, 1, 16            # Discriminator_CNN(input_channels=4, d=16)
    params = init_params(k_par, img_ch + label_ch, d)

    inp = jax.random.normal(k_in, (N, img_ch, H, W), jnp.float32)
    label = jax.random.normal(k_lab, (N, label_ch, H, W), jnp.float32)

    out = discriminator_forward(params, inp, label)
    out = jax.block_until_ready(out)

    ref = reference_forward(params, inp, label)
    assert out.shape == (N, 1, 2, 2), out.shape
    assert bool(jnp.all(jnp.isfinite(out)))
    assert bool(jnp.max(jnp.abs(out - ref)) < 5e-2)

    print("KERNEL_OK")
</pallas_src>

<mosaic_0001>
module attributes {stable_mosaic.version = 11 : i64} {
  func.func @_fused_conv_kernel(%arg0: i32, %arg1: memref<512x64xbf16, #tpu.memory_space<vmem>>, %arg2: memref<64x16xbf16, #tpu.memory_space<vmem>>, %arg3: memref<1x16xf32, #tpu.memory_space<vmem>>, %arg4: memref<512x16xbf16, #tpu.memory_space<vmem>>) attributes {dimension_semantics = [#tpu.dimension_semantics<arbitrary>], iteration_bounds = array<i64: 1>, scalar_prefetch = 0 : i64, scratch_operands = 0 : i64, tpu.core_type = #tpu.core_type<tc>, window_params = [{pipeline_mode = #tpu.pipeline_mode<synchronous>, transform_indices = @transform_0, window_bounds = array<i64: 512, 64>}, {pipeline_mode = #tpu.pipeline_mode<synchronous>, transform_indices = @transform_1, window_bounds = array<i64: 64, 16>}, {pipeline_mode = #tpu.pipeline_mode<synchronous>, transform_indices = @transform_2, window_bounds = array<i64: 1, 16>}, {pipeline_mode = #tpu.pipeline_mode<synchronous>, transform_indices = @transform_3, window_bounds = array<i64: 512, 16>}]} {
    %c0 = arith.constant 0 : index
    %c0_0 = arith.constant 0 : index
    %0 = vector.load %arg1[%c0, %c0_0] : memref<512x64xbf16, #tpu.memory_space<vmem>>, vector<512x64xbf16>
    %c0_1 = arith.constant 0 : index
    %c0_2 = arith.constant 0 : index
    %1 = vector.load %arg2[%c0_1, %c0_2] : memref<64x16xbf16, #tpu.memory_space<vmem>>, vector<64x16xbf16>
    %cst = arith.constant dense<0.000000e+00> : vector<512x16xf32>
    %2 = tpu.matmul %0, %1, %cst {dimension_numbers = #tpu.dot_dimension_numbers<[1], [0], [0], [1], [0, 0, 1, 1], [], []>} : vector<512x64xbf16>, vector<64x16xbf16>, vector<512x16xf32> -> vector<512x16xf32>
    %c0_3 = arith.constant 0 : index
    %c0_4 = arith.constant 0 : index
    %3 = vector.load %arg3[%c0_3, %c0_4] : memref<1x16xf32, #tpu.memory_space<vmem>>, vector<1x16xf32>
    %4 = vector.broadcast %3 : vector<1x16xf32> to vector<512x16xf32>
    %5 = arith.addf %2, %4 : vector<512x16xf32>
    %cst_5 = arith.constant 0.000000e+00 : f32
    %6 = vector.broadcast %cst_5 : f32 to vector<512x16xf32>
    %7 = arith.cmpf oge, %5, %6 : vector<512x16xf32>
    %cst_6 = arith.constant 2.000000e-01 : f32
    %8 = vector.broadcast %cst_6 : f32 to vector<512x16xf32>
    %9 = arith.mulf %8, %5 : vector<512x16xf32>
    %10 = arith.select %7, %5, %9 : vector<512x16xi1>, vector<512x16xf32>
    %11 = arith.truncf %10 : vector<512x16xf32> to vector<512x16xbf16>
    %c0_7 = arith.constant 0 : index
    %c0_8 = arith.constant 0 : index
    %12 = vector.load %arg4[%c0_7, %c0_8] : memref<512x16xbf16, #tpu.memory_space<vmem>>, vector<512x16xbf16>
    tpu.vector_store %arg4[%c0_7, %c0_8], %11 {strides = array<i32>} : memref<512x16xbf16, #tpu.memory_space<vmem>>, vector<512x16xbf16>,
    return
  }
  func.func @transform_0(%arg0: i32) -> (i32, i32) {
    %c0_i32 = arith.constant 0 : i32
    %c0_i32_0 = arith.constant 0 : i32
    %c0_i32_1 = arith.constant 0 : i32
    return %c0_i32, %c0_i32_0 : i32, i32
  }
  func.func @transform_1(%arg0: i32) -> (i32, i32) {
    %c0_i32 = arith.constant 0 : i32
    %c0_i32_0 = arith.constant 0 : i32
    %c0_i32_1 = arith.constant 0 : i32
    return %c0_i32, %c0_i32_0 : i32, i32
  }
  func.func @transform_2(%arg0: i32) -> (i32, i32) {
    %c0_i32 = arith.constant 0 : i32
    %c0_i32_0 = arith.constant 0 : i32
    %c0_i32_1 = arith.constant 0 : i32
    return %c0_i32, %c0_i32_0 : i32, i32
  }
  func.func @transform_3(%arg0: i32) -> (i32, i32) {
    %c0_i32 = arith.constant 0 : i32
    %c0_i32_0 = arith.constant 0 : i32
    %c0_i32_1 = arith.constant 0 : i32
    return %c0_i32, %c0_i32_0 : i32, i32
  }
}

module attributes {stable_mosaic.version = 11 : i64} {
  func.func @_fused_conv_kernel(%arg0: i32, %arg1: memref<128x256xbf16, #tpu.memory_space<vmem>>, %arg2: memref<256x32xbf16, #tpu.memory_space<vmem>>, %arg3: memref<1x32xf32, #tpu.memory_space<vmem>>, %arg4: memref<1x32xf32, #tpu.memory_space<vmem>>, %arg5: memref<1x32xf32, #tpu.memory_space<vmem>>, %arg6: memref<128x32xbf16, #tpu.memory_space<vmem>>) attributes {dimension_semantics = [#tpu.dimension_semantics<arbitrary>], iteration_bounds = array<i64: 1>, scalar_prefetch = 0 : i64, scratch_operands = 0 : i64, tpu.core_type = #tpu.core_type<tc>, window_params = [{pipeline_mode = #tpu.pipeline_mode<synchronous>, transform_indices = @transform_0, window_bounds = array<i64: 128, 256>}, {pipeline_mode = #tpu.pipeline_mode<synchronous>, transform_indices = @transform_1, window_bounds = array<i64: 256, 32>}, {pipeline_mode = #tpu.pipeline_mode<synchronous>, transform_indices = @transform_2, window_bounds = array<i64: 1, 32>}, {pipeline_mode = #tpu.pipeline_mode<synchronous>, transform_indices = @transform_3, window_bounds = array<i64: 1, 32>}, {pipeline_mode = #tpu.pipeline_mode<synchronous>, transform_indices = @transform_4, window_bounds = array<i64: 1, 32>}, {pipeline_mode = #tpu.pipeline_mode<synchronous>, transform_indices = @transform_5, window_bounds = array<i64: 128, 32>}]} {
    %c0 = arith.constant 0 : index
    %c0_0 = arith.constant 0 : index
    %0 = vector.load %arg1[%c0, %c0_0] : memref<128x256xbf16, #tpu.memory_space<vmem>>, vector<128x256xbf16>
    %c0_1 = arith.constant 0 : index
    %c0_2 = arith.constant 0 : index
    %1 = vector.load %arg2[%c0_1, %c0_2] : memref<256x32xbf16, #tpu.memory_space<vmem>>, vector<256x32xbf16>
    %cst = arith.constant dense<0.000000e+00> : vector<128x32xf32>
    %2 = tpu.matmul %0, %1, %cst {dimension_numbers = #tpu.dot_dimension_numbers<[1], [0], [0], [1], [0, 0, 1, 1], [], []>} : vector<128x256xbf16>, vector<256x32xbf16>, vector<128x32xf32> -> vector<128x32xf32>
    %c0_3 = arith.constant 0 : index
    %c0_4 = arith.constant 0 : index
    %3 = vector.load %arg3[%c0_3, %c0_4] : memref<1x32xf32, #tpu.memory_space<vmem>>, vector<1x32xf32>
    %4 = vector.broadcast %3 : vector<1x32xf32> to vector<128x32xf32>
    %5 = arith.addf %2, %4 : vector<128x32xf32>
    %cst_5 = arith.constant dense<0.000000e+00> : vector<32xf32>
    %6 = vector.multi_reduction <add>, %5, %cst_5 [0] : vector<128x32xf32> to vector<32xf32>
    %7 = vector.shape_cast %6 : vector<32xf32> to vector<1x32xf32>
    %cst_6 = arith.constant 7.812500e-03 : f32
    %8 = vector.broadcast %cst_6 : f32 to vector<1x32xf32>
    %9 = arith.mulf %7, %8 : vector<1x32xf32>
    %10 = vector.broadcast %9 : vector<1x32xf32> to vector<128x32xf32>
    %11 = arith.subf %5, %10 : vector<128x32xf32>
    %12 = arith.mulf %11, %11 : vector<128x32xf32>
    %cst_7 = arith.constant dense<0.000000e+00> : vector<32xf32>
    %13 = vector.multi_reduction <add>, %12, %cst_7 [0] : vector<128x32xf32> to vector<32xf32>
    %14 = vector.shape_cast %13 : vector<32xf32> to vector<1x32xf32>
    %cst_8 = arith.constant 7.812500e-03 : f32
    %15 = vector.broadcast %cst_8 : f32 to vector<1x32xf32>
    %16 = arith.mulf %14, %15 : vector<1x32xf32>
    %c0_9 = arith.constant 0 : index
    %c0_10 = arith.constant 0 : index
    %17 = vector.load %arg4[%c0_9, %c0_10] : memref<1x32xf32, #tpu.memory_space<vmem>>, vector<1x32xf32>
    %cst_11 = arith.constant 9.99999974E-6 : f32
    %18 = vector.broadcast %cst_11 : f32 to vector<1x32xf32>
    %19 = arith.addf %16, %18 : vector<1x32xf32>
    %20 = math.rsqrt %19 : vector<1x32xf32>
    %21 = arith.mulf %17, %20 : vector<1x32xf32>
    %22 = vector.broadcast %21 : vector<1x32xf32> to vector<128x32xf32>
    %23 = arith.mulf %11, %22 : vector<128x32xf32>
    %c0_12 = arith.constant 0 : index
    %c0_13 = arith.constant 0 : index
    %24 = vector.load %arg5[%c0_12, %c0_13] : memref<1x32xf32, #tpu.memory_space<vmem>>, vector<1x32xf32>
    %25 = vector.broadcast %24 : vector<1x32xf32> to vector<128x32xf32>
    %26 = arith.addf %23, %25 : vector<128x32xf32>
    %cst_14 = arith.constant 0.000000e+00 : f32
    %27 = vector.broadcast %cst_14 : f32 to vector<128x32xf32>
    %28 = arith.cmpf oge, %26, %27 : vector<128x32xf32>
    %cst_15 = arith.constant 2.000000e-01 : f32
    %29 = vector.broadcast %cst_15 : f32 to vector<128x32xf32>
    %30 = arith.mulf %29, %26 : vector<128x32xf32>
    %31 = arith.select %28, %26, %30 : vector<128x32xi1>, vector<128x32xf32>
    %32 = arith.truncf %31 : vector<128x32xf32> to vector<128x32xbf16>
    %c0_16 = arith.constant 0 : index
    %c0_17 = arith.constant 0 : index
    %33 = vector.load %arg6[%c0_16, %c0_17] : memref<128x32xbf16, #tpu.memory_space<vmem>>, vector<128x32xbf16>
    tpu.vector_store %arg6[%c0_16, %c0_17], %32 {strides = array<i32>} : memref<128x32xbf16, #tpu.memory_space<vmem>>, vector<128x32xbf16>,
    return
  }
  func.func @transform_0(%arg0: i32) -> (i32, i32) {
    %c0_i32 = arith.constant 0 : i32
    %c0_i32_0 = arith.constant 0 : i32
    %c0_i32_1 = arith.constant 0 : i32
    return %c0_i32, %c0_i32_0 : i32, i32
  }
  func.func @transform_1(%arg0: i32) -> (i32, i32) {
    %c0_i32 = arith.constant 0 : i32
    %c0_i32_0 = arith.constant 0 : i32
    %c0_i32_1 = arith.constant 0 : i32
    return %c0_i32, %c0_i32_0 : i32, i32
  }
  func.func @transform_2(%arg0: i32) -> (i32, i32) {
    %c0_i32 = arith.constant 0 : i32
    %c0_i32_0 = arith.constant 0 : i32
    %c0_i32_1 = arith.constant 0 : i32
    return %c0_i32, %c0_i32_0 : i32, i32
  }
  func.func @transform_3(%arg0: i32) -> (i32, i32) {
    %c0_i32 = arith.constant 0 : i32
    %c0_i32_0 = arith.constant 0 : i32
    %c0_i32_1 = arith.constant 0 : i32
    return %c0_i32, %c0_i32_0 : i32, i32
  }
  func.func @transform_4(%arg0: i32) -> (i32, i32) {
    %c0_i32 = arith.constant 0 : i32
    %c0_i32_0 = arith.constant 0 : i32
    %c0_i32_1 = arith.constant 0 : i32
    return %c0_i32, %c0_i32_0 : i32, i32
  }
  func.func @transform_5(%arg0: i32) -> (i32, i32) {
    %c0_i32 = arith.constant 0 : i32
    %c0_i32_0 = arith.constant 0 : i32
    %c0_i32_1 = arith.constant 0 : i32
    return %c0_i32, %c0_i32_0 : i32, i32
  }
}

module attributes {stable_mosaic.version = 11 : i64} {
  func.func @_fused_conv_kernel(%arg0: i32, %arg1: memref<32x512xbf16, #tpu.memory_space<vmem>>, %arg2: memref<512x64xbf16, #tpu.memory_space<vmem>>, %arg3: memref<1x64xf32, #tpu.memory_space<vmem>>, %arg4: memref<1x64xf32, #tpu.memory_space<vmem>>, %arg5: memref<1x64xf32, #tpu.memory_space<vmem>>, %arg6: memref<32x64xbf16, #tpu.memory_space<vmem>>) attributes {dimension_semantics = [#tpu.dimension_semantics<arbitrary>], iteration_bounds = array<i64: 1>, scalar_prefetch = 0 : i64, scratch_operands = 0 : i64, tpu.core_type = #tpu.core_type<tc>, window_params = [{pipeline_mode = #tpu.pipeline_mode<synchronous>, transform_indices = @transform_0, window_bounds = array<i64: 32, 512>}, {pipeline_mode = #tpu.pipeline_mode<synchronous>, transform_indices = @transform_1, window_bounds = array<i64: 512, 64>}, {pipeline_mode = #tpu.pipeline_mode<synchronous>, transform_indices = @transform_2, window_bounds = array<i64: 1, 64>}, {pipeline_mode = #tpu.pipeline_mode<synchronous>, transform_indices = @transform_3, window_bounds = array<i64: 1, 64>}, {pipeline_mode = #tpu.pipeline_mode<synchronous>, transform_indices = @transform_4, window_bounds = array<i64: 1, 64>}, {pipeline_mode = #tpu.pipeline_mode<synchronous>, transform_indices = @transform_5, window_bounds = array<i64: 32, 64>}]} {
    %c0 = arith.constant 0 : index
    %c0_0 = arith.constant 0 : index
    %0 = vector.load %arg1[%c0, %c0_0] : memref<32x512xbf16, #tpu.memory_space<vmem>>, vector<32x512xbf16>
    %c0_1 = arith.constant 0 : index
    %c0_2 = arith.constant 0 : index
    %1 = vector.load %arg2[%c0_1, %c0_2] : memref<512x64xbf16, #tpu.memory_space<vmem>>, vector<512x64xbf16>
    %cst = arith.constant dense<0.000000e+00> : vector<32x64xf32>
    %2 = tpu.matmul %0, %1, %cst {dimension_numbers = #tpu.dot_dimension_numbers<[1], [0], [0], [1], [0, 0, 1, 1], [], []>} : vector<32x512xbf16>, vector<512x64xbf16>, vector<32x64xf32> -> vector<32x64xf32>
    %c0_3 = arith.constant 0 : index
    %c0_4 = arith.constant 0 : index
    %3 = vector.load %arg3[%c0_3, %c0_4] : memref<1x64xf32, #tpu.memory_space<vmem>>, vector<1x64xf32>
    %4 = vector.broadcast %3 : vector<1x64xf32> to vector<32x64xf32>
    %5 = arith.addf %2, %4 : vector<32x64xf32>
    %cst_5 = arith.constant dense<0.000000e+00> : vector<64xf32>
    %6 = vector.multi_reduction <add>, %5, %cst_5 [0] : vector<32x64xf32> to vector<64xf32>
    %7 = vector.shape_cast %6 : vector<64xf32> to vector<1x64xf32>
    %cst_6 = arith.constant 3.125000e-02 : f32
    %8 = vector.broadcast %cst_6 : f32 to vector<1x64xf32>
    %9 = arith.mulf %7, %8 : vector<1x64xf32>
    %10 = vector.broadcast %9 : vector<1x64xf32> to vector<32x64xf32>
    %11 = arith.subf %5, %10 : vector<32x64xf32>
    %12 = arith.mulf %11, %11 : vector<32x64xf32>
    %cst_7 = arith.constant dense<0.000000e+00> : vector<64xf32>
    %13 = vector.multi_reduction <add>, %12, %cst_7 [0] : vector<32x64xf32> to vector<64xf32>
    %14 = vector.shape_cast %13 : vector<64xf32> to vector<1x64xf32>
    %cst_8 = arith.constant 3.125000e-02 : f32
    %15 = vector.broadcast %cst_8 : f32 to vector<1x64xf32>
    %16 = arith.mulf %14, %15 : vector<1x64xf32>
    %c0_9 = arith.constant 0 : index
    %c0_10 = arith.constant 0 : index
    %17 = vector.load %arg4[%c0_9, %c0_10] : memref<1x64xf32, #tpu.memory_space<vmem>>, vector<1x64xf32>
    %cst_11 = arith.constant 9.99999974E-6 : f32
    %18 = vector.broadcast %cst_11 : f32 to vector<1x64xf32>
    %19 = arith.addf %16, %18 : vector<1x64xf32>
    %20 = math.rsqrt %19 : vector<1x64xf32>
    %21 = arith.mulf %17, %20 : vector<1x64xf32>
    %22 = vector.broadcast %21 : vector<1x64xf32> to vector<32x64xf32>
    %23 = arith.mulf %11, %22 : vector<32x64xf32>
    %c0_12 = arith.constant 0 : index
    %c0_13 = arith.constant 0 : index
    %24 = vector.load %arg5[%c0_12, %c0_13] : memref<1x64xf32, #tpu.memory_space<vmem>>, vector<1x64xf32>
    %25 = vector.broadcast %24 : vector<1x64xf32> to vector<32x64xf32>
    %26 = arith.addf %23, %25 : vector<32x64xf32>
    %cst_14 = arith.constant 0.000000e+00 : f32
    %27 = vector.broadcast %cst_14 : f32 to vector<32x64xf32>
    %28 = arith.cmpf oge, %26, %27 : vector<32x64xf32>
    %cst_15 = arith.constant 2.000000e-01 : f32
    %29 = vector.broadcast %cst_15 : f32 to vector<32x64xf32>
    %30 = arith.mulf %29, %26 : vector<32x64xf32>
    %31 = arith.select %28, %26, %30 : vector<32x64xi1>, vector<32x64xf32>
    %32 = arith.truncf %31 : vector<32x64xf32> to vector<32x64xbf16>
    %c0_16 = arith.constant 0 : index
    %c0_17 = arith.constant 0 : index
    %33 = vector.load %arg6[%c0_16, %c0_17] : memref<32x64xbf16, #tpu.memory_space<vmem>>, vector<32x64xbf16>
    tpu.vector_store %arg6[%c0_16, %c0_17], %32 {strides = array<i32>} : memref<32x64xbf16, #tpu.memory_space<vmem>>, vector<32x64xbf16>,
    return
  }
  func.func @transform_0(%arg0: i32) -> (i32, i32) {
    %c0_i32 = arith.constant 0 : i32
    %c0_i32_0 = arith.constant 0 : i32
    %c0_i32_1 = arith.constant 0 : i32
    return %c0_i32, %c0_i32_0 : i32, i32
  }
  func.func @transform_1(%arg0: i32) -> (i32, i32) {
    %c0_i32 = arith.constant 0 : i32
    %c0_i32_0 = arith.constant 0 : i32
    %c0_i32_1 = arith.constant 0 : i32
    return %c0_i32, %c0_i32_0 : i32, i32
  }
  func.func @transform_2(%arg0: i32) -> (i32, i32) {
    %c0_i32 = arith.constant 0 : i32
    %c0_i32_0 = arith.constant 0 : i32
    %c0_i32_1 = arith.constant 0 : i32
    return %c0_i32, %c0_i32_0 : i32, i32
  }
  func.func @transform_3(%arg0: i32) -> (i32, i32) {
    %c0_i32 = arith.constant 0 : i32
    %c0_i32_0 = arith.constant 0 : i32
    %c0_i32_1 = arith.constant 0 : i32
    return %c0_i32, %c0_i32_0 : i32, i32
  }
  func.func @transform_4(%arg0: i32) -> (i32, i32) {
    %c0_i32 = arith.constant 0 : i32
    %c0_i32_0 = arith.constant 0 : i32
    %c0_i32_1 = arith.constant 0 : i32
    return %c0_i32, %c0_i32_0 : i32, i32
  }
  func.func @transform_5(%arg0: i32) -> (i32, i32) {
    %c0_i32 = arith.constant 0 : i32
    %c0_i32_0 = arith.constant 0 : i32
    %c0_i32_1 = arith.constant 0 : i32
    return %c0_i32, %c0_i32_0 : i32, i32
  }
}

module attributes {stable_mosaic.version = 11 : i64} {
  func.func @_fused_conv_kernel(%arg0: i32, %arg1: memref<18x1024xbf16, #tpu.memory_space<vmem>>, %arg2: memref<1024x128xbf16, #tpu.memory_space<vmem>>, %arg3: memref<1x128xf32, #tpu.memory_space<vmem>>, %arg4: memref<1x128xf32, #tpu.memory_space<vmem>>, %arg5: memref<1x128xf32, #tpu.memory_space<vmem>>, %arg6: memref<18x128xbf16, #tpu.memory_space<vmem>>) attributes {dimension_semantics = [#tpu.dimension_semantics<arbitrary>], iteration_bounds = array<i64: 1>, scalar_prefetch = 0 : i64, scratch_operands = 0 : i64, tpu.core_type = #tpu.core_type<tc>, window_params = [{pipeline_mode = #tpu.pipeline_mode<synchronous>, transform_indices = @transform_0, window_bounds = array<i64: 18, 1024>}, {pipeline_mode = #tpu.pipeline_mode<synchronous>, transform_indices = @transform_1, window_bounds = array<i64: 1024, 128>}, {pipeline_mode = #tpu.pipeline_mode<synchronous>, transform_indices = @transform_2, window_bounds = array<i64: 1, 128>}, {pipeline_mode = #tpu.pipeline_mode<synchronous>, transform_indices = @transform_3, window_bounds = array<i64: 1, 128>}, {pipeline_mode = #tpu.pipeline_mode<synchronous>, transform_indices = @transform_4, window_bounds = array<i64: 1, 128>}, {pipeline_mode = #tpu.pipeline_mode<synchronous>, transform_indices = @transform_5, window_bounds = array<i64: 18, 128>}]} {
    %c0 = arith.constant 0 : index
    %c0_0 = arith.constant 0 : index
    %0 = vector.load %arg1[%c0, %c0_0] : memref<18x1024xbf16, #tpu.memory_space<vmem>>, vector<18x1024xbf16>
    %c0_1 = arith.constant 0 : index
    %c0_2 = arith.constant 0 : index
    %1 = vector.load %arg2[%c0_1, %c0_2] : memref<1024x128xbf16, #tpu.memory_space<vmem>>, vector<1024x128xbf16>
    %cst = arith.constant dense<0.000000e+00> : vector<18x128xf32>
    %2 = tpu.matmul %0, %1, %cst {dimension_numbers = #tpu.dot_dimension_numbers<[1], [0], [0], [1], [0, 0, 1, 1], [], []>} : vector<18x1024xbf16>, vector<1024x128xbf16>, vector<18x128xf32> -> vector<18x128xf32>
    %c0_3 = arith.constant 0 : index
    %c0_4 = arith.constant 0 : index
    %3 = vector.load %arg3[%c0_3, %c0_4] : memref<1x128xf32, #tpu.memory_space<vmem>>, vector<1x128xf32>
    %4 = vector.broadcast %3 : vector<1x128xf32> to vector<18x128xf32>
    %5 = arith.addf %2, %4 : vector<18x128xf32>
    %cst_5 = arith.constant dense<0.000000e+00> : vector<128xf32>
    %6 = vector.multi_reduction <add>, %5, %cst_5 [0] : vector<18x128xf32> to vector<128xf32>
    %7 = vector.shape_cast %6 : vector<128xf32> to vector<1x128xf32>
    %cst_6 = arith.constant 0.055555556 : f32
    %8 = vector.broadcast %cst_6 : f32 to vector<1x128xf32>
    %9 = arith.mulf %7, %8 : vector<1x128xf32>
    %10 = vector.broadcast %9 : vector<1x128xf32> to vector<18x128xf32>
    %11 = arith.subf %5, %10 : vector<18x128xf32>
    %12 = arith.mulf %11, %11 : vector<18x128xf32>
    %cst_7 = arith.constant dense<0.000000e+00> : vector<128xf32>
    %13 = vector.multi_reduction <add>, %12, %cst_7 [0] : vector<18x128xf32> to vector<128xf32>
    %14 = vector.shape_cast %13 : vector<128xf32> to vector<1x128xf32>
    %cst_8 = arith.constant 0.055555556 : f32
    %15 = vector.broadcast %cst_8 : f32 to vector<1x128xf32>
    %16 = arith.mulf %14, %15 : vector<1x128xf32>
    %c0_9 = arith.constant 0 : index
    %c0_10 = arith.constant 0 : index
    %17 = vector.load %arg4[%c0_9, %c0_10] : memref<1x128xf32, #tpu.memory_space<vmem>>, vector<1x128xf32>
    %cst_11 = arith.constant 9.99999974E-6 : f32
    %18 = vector.broadcast %cst_11 : f32 to vector<1x128xf32>
    %19 = arith.addf %16, %18 : vector<1x128xf32>
    %20 = math.rsqrt %19 : vector<1x128xf32>
    %21 = arith.mulf %17, %20 : vector<1x128xf32>
    %22 = vector.broadcast %21 : vector<1x128xf32> to vector<18x128xf32>
    %23 = arith.mulf %11, %22 : vector<18x128xf32>
    %c0_12 = arith.constant 0 : index
    %c0_13 = arith.constant 0 : index
    %24 = vector.load %arg5[%c0_12, %c0_13] : memref<1x128xf32, #tpu.memory_space<vmem>>, vector<1x128xf32>
    %25 = vector.broadcast %24 : vector<1x128xf32> to vector<18x128xf32>
    %26 = arith.addf %23, %25 : vector<18x128xf32>
    %cst_14 = arith.constant 0.000000e+00 : f32
    %27 = vector.broadcast %cst_14 : f32 to vector<18x128xf32>
    %28 = arith.cmpf oge, %26, %27 : vector<18x128xf32>
    %cst_15 = arith.constant 2.000000e-01 : f32
    %29 = vector.broadcast %cst_15 : f32 to vector<18x128xf32>
    %30 = arith.mulf %29, %26 : vector<18x128xf32>
    %31 = arith.select %28, %26, %30 : vector<18x128xi1>, vector<18x128xf32>
    %32 = arith.truncf %31 : vector<18x128xf32> to vector<18x128xbf16>
    %c0_16 = arith.constant 0 : index
    %c0_17 = arith.constant 0 : index
    %33 = vector.load %arg6[%c0_16, %c0_17] : memref<18x128xbf16, #tpu.memory_space<vmem>>, vector<18x128xbf16>
    tpu.vector_store %arg6[%c0_16, %c0_17], %32 {strides = array<i32>} : memref<18x128xbf16, #tpu.memory_space<vmem>>, vector<18x128xbf16>,
    return
  }
  func.func @transform_0(%arg0: i32) -> (i32, i32) {
    %c0_i32 = arith.constant 0 : i32
    %c0_i32_0 = arith.constant 0 : i32
    %c0_i32_1 = arith.constant 0 : i32
    return %c0_i32, %c0_i32_0 : i32, i32
  }
  func.func @transform_1(%arg0: i32) -> (i32, i32) {
    %c0_i32 = arith.constant 0 : i32
    %c0_i32_0 = arith.constant 0 : i32
    %c0_i32_1 = arith.constant 0 : i32
    return %c0_i32, %c0_i32_0 : i32, i32
  }
  func.func @transform_2(%arg0: i32) -> (i32, i32) {
    %c0_i32 = arith.constant 0 : i32
    %c0_i32_0 = arith.constant 0 : i32
    %c0_i32_1 = arith.constant 0 : i32
    return %c0_i32, %c0_i32_0 : i32, i32
  }
  func.func @transform_3(%arg0: i32) -> (i32, i32) {
    %c0_i32 = arith.constant 0 : i32
    %c0_i32_0 = arith.constant 0 : i32
    %c0_i32_1 = arith.constant 0 : i32
    return %c0_i32, %c0_i32_0 : i32, i32
  }
  func.func @transform_4(%arg0: i32) -> (i32, i32) {
    %c0_i32 = arith.constant 0 : i32
    %c0_i32_0 = arith.constant 0 : i32
    %c0_i32_1 = arith.constant 0 : i32
    return %c0_i32, %c0_i32_0 : i32, i32
  }
  func.func @transform_5(%arg0: i32) -> (i32, i32) {
    %c0_i32 = arith.constant 0 : i32
    %c0_i32_0 = arith.constant 0 : i32
    %c0_i32_1 = arith.constant 0 : i32
    return %c0_i32, %c0_i32_0 : i32, i32
  }
}

module attributes {stable_mosaic.version = 11 : i64} {
  func.func @_fused_conv_kernel(%arg0: i32, %arg1: memref<8x2048xbf16, #tpu.memory_space<vmem>>, %arg2: memref<2048x128xbf16, #tpu.memory_space<vmem>>, %arg3: memref<1x128xf32, #tpu.memory_space<vmem>>, %arg4: memref<8x128xf32, #tpu.memory_space<vmem>>) attributes {dimension_semantics = [#tpu.dimension_semantics<arbitrary>], iteration_bounds = array<i64: 1>, scalar_prefetch = 0 : i64, scratch_operands = 0 : i64, tpu.core_type = #tpu.core_type<tc>, window_params = [{pipeline_mode = #tpu.pipeline_mode<synchronous>, transform_indices = @transform_0, window_bounds = array<i64: 8, 2048>}, {pipeline_mode = #tpu.pipeline_mode<synchronous>, transform_indices = @transform_1, window_bounds = array<i64: 2048, 128>}, {pipeline_mode = #tpu.pipeline_mode<synchronous>, transform_indices = @transform_2, window_bounds = array<i64: 1, 128>}, {pipeline_mode = #tpu.pipeline_mode<synchronous>, transform_indices = @transform_3, window_bounds = array<i64: 8, 128>}]} {
    %c0 = arith.constant 0 : index
    %c0_0 = arith.constant 0 : index
    %0 = vector.load %arg1[%c0, %c0_0] : memref<8x2048xbf16, #tpu.memory_space<vmem>>, vector<8x2048xbf16>
    %c0_1 = arith.constant 0 : index
    %c0_2 = arith.constant 0 : index
    %1 = vector.load %arg2[%c0_1, %c0_2] : memref<2048x128xbf16, #tpu.memory_space<vmem>>, vector<2048x128xbf16>
    %cst = arith.constant dense<0.000000e+00> : vector<8x128xf32>
    %2 = tpu.matmul %0, %1, %cst {dimension_numbers = #tpu.dot_dimension_numbers<[1], [0], [0], [1], [0, 0, 1, 1], [], []>} : vector<8x2048xbf16>, vector<2048x128xbf16>, vector<8x128xf32> -> vector<8x128xf32>
    %c0_3 = arith.constant 0 : index
    %c0_4 = arith.constant 0 : index
    %3 = vector.load %arg3[%c0_3, %c0_4] : memref<1x128xf32, #tpu.memory_space<vmem>>, vector<1x128xf32>
    %4 = vector.broadcast %3 : vector<1x128xf32> to vector<8x128xf32>
    %5 = arith.addf %2, %4 : vector<8x128xf32>
    %6 = arith.negf %5 : vector<8x128xf32>
    %7 = math.exp %6 : vector<8x128xf32>
    %cst_5 = arith.constant 1.000000e+00 : f32
    %8 = vector.broadcast %cst_5 : f32 to vector<8x128xf32>
    %9 = arith.addf %8, %7 : vector<8x128xf32>
    %10 = arith.divf %8, %9 : vector<8x128xf32>
    %c0_6 = arith.constant 0 : index
    %c0_7 = arith.constant 0 : index
    %11 = vector.load %arg4[%c0_6, %c0_7] : memref<8x128xf32, #tpu.memory_space<vmem>>, vector<8x128xf32>
    tpu.vector_store %arg4[%c0_6, %c0_7], %10 {strides = array<i32>} : memref<8x128xf32, #tpu.memory_space<vmem>>, vector<8x128xf32>,
    return
  }
  func.func @transform_0(%arg0: i32) -> (i32, i32) {
    %c0_i32 = arith.constant 0 : i32
    %c0_i32_0 = arith.constant 0 : i32
    %c0_i32_1 = arith.constant 0 : i32
    return %c0_i32, %c0_i32_0 : i32, i32
  }
  func.func @transform_1(%arg0: i32) -> (i32, i32) {
    %c0_i32 = arith.constant 0 : i32
    %c0_i32_0 = arith.constant 0 : i32
    %c0_i32_1 = arith.constant 0 : i32
    return %c0_i32, %c0_i32_0 : i32, i32
  }
  func.func @transform_2(%arg0: i32) -> (i32, i32) {
    %c0_i32 = arith.constant 0 : i32
    %c0_i32_0 = arith.constant 0 : i32
    %c0_i32_1 = arith.constant 0 : i32
    return %c0_i32, %c0_i32_0 : i32, i32
  }
  func.func @transform_3(%arg0: i32) -> (i32, i32) {
    %c0_i32 = arith.constant 0 : i32
    %c0_i32_0 = arith.constant 0 : i32
    %c0_i32_1 = arith.constant 0 : i32
    return %c0_i32, %c0_i32_0 : i32, i32
  }
}

</mosaic_0001>

<bundles_post_ra>
// kernel: discriminator_forward.5
= control target key start
LH: loop header
LB: loop body
LE: loop exit
PB: predicated region body
PF: predicated region fallthrough
CT: control target
= control target key end

     0   :  { %vm278_vm0 = vcmask 523264   ;;  %vm1112_vm3 = vcmask 125952   ;;  %s2042_s1 = inlined_call_operand.vmem [shape: bf16[64,16], index: 1, kind: input, shape index: {}]   ;;  %s2043_s0 = inlined_call_operand.vmem [shape: bf16[512,64], index: 0, kind: input, shape index: {}]   ;;  %s2044_s2 = inlined_call_operand.vmem [shape: f32[1,16], index: 2, kind: input, shape index: {}]   ;;  %s2045_s3 = inlined_call_operand.vmem [shape: bf16[512,16], index: 3, kind: output, shape index: {}]  }
   0x1   :  { %v1494_v0 = vld [vmem:[%s2042_s1 + $0x18] sm:$0xff]   ;;  %v1495_v1 = vld [vmem:[%s2042_s1 + $0x10] sm:$0xff]   ;;  %v1496_v2 = vld [vmem:[%s2042_s1 + $0x8] sm:$0xff]  }
   0x2   :  { %1414 = vmatprep.subr.bf16.mxu0 %v1494_v0  ;;  %1486 = vmatprep.subr.bf16.mxu1 %v1494_v0  ;;  %v1498_v3 = vld [vmem:[%s2043_s0] sm:$0xff]   ;;  %v1500_v6 = vld [vmem:[%s2043_s0 + $0x8] sm:$0xff]   ;;  %v1502_v8 = vld [vmem:[%s2043_s0 + $0x10] sm:$0xff]  }
   0x3   :  { %1415 = vmatpush3.bf16.msra.mxu0 %v1494_v0  ;;  %1490 = vmatpush3.bf16.msra.mxu1 %v1494_v0  ;;  %v1499_v4 = vld [vmem:[%s2043_s0 + $0x80] sm:$0xff]   ;;  %v1501_v7 = vld [vmem:[%s2043_s0 + $0x88] sm:$0xff]   ;;  %v1503_v9 = vld [vmem:[%s2043_s0 + $0x90] sm:$0xff]  }
   0x4   :  { %1416 = vmatprep.subr.bf16.mxu0 %v1495_v1  ;;  %1487 = vmatprep.subr.bf16.mxu1 %v1495_v1  ;;  %v1497_v5 = vld [vmem:[%s2042_s1] sm:$0xff]   ;;  %v1504_v10 = vld [vmem:[%s2043_s0 + $0x18] sm:$0xff]   ;;  %v1508_v14 = vld [vmem:[%s2043_s0 + $0x28] sm:$0xff]  }
   0x5   :  { %1422 = vmatprep.mubr.msk.bf16.mxu0 %vm278_vm0, %v1498_v3  ;;  %1454 = vmatprep.mubr.msk.bf16.mxu1 %vm278_vm0, %v1499_v4  ;;  %v1505_v11 = vld [vmem:[%s2043_s0 + $0x98] sm:$0xff]   ;;  %v1506_v12 = vld [vmem:[%s2043_s0 + $0x20] sm:$0xff]   ;;  %v1509_v15 = vld [vmem:[%s2043_s0 + $0xa8] sm:$0xff]  }
   0x6   :  { %v1507_v13 = vld [vmem:[%s2043_s0 + $0xa0] sm:$0xff]   ;;  %v1510_v16 = vld [vmem:[%s2043_s0 + $0x30] sm:$0xff]   ;;  %v1512_v18 = vld [vmem:[%s2043_s0 + $0x38] sm:$0xff]  }
   0x7   :  { %1417 = vmatpush3.bf16.msra.mxu0 %v1495_v1  ;;  %1491 = vmatpush3.bf16.msra.mxu1 %v1495_v1  ;;  %v1511_v17 = vld [vmem:[%s2043_s0 + $0xb0] sm:$0xff]   ;;  %v1513_v19 = vld [vmem:[%s2043_s0 + $0xb8] sm:$0xff]   ;;  %v1514_v20 = vld [vmem:[%s2043_s0 + $0x40] sm:$0xff]  }
   0x8   :  { %1418 = vmatprep.subr.bf16.mxu0 %v1496_v2  ;;  %1488 = vmatprep.subr.bf16.mxu1 %v1496_v2  ;;  %v1515_v21 = vld [vmem:[%s2043_s0 + $0xc0] sm:$0xff]   ;;  %v1516_v22 = vld [vmem:[%s2043_s0 + $0x48] sm:$0xff]   ;;  %v1518_v24 = vld [vmem:[%s2043_s0 + $0x50] sm:$0xff]  }
   0x9   :  { %v1517_v23 = vld [vmem:[%s2043_s0 + $0xc8] sm:$0xff]   ;;  %v1519_v25 = vld [vmem:[%s2043_s0 + $0xd0] sm:$0xff]   ;;  %v1520_v26 = vld [vmem:[%s2043_s0 + $0x58] sm:$0xff]  }
   0xa   :  { %v1521_v27 = vld [vmem:[%s2043_s0 + $0xd8] sm:$0xff]   ;;  %v1522_v28 = vld [vmem:[%s2043_s0 + $0x60] sm:$0xff]   ;;  %v1524_v30 = vld [vmem:[%s2043_s0 + $0x68] sm:$0xff]  }
   0xb   :  { %1419 = vmatpush3.bf16.msra.mxu0 %v1496_v2  ;;  %1492 = vmatpush3.bf16.msra.mxu1 %v1496_v2  ;;  %v1523_v29 = vld [vmem:[%s2043_s0 + $0xe0] sm:$0xff]   ;;  %v1525_v31 = vld [vmem:[%s2043_s0 + $0xe8] sm:$0xff]   ;;  %v1526_v32 = vld [vmem:[%s2043_s0 + $0x70] sm:$0xff]  }
   0xc   :  { %1420 = vmatprep.subr.bf16.mxu0 %v1497_v5  ;;  %1489 = vmatprep.subr.bf16.mxu1 %v1497_v5  ;;  %v1527_v33 = vld [vmem:[%s2043_s0 + $0xf0] sm:$0xff]   ;;  %v1528_v34 = vld [vmem:[%s2043_s0 + $0x78] sm:$0xff]   ;;  %v1693_v36 = vld [vmem:[%s2044_s2] ss:$0 sm:$0xff] }
   0xd   :  { %v1529_v35 = vld [vmem:[%s2043_s0 + $0xf8] sm:$0xff]  }
   0xf   :  { %1421 = vmatpush3.bf16.msra.mxu0 %v1497_v5  ;;  %1493 = vmatpush3.bf16.msra.mxu1 %v1497_v5 }
  0x12   :  { %1423 = vmatmul.mubr.msk.bf16.vlgmr.msra.gmra.mxu0 %vm278_vm0, %v1500_v6  ;;  %1455 = vmatmul.mubr.msk.bf16.vlgmr.msra.gmra.mxu1 %vm278_vm0, %v1501_v7 }
  0x13   :  { %1426 = vmatprep.mubr.msk.bf16.mxu0 %vm278_vm0, %v1502_v8  ;;  %1458 = vmatprep.mubr.msk.bf16.mxu1 %vm278_vm0, %v1503_v9 }
  0x1a   :  { %1427 = vmatmul.mubr.msk.bf16.gmra.mxu0 %vm278_vm0, %v1504_v10  ;;  %1459 = vmatmul.mubr.msk.bf16.gmra.mxu1 %vm278_vm0, %v1505_v11 }
  0x1b   :  { %1430 = vmatprep.mubr.msk.bf16.mxu0 %vm278_vm0, %v1506_v12  ;;  %1462 = vmatprep.mubr.msk.bf16.mxu1 %vm278_vm0, %v1507_v13 }
  0x22   :  { %1431 = vmatmul.mubr.msk.bf16.gmra.mxu0 %vm278_vm0, %v1508_v14  ;;  %1463 = vmatmul.mubr.msk.bf16.gmra.mxu1 %vm278_vm0, %v1509_v15 }
  0x23   :  { %1434 = vmatprep.mubr.msk.bf16.mxu0 %vm278_vm0, %v1510_v16  ;;  %1466 = vmatprep.mubr.msk.bf16.mxu1 %vm278_vm0, %v1511_v17 }
  0x2a   :  { %1435 = vmatmul.mubr.msk.bf16.gmra.mxu0 %vm278_vm0, %v1512_v18  ;;  %1467 = vmatmul.mubr.msk.bf16.gmra.mxu1 %vm278_vm0, %v1513_v19 }
  0x2b   :  { %1438 = vmatprep.mubr.msk.bf16.mxu0 %vm278_vm0, %v1514_v20  ;;  %1470 = vmatprep.mubr.msk.bf16.mxu1 %vm278_vm0, %v1515_v21 }
  0x32   :  { %1439 = vmatmul.mubr.msk.bf16.gmra.mxu0 %vm278_vm0, %v1516_v22  ;;  %1471 = vmatmul.mubr.msk.bf16.gmra.mxu1 %vm278_vm0, %v1517_v23 }
  0x33   :  { %1442 = vmatprep.mubr.msk.bf16.mxu0 %vm278_vm0, %v1518_v24  ;;  %1474 = vmatprep.mubr.msk.bf16.mxu1 %vm278_vm0, %v1519_v25 }
  0x3a   :  { %1443 = vmatmul.mubr.msk.bf16.gmra.mxu0 %vm278_vm0, %v1520_v26  ;;  %1475 = vmatmul.mubr.msk.bf16.gmra.mxu1 %vm278_vm0, %v1521_v27 }
  0x3b   :  { %1446 = vmatprep.mubr.msk.bf16.mxu0 %vm278_vm0, %v1522_v28  ;;  %1478 = vmatprep.mubr.msk.bf16.mxu1 %vm278_vm0, %v1523_v29 }
  0x42   :  { %1447 = vmatmul.mubr.msk.bf16.gmra.mxu0 %vm278_vm0, %v1524_v30  ;;  %1479 = vmatmul.mubr.msk.bf16.gmra.mxu1 %vm278_vm0, %v1525_v31 }
  0x43   :  { %1450 = vmatprep.mubr.msk.bf16.mxu0 %vm278_vm0, %v1526_v32  ;;  %1482 = vmatprep.mubr.msk.bf16.mxu1 %vm278_vm0, %v1527_v33 }
  0x4a   :  { %1451 = vmatmul.mubr.msk.bf16.gmra.mxu0 %vm278_vm0, %v1528_v34  ;;  %1483 = vmatmul.mubr.msk.bf16.gmra.mxu1 %vm278_vm0, %v1529_v35 }
  0xd2   :  { %v1424_v37 = vpop.f32.mrf.mxu0  ;;  %v1456_v38 = vpop.f32.mrf.mxu1 }
  0xd3   :  { %v418_v39 = vadd.f32 %v1424_v37, %v1693_v36  ;;  %v546_v40 = vadd.f32 %v1456_v38, %v1693_v36 }
  0xd4   :  { %v409_v41 = vpop.f32.mrf.mxu0  ;;  %v537_v42 = vpop.f32.mrf.mxu1 }
  0xd5   :  { %vm666_vm1 = vcmp.ge.f32.partialorder %v418_v39, 0.0  ;;  %v730_v43 = vmul.f32 0.2, %v418_v39  ;;  %vm698_vm2 = vcmp.ge.f32.partialorder %v546_v40, 0.0  ;;  %v762_v44 = vmul.f32 0.2, %v546_v40 }
  0xd6   :  { %v410_v45 = vadd.f32 %v1693_v36, %v409_v41  ;;  %v538_v46 = vadd.f32 %v1693_v36, %v537_v42  ;;  %v1425_v47 = vpop.f32.mrf.mxu0  ;;  %v1457_v48 = vpop.f32.mrf.mxu1 }
  0xd7   :  { %v794_v49 = vsel %vm666_vm1, %v418_v39, %v730_v43  ;;  %v826_v50 = vsel %vm698_vm2, %v546_v40, %v762_v44  ;;  %v421_v51 = vadd.f32 %v1425_v47, %v1693_v36  ;;  %v549_v52 = vadd.f32 %v1457_v48, %v1693_v36 }
  0xd8   :  { %v1316_v53 = vpack.c.bf16 %v794_v49, %v794_v49  ;;  %v1348_v54 = vpack.c.bf16 %v826_v50, %v826_v50  ;;  %vm664_vm4 = vcmp.ge.f32.partialorder %v410_v45, 0.0  ;;  %v728_v55 = vmul.f32 0.2, %v410_v45  ;;  %v412_v56 = vpop.f32.mrf.mxu0  ;;  %v540_v57 = vpop.f32.mrf.mxu1 }
  0xd9   :  { %vm696_vm5 = vcmp.ge.f32.partialorder %v538_v46, 0.0  ;;  %v760_v58 = vmul.f32 0.2, %v538_v46  ;;  %vm667_vm6 = vcmp.ge.f32.partialorder %v421_v51, 0.0  ;;  %v731_v59 = vmul.f32 0.2, %v421_v51 }
  0xda   :  { %1115 = vst.msk [vmem:[%s2045_s3 + $0x8] sm:$0xf] %vm1112_vm3, %v1316_v53  ;;  %1147 = vst.msk [vmem:[%s2045_s3 + $0x88] sm:$0xf] %vm1112_vm3, %v1348_v54  ;;  %v792_v60 = vsel %vm664_vm4, %v410_v45, %v728_v55  ;;  %vm699_vm7 = vcmp.ge.f32.partialorder %v549_v52, 0.0  ;;  %v413_v62 = vadd.f32 %v1693_v36, %v412_v56  ;;  %v1428_v63 = vpop.f32.mrf.mxu0  ;;  %v1460_v0 = vpop.f32.mrf.mxu1  ;;  %v541_v4 = vadd.f32 %v1693_v36, %v540_v57 }
  0xdb   :  { %v763_v61 = vmul.f32 0.2, %v549_v52  ;;  %v1314_v1 = vpack.c.bf16 %v792_v60, %v792_v60  ;;  %v824_v2 = vsel %vm696_vm5, %v538_v46, %v760_v58  ;;  %v795_v3 = vsel %vm667_vm6, %v421_v51, %v731_v59 }
  0xdc   :  { %v1346_v5 = vpack.c.bf16 %v824_v2, %v824_v2  ;;  %v1317_v6 = vpack.c.bf16 %v795_v3, %v795_v3  ;;  %vm665_vm8 = vcmp.ge.f32.partialorder %v413_v62, 0.0  ;;  %v425_v8 = vpop.f32.mrf.mxu0  ;;  %v553_v9 = vpop.f32.mrf.mxu1  ;;  %v729_v11 = vmul.f32 0.2, %v413_v62 }
  0xdd   :  { %v827_v7 = vsel %vm699_vm7, %v549_v52, %v763_v61  ;;  %1113 = vst.msk [vmem:[%s2045_s3] sm:$0xf] %vm1112_vm3, %v1314_v1  ;;  %vm697_vm9 = vcmp.ge.f32.partialorder %v541_v4, 0.0  ;;  %v761_v12 = vmul.f32 0.2, %v541_v4  ;;  %v434_v13 = vadd.f32 %v1428_v63, %v1693_v36 }
  0xde   :  { %v1349_v10 = vpack.c.bf16 %v827_v7, %v827_v7  ;;  %1145 = vst.msk [vmem:[%s2045_s3 + $0x80] sm:$0xf] %vm1112_vm3, %v1346_v5  ;;  %1116 = vst.msk [vmem:[%s2045_s3 + $0xc] sm:$0xf] %vm1112_vm3, %v1317_v6  ;;  %v562_v14 = vadd.f32 %v1460_v0, %v1693_v36  ;;  %v426_v15 = vadd.f32 %v1693_v36, %v425_v8  ;;  %v1429_v17 = vpop.f32.mrf.mxu0  ;;  %v1461_v18 = vpop.f32.mrf.mxu1 }
  0xdf   :  { %v554_v16 = vadd.f32 %v1693_v36, %v553_v9  ;;  %v793_v19 = vsel %vm665_vm8, %v413_v62, %v729_v11  ;;  %v825_v20 = vsel %vm697_vm9, %v541_v4, %v761_v12  ;;  %v437_v21 = vadd.f32 %v1429_v17, %v1693_v36 }
  0xe0   :  { %1148 = vst.msk [vmem:[%s2045_s3 + $0x8c] sm:$0xf] %vm1112_vm3, %v1349_v10  ;;  %v565_v22 = vadd.f32 %v1461_v18, %v1693_v36  ;;  %v1315_v23 = vpack.c.bf16 %v793_v19, %v793_v19  ;;  %v1347_v24 = vpack.c.bf16 %v825_v20, %v825_v20  ;;  %vm670_vm10 = vcmp.ge.f32.partialorder %v434_v13, 0.0  ;;  %v428_v26 = vpop.f32.mrf.mxu0  ;;  %v556_v27 = vpop.f32.mrf.mxu1 }
  0xe1   :  { %v734_v25 = vmul.f32 0.2, %v434_v13  ;;  %vm702_vm11 = vcmp.ge.f32.partialorder %v562_v14, 0.0  ;;  %v766_v28 = vmul.f32 0.2, %v562_v14  ;;  %vm668_vm12 = vcmp.ge.f32.partialorder %v426_v15, 0.0 }
  0xe2   :  { %v732_v29 = vmul.f32 0.2, %v426_v15  ;;  %1114 = vst.msk [vmem:[%s2045_s3 + $0x4] sm:$0xf] %vm1112_vm3, %v1315_v23  ;;  %1146 = vst.msk [vmem:[%s2045_s3 + $0x84] sm:$0xf] %vm1112_vm3, %v1347_v24  ;;  %v1432_v32 = vpop.f32.mrf.mxu0  ;;  %v1464_v33 = vpop.f32.mrf.mxu1  ;;  %v429_v47 = vadd.f32 %v1693_v36, %v428_v26  ;;  %v557_v49 = vadd.f32 %v1693_v36, %v556_v27 }
  0xe3   :  { %v798_v30 = vsel %vm670_vm10, %v434_v13, %v734_v25  ;;  %vm700_vm13 = vcmp.ge.f32.partialorder %v554_v16, 0.0  ;;  %v764_v31 = vmul.f32 0.2, %v554_v16  ;;  %vm671_vm14 = vcmp.ge.f32.partialorder %v437_v21, 0.0 }
  0xe4   :  { %v1320_v34 = vpack.c.bf16 %v798_v30, %v798_v30  ;;  %v830_v35 = vsel %vm702_vm11, %v562_v14, %v766_v28  ;;  %v796_v37 = vsel %vm668_vm12, %v426_v15, %v732_v29  ;;  %v735_v38 = vmul.f32 0.2, %v437_v21  ;;  %v441_v42 = vpop.f32.mrf.mxu0  ;;  %v569_v43 = vpop.f32.mrf.mxu1 }
  0xe5   :  { %v1352_v39 = vpack.c.bf16 %v830_v35, %v830_v35  ;;  %v1318_v40 = vpack.c.bf16 %v796_v37, %v796_v37  ;;  %v828_v41 = vsel %vm700_vm13, %v554_v16, %v764_v31  ;;  %vm703_vm15 = vcmp.ge.f32.partialorder %v565_v22, 0.0 }
  0xe6   :  { %1119 = vst.msk [vmem:[%s2045_s3 + $0x18] sm:$0xf] %vm1112_vm3, %v1320_v34  ;;  %v1350_v44 = vpack.c.bf16 %v828_v41, %v828_v41  ;;  %v799_v45 = vsel %vm671_vm14, %v437_v21, %v735_v38  ;;  %v767_v46 = vmul.f32 0.2, %v565_v22  ;;  %v450_v50 = vadd.f32 %v1432_v32, %v1693_v36  ;;  %v1433_v52 = vpop.f32.mrf.mxu0  ;;  %v1465_v53 = vpop.f32.mrf.mxu1 }
  0xe7   :  { %1151 = vst.msk [vmem:[%s2045_s3 + $0x98] sm:$0xf] %vm1112_vm3, %v1352_v39  ;;  %1117 = vst.msk [vmem:[%s2045_s3 + $0x10] sm:$0xf] %vm1112_vm3, %v1318_v40  ;;  %v1321_v48 = vpack.c.bf16 %v799_v45, %v799_v45  ;;  %v578_v51 = vadd.f32 %v1464_v33, %v1693_v36  ;;  %vm669_vm0 = vcmp.ge.f32.partialorder %v429_v47, 0.0  ;;  %v442_v56 = vadd.f32 %v1693_v36, %v441_v42 }
  0xe8   :  { %1149 = vst.msk [vmem:[%s2045_s3 + $0x90] sm:$0xf] %vm1112_vm3, %v1350_v44  ;;  %v831_v54 = vsel %vm703_vm15, %v565_v22, %v767_v46  ;;  %v733_v55 = vmul.f32 0.2, %v429_v47  ;;  %vm701_vm1 = vcmp.ge.f32.partialorder %v557_v49, 0.0  ;;  %vm674_vm2 = vcmp.ge.f32.partialorder %v450_v50, 0.0  ;;  %v444_v59 = vpop.f32.mrf.mxu0  ;;  %v572_v60 = vpop.f32.mrf.mxu1 }
  0xe9   :  { %1120 = vst.msk [vmem:[%s2045_s3 + $0x1c] sm:$0xf] %vm1112_vm3, %v1321_v48  ;;  %v1353_v57 = vpack.c.bf16 %v831_v54, %v831_v54  ;;  %v765_v58 = vmul.f32 0.2, %v557_v49  ;;  %v738_v62 = vmul.f32 0.2, %v450_v50  ;;  %v570_v8 = vadd.f32 %v1693_v36, %v569_v43 }
  0xea   :  { %v797_v61 = vsel %vm669_vm0, %v429_v47, %v733_v55  ;;  %vm706_vm4 = vcmp.ge.f32.partialorder %v578_v51, 0.0  ;;  %v770_v63 = vmul.f32 0.2, %v578_v51  ;;  %vm672_vm5 = vcmp.ge.f32.partialorder %v442_v56, 0.0  ;;  %v1436_v3 = vpop.f32.mrf.mxu0  ;;  %v1468_v4 = vpop.f32.mrf.mxu1 }
  0xeb   :  { %1152 = vst.msk [vmem:[%s2045_s3 + $0x9c] sm:$0xf] %vm1112_vm3, %v1353_v57  ;;  %v1319_v0 = vpack.c.bf16 %v797_v61, %v797_v61  ;;  %v829_v1 = vsel %vm701_vm1, %v557_v49, %v765_v58  ;;  %v736_v2 = vmul.f32 0.2, %v442_v56  ;;  %v802_v6 = vsel %vm674_vm2, %v450_v50, %v738_v62 }
  0xec   :  { %v1351_v5 = vpack.c.bf16 %v829_v1, %v829_v1  ;;  %v834_v7 = vsel %vm706_vm4, %v578_v51, %v770_v63  ;;  %v1324_v9 = vpack.c.bf16 %v802_v6, %v802_v6  ;;  %v453_v12 = vadd.f32 %v1433_v52, %v1693_v36  ;;  %v457_v13 = vpop.f32.mrf.mxu0  ;;  %v585_v14 = vpop.f32.mrf.mxu1 }
  0xed   :  { %1118 = vst.msk [vmem:[%s2045_s3 + $0x14] sm:$0xf] %vm1112_vm3, %v1319_v0  ;;  %v1356_v10 = vpack.c.bf16 %v834_v7, %v834_v7  ;;  %v800_v11 = vsel %vm672_vm5, %v442_v56, %v736_v2  ;;  %vm704_vm6 = vcmp.ge.f32.partialorder %v570_v8, 0.0  ;;  %v768_v16 = vmul.f32 0.2, %v570_v8 }
  0xee   :  { %1150 = vst.msk [vmem:[%s2045_s3 + $0x94] sm:$0xf] %vm1112_vm3, %v1351_v5  ;;  %v1322_v15 = vpack.c.bf16 %v800_v11, %v800_v11  ;;  %v581_v17 = vadd.f32 %v1465_v53, %v1693_v36  ;;  %1123 = vst.msk [vmem:[%s2045_s3 + $0x28] sm:$0xf] %vm1112_vm3, %v1324_v9  ;;  %vm675_vm7 = vcmp.ge.f32.partialorder %v453_v12, 0.0  ;;  %v445_v19 = vadd.f32 %v1693_v36, %v444_v59  ;;  %v1437_v21 = vpop.f32.mrf.mxu0  ;;  %v1469_v22 = vpop.f32.mrf.mxu1 }
  0xef   :  { %1155 = vst.msk [vmem:[%s2045_s3 + $0xa8] sm:$0xf] %vm1112_vm3, %v1356_v10  ;;  %v739_v18 = vmul.f32 0.2, %v453_v12  ;;  %v573_v20 = vadd.f32 %v1693_v36, %v572_v60  ;;  %v832_v23 = vsel %vm704_vm6, %v570_v8, %v768_v16  ;;  %v466_v25 = vadd.f32 %v1436_v3, %v1693_v36 }
  0xf0   :  { %1121 = vst.msk [vmem:[%s2045_s3 + $0x20] sm:$0xf] %vm1112_vm3, %v1322_v15  ;;  %vm707_vm8 = vcmp.ge.f32.partialorder %v581_v17, 0.0  ;;  %v771_v24 = vmul.f32 0.2, %v581_v17  ;;  %v1354_v26 = vpack.c.bf16 %v832_v23, %v832_v23  ;;  %vm673_vm9 = vcmp.ge.f32.partialorder %v445_v19, 0.0  ;;  %v460_v29 = vpop.f32.mrf.mxu0  ;;  %v588_v30 = vpop.f32.mrf.mxu1 }
  0xf1   :  { %v803_v27 = vsel %vm675_vm7, %v453_v12, %v739_v18  ;;  %v737_v28 = vmul.f32 0.2, %v445_v19  ;;  %vm705_vm10 = vcmp.ge.f32.partialorder %v573_v20, 0.0  ;;  %v769_v33 = vmul.f32 0.2, %v573_v20 }
  0xf2   :  { %v1325_v31 = vpack.c.bf16 %v803_v27, %v803_v27  ;;  %v835_v32 = vsel %vm707_vm8, %v581_v17, %v771_v24  ;;  %1153 = vst.msk [vmem:[%s2045_s3 + $0xa0] sm:$0xf] %vm1112_vm3, %v1354_v26  ;;  %vm678_vm11 = vcmp.ge.f32.partialorder %v466_v25, 0.0  ;;  %v742_v37 = vmul.f32 0.2, %v466_v25  ;;  %v1440_v38 = vpop.f32.mrf.mxu0  ;;  %v1472_v39 = vpop.f32.mrf.mxu1 }
  0xf3   :  { %v1357_v34 = vpack.c.bf16 %v835_v32, %v835_v32  ;;  %v801_v35 = vsel %vm673_vm9, %v445_v19, %v737_v28  ;;  %v833_v41 = vsel %vm705_vm10, %v573_v20, %v769_v33  ;;  %v594_v42 = vadd.f32 %v1468_v4, %v1693_v36 }
  0xf4   :  { %1124 = vst.msk [vmem:[%s2045_s3 + $0x2c] sm:$0xf] %vm1112_vm3, %v1325_v31  ;;  %v1323_v40 = vpack.c.bf16 %v801_v35, %v801_v35  ;;  %v458_v43 = vadd.f32 %v1693_v36, %v457_v13  ;;  %v1355_v44 = vpack.c.bf16 %v833_v41, %v833_v41  ;;  %v806_v45 = vsel %vm678_vm11, %v466_v25, %v742_v37  ;;  %v473_v48 = vpop.f32.mrf.mxu0  ;;  %v601_v49 = vpop.f32.mrf.mxu1 }
  0xf5   :  { %1156 = vst.msk [vmem:[%s2045_s3 + $0xac] sm:$0xf] %vm1112_vm3, %v1357_v34  ;;  %v586_v46 = vadd.f32 %v1693_v36, %v585_v14  ;;  %v469_v47 = vadd.f32 %v1437_v21, %v1693_v36  ;;  %v1328_v50 = vpack.c.bf16 %v806_v45, %v806_v45  ;;  %vm710_vm12 = vcmp.ge.f32.partialorder %v594_v42, 0.0 }
  0xf6   :  { %1122 = vst.msk [vmem:[%s2045_s3 + $0x24] sm:$0xf] %vm1112_vm3, %v1323_v40  ;;  %v774_v51 = vmul.f32 0.2, %v594_v42  ;;  %vm676_vm13 = vcmp.ge.f32.partialorder %v458_v43, 0.0  ;;  %v1441_v54 = vpop.f32.mrf.mxu0  ;;  %v1473_v55 = vpop.f32.mrf.mxu1  ;;  %v597_v58 = vadd.f32 %v1469_v22, %v1693_v36  ;;  %v461_v59 = vadd.f32 %v1693_v36, %v460_v29 }
  0xf7   :  { %1154 = vst.msk [vmem:[%s2045_s3 + $0xa4] sm:$0xf] %vm1112_vm3, %v1355_v44  ;;  %v740_v52 = vmul.f32 0.2, %v458_v43  ;;  %vm708_vm14 = vcmp.ge.f32.partialorder %v586_v46, 0.0  ;;  %vm679_vm15 = vcmp.ge.f32.partialorder %v469_v47, 0.0  ;;  %v589_v63 = vadd.f32 %v1693_v36, %v588_v30 }
  0xf8   :  { %v772_v53 = vmul.f32 0.2, %v586_v46  ;;  %1127 = vst.msk [vmem:[%s2045_s3 + $0x38] sm:$0xf] %vm1112_vm3, %v1328_v50  ;;  %v838_v56 = vsel %vm710_vm12, %v594_v42, %v774_v51  ;;  %v743_v57 = vmul.f32 0.2, %v469_v47  ;;  %v1829_v0 = vpop.f32.mrf.mxu0  ;;  %v1831_v1 = vpop.f32.mrf.mxu1  ;;  %v482_v11 = vadd.f32 %v1440_v38, %v1693_v36 }
  0xf9   :  { %v1360_v60 = vpack.c.bf16 %v838_v56, %v838_v56  ;;  %v804_v61 = vsel %vm676_vm13, %v458_v43, %v740_v52  ;;  %vm711_vm0 = vcmp.ge.f32.partialorder %v597_v58, 0.0  ;;  %v775_v6 = vmul.f32 0.2, %v597_v58 }
  0xfa   :  { %v836_v62 = vsel %vm708_vm14, %v586_v46, %v772_v53  ;;  %v1326_v2 = vpack.c.bf16 %v804_v61, %v804_v61  ;;  %v807_v4 = vsel %vm679_vm15, %v469_v47, %v743_v57  ;;  %vm677_vm1 = vcmp.ge.f32.partialorder %v461_v59, 0.0  ;;  %v1444_v8 = vpop.f32.mrf.mxu0  ;;  %v1476_v9 = vpop.f32.mrf.mxu1 }
  0xfb   :  { %v1358_v3 = vpack.c.bf16 %v836_v62, %v836_v62  ;;  %1159 = vst.msk [vmem:[%s2045_s3 + $0xb8] sm:$0xf] %vm1112_vm3, %v1360_v60  ;;  %v1329_v5 = vpack.c.bf16 %v807_v4, %v807_v4  ;;  %v741_v7 = vmul.f32 0.2, %v461_v59  ;;  %vm709_vm2 = vcmp.ge.f32.partialorder %v589_v63, 0.0 }
  0xfc   :  { %1125 = vst.msk [vmem:[%s2045_s3 + $0x30] sm:$0xf] %vm1112_vm3, %v1326_v2  ;;  %v773_v10 = vmul.f32 0.2, %v589_v63  ;;  %v610_v12 = vadd.f32 %v1472_v39, %v1693_v36  ;;  %v839_v13 = vsel %vm711_vm0, %v597_v58, %v775_v6  ;;  %v474_v15 = vadd.f32 %v1693_v36, %v473_v48  ;;  %v489_v17 = vpop.f32.mrf.mxu0  ;;  %v1854_v18 = vpop.f32.mrf.mxu1 }
  0xfd   :  { %1157 = vst.msk [vmem:[%s2045_s3 + $0xb0] sm:$0xf] %vm1112_vm3, %v1358_v3  ;;  %1128 = vst.msk [vmem:[%s2045_s3 + $0x3c] sm:$0xf] %vm1112_vm3, %v1329_v5  ;;  %v805_v14 = vsel %vm677_vm1, %v461_v59, %v741_v7  ;;  %v602_v16 = vadd.f32 %v1693_v36, %v601_v49  ;;  %v1361_v19 = vpack.c.bf16 %v839_v13, %v839_v13  ;;  %vm682_vm4 = vcmp.ge.f32.partialorder %v482_v11, 0.0 }
  0xfe   :  { %v1327_v20 = vpack.c.bf16 %v805_v14, %v805_v14  ;;  %v837_v21 = vsel %vm709_vm2, %v589_v63, %v773_v10  ;;  %v746_v23 = vmul.f32 0.2, %v482_v11  ;;  %vm714_vm5 = vcmp.ge.f32.partialorder %v610_v12, 0.0  ;;  %v1856_v25 = vpop.f32.mrf.mxu0  ;;  %v1858_v26 = vpop.f32.mrf.mxu1 }
  0xff   :  { %v1359_v22 = vpack.c.bf16 %v837_v21, %v837_v21  ;;  %v778_v24 = vmul.f32 0.2, %v610_v12  ;;  %1160 = vst.msk [vmem:[%s2045_s3 + $0xbc] sm:$0xf] %vm1112_vm3, %v1361_v19  ;;  %vm680_vm6 = vcmp.ge.f32.partialorder %v474_v15, 0.0  ;;  %vm712_vm7 = vcmp.ge.f32.partialorder %v602_v16, 0.0 }
 0x100   :  { %1126 = vst.msk [vmem:[%s2045_s3 + $0x34] sm:$0xf] %vm1112_vm3, %v1327_v20  ;;  %v744_v27 = vmul.f32 0.2, %v474_v15  ;;  %v776_v28 = vmul.f32 0.2, %v602_v16  ;;  %v810_v29 = vsel %vm682_vm4, %v482_v11, %v746_v23  ;;  %v485_v31 = vadd.f32 %v1441_v54, %v1693_v36  ;;  %v1874_v33 = vpop.f32.mrf.mxu0  ;;  %v1876_v34 = vpop.f32.mrf.mxu1 }
 0x101   :  { %1158 = vst.msk [vmem:[%s2045_s3 + $0xb4] sm:$0xf] %vm1112_vm3, %v1359_v22  ;;  %v842_v30 = vsel %vm714_vm5, %v610_v12, %v778_v24  ;;  %v613_v32 = vadd.f32 %v1473_v55, %v1693_v36  ;;  %v1332_v35 = vpack.c.bf16 %v810_v29, %v810_v29  ;;  %v477_v46 = vadd.f32 %v1693_v36, %v1829_v0 }
 0x102   :  { %v1364_v37 = vpack.c.bf16 %v842_v30, %v842_v30  ;;  %v808_v38 = vsel %vm680_vm6, %v474_v15, %v744_v27  ;;  %v840_v39 = vsel %vm712_vm7, %v602_v16, %v776_v28  ;;  %vm683_vm8 = vcmp.ge.f32.partialorder %v485_v31, 0.0  ;;  %v1448_v43 = vpop.f32.mrf.mxu0  ;;  %v1878_v44 = vpop.f32.mrf.mxu1 }
 0x103   :  { %v1330_v40 = vpack.c.bf16 %v808_v38, %v808_v38  ;;  %v1362_v41 = vpack.c.bf16 %v840_v39, %v840_v39  ;;  %v747_v42 = vmul.f32 0.2, %v485_v31  ;;  %1131 = vst.msk [vmem:[%s2045_s3 + $0x48] sm:$0xf] %vm1112_vm3, %v1332_v35  ;;  %vm715_vm9 = vcmp.ge.f32.partialorder %v613_v32, 0.0 }
 0x104   :  { %1163 = vst.msk [vmem:[%s2045_s3 + $0xc8] sm:$0xf] %vm1112_vm3, %v1364_v37  ;;  %v779_v45 = vmul.f32 0.2, %v613_v32  ;;  %v605_v47 = vadd.f32 %v1693_v36, %v1831_v1  ;;  %v498_v49 = vadd.f32 %v1444_v8, %v1693_v36  ;;  %v626_v50 = vadd.f32 %v1476_v9, %v1693_v36  ;;  %v505_v57 = vpop.f32.mrf.mxu0  ;;  %v633_v58 = vpop.f32.mrf.mxu1 }
 0x105   :  { %1129 = vst.msk [vmem:[%s2045_s3 + $0x40] sm:$0xf] %vm1112_vm3, %v1330_v40  ;;  %1161 = vst.msk [vmem:[%s2045_s3 + $0xc0] sm:$0xf] %vm1112_vm3, %v1362_v41  ;;  %v811_v48 = vsel %vm683_vm8, %v485_v31, %v747_v42  ;;  %v490_v51 = vadd.f32 %v1693_v36, %v489_v17  ;;  %vm681_vm10 = vcmp.ge.f32.partialorder %v477_v46, 0.0  ;;  %v618_v4 = vadd.f32 %v1693_v36, %v1854_v18 }
 0x106   :  { %v1333_v52 = vpack.c.bf16 %v811_v48, %v811_v48  ;;  %v843_v53 = vsel %vm715_vm9, %v613_v32, %v779_v45  ;;  %v745_v54 = vmul.f32 0.2, %v477_v46  ;;  %vm713_vm11 = vcmp.ge.f32.partialorder %v605_v47, 0.0  ;;  %v1449_v9 = vpop.f32.mrf.mxu0  ;;  %v1481_v10 = vpop.f32.mrf.mxu1 }
 0x107   :  { %v1365_v55 = vpack.c.bf16 %v843_v53, %v843_v53  ;;  %v777_v56 = vmul.f32 0.2, %v605_v47  ;;  %vm686_vm12 = vcmp.ge.f32.partialorder %v498_v49, 0.0  ;;  %v750_v60 = vmul.f32 0.2, %v498_v49 }
 0x108   :  { %1132 = vst.msk [vmem:[%s2045_s3 + $0x4c] sm:$0xf] %vm1112_vm3, %v1333_v52  ;;  %v809_v59 = vsel %vm681_vm10, %v477_v46, %v745_v54  ;;  %vm718_vm13 = vcmp.ge.f32.partialorder %v626_v50, 0.0  ;;  %v782_v61 = vmul.f32 0.2, %v626_v50  ;;  %vm684_vm14 = vcmp.ge.f32.partialorder %v490_v51, 0.0  ;;  %v508_v23 = vpop.f32.mrf.mxu0  ;;  %v636_v24 = vpop.f32.mrf.mxu1 }
 0x109   :  { %1164 = vst.msk [vmem:[%s2045_s3 + $0xcc] sm:$0xf] %vm1112_vm3, %v1365_v55  ;;  %v1331_v62 = vpack.c.bf16 %v809_v59, %v809_v59  ;;  %v841_v63 = vsel %vm713_vm11, %v605_v47, %v777_v56  ;;  %v748_v0 = vmul.f32 0.2, %v490_v51  ;;  %v814_v2 = vsel %vm686_vm12, %v498_v49, %v750_v60 }
 0x10a   :  { %v1363_v1 = vpack.c.bf16 %v841_v63, %v841_v63  ;;  %v846_v3 = vsel %vm718_vm13, %v626_v50, %v782_v61  ;;  %v1336_v5 = vpack.c.bf16 %v814_v2, %v814_v2  ;;  %v501_v8 = vadd.f32 %v1856_v25, %v1693_v36  ;;  %v1452_v40 = vpop.f32.mrf.mxu0  ;;  %v1484_v41 = vpop.f32.mrf.mxu1 }
 0x10b   :  { %1130 = vst.msk [vmem:[%s2045_s3 + $0x44] sm:$0xf] %vm1112_vm3, %v1331_v62  ;;  %v1368_v6 = vpack.c.bf16 %v846_v3, %v846_v3  ;;  %v812_v7 = vsel %vm684_vm14, %v490_v51, %v748_v0  ;;  %vm716_vm15 = vcmp.ge.f32.partialorder %v618_v4, 0.0  ;;  %v780_v12 = vmul.f32 0.2, %v618_v4 }
 0x10c   :  { %1162 = vst.msk [vmem:[%s2045_s3 + $0xc4] sm:$0xf] %vm1112_vm3, %v1363_v1  ;;  %v1334_v11 = vpack.c.bf16 %v812_v7, %v812_v7  ;;  %v629_v13 = vadd.f32 %v1858_v26, %v1693_v36  ;;  %1135 = vst.msk [vmem:[%s2045_s3 + $0x58] sm:$0xf] %vm1112_vm3, %v1336_v5  ;;  %vm687_vm0 = vcmp.ge.f32.partialorder %v501_v8, 0.0  ;;  %v493_v15 = vadd.f32 %v1693_v36, %v1874_v33  ;;  %v521_v54 = vpop.f32.mrf.mxu0  ;;  %v649_v55 = vpop.f32.mrf.mxu1 }
 0x10d   :  { %1167 = vst.msk [vmem:[%s2045_s3 + $0xd8] sm:$0xf] %vm1112_vm3, %v1368_v6  ;;  %v751_v14 = vmul.f32 0.2, %v501_v8  ;;  %v621_v16 = vadd.f32 %v1693_v36, %v1876_v34  ;;  %v844_v17 = vsel %vm716_vm15, %v618_v4, %v780_v12  ;;  %v514_v19 = vadd.f32 %v1448_v43, %v1693_v36 }
 0x10e   :  { %1133 = vst.msk [vmem:[%s2045_s3 + $0x50] sm:$0xf] %vm1112_vm3, %v1334_v11  ;;  %vm719_vm1 = vcmp.ge.f32.partialorder %v629_v13, 0.0  ;;  %v783_v18 = vmul.f32 0.2, %v629_v13  ;;  %v1366_v20 = vpack.c.bf16 %v844_v17, %v844_v17  ;;  %vm685_vm2 = vcmp.ge.f32.partialorder %v493_v15, 0.0  ;;  %v1453_v5 = vpop.f32.mrf.mxu0  ;;  %v1485_v6 = vpop.f32.mrf.mxu1 }
 0x10f   :  { %v815_v21 = vsel %vm687_vm0, %v501_v8, %v751_v14  ;;  %v749_v22 = vmul.f32 0.2, %v493_v15  ;;  %vm717_vm4 = vcmp.ge.f32.partialorder %v621_v16, 0.0  ;;  %v781_v27 = vmul.f32 0.2, %v621_v16 }
 0x110   :  { %v1337_v25 = vpack.c.bf16 %v815_v21, %v815_v21  ;;  %v847_v26 = vsel %vm719_vm1, %v629_v13, %v783_v18  ;;  %1165 = vst.msk [vmem:[%s2045_s3 + $0xd0] sm:$0xf] %vm1112_vm3, %v1366_v20  ;;  %vm690_vm5 = vcmp.ge.f32.partialorder %v514_v19, 0.0  ;;  %v754_v30 = vmul.f32 0.2, %v514_v19  ;;  %v652_v20 = vpop.f32.mrf.mxu1 }
 0x111   :  { %v1369_v28 = vpack.c.bf16 %v847_v26, %v847_v26  ;;  %v813_v29 = vsel %vm685_vm2, %v493_v15, %v749_v22  ;;  %v845_v32 = vsel %vm717_vm4, %v621_v16, %v781_v27  ;;  %v642_v33 = vadd.f32 %v1878_v44, %v1693_v36 }
 0x112   :  { %1136 = vst.msk [vmem:[%s2045_s3 + $0x5c] sm:$0xf] %vm1112_vm3, %v1337_v25  ;;  %v1335_v31 = vpack.c.bf16 %v813_v29, %v813_v29  ;;  %v506_v34 = vadd.f32 %v1693_v36, %v505_v57  ;;  %v1367_v35 = vpack.c.bf16 %v845_v32, %v845_v32  ;;  %v818_v37 = vsel %vm690_vm5, %v514_v19, %v754_v30  ;;  %v524_v19 = vpop.f32.mrf.mxu0 }
 0x113   :  { %1168 = vst.msk [vmem:[%s2045_s3 + $0xdc] sm:$0xf] %vm1112_vm3, %v1369_v28  ;;  %v634_v38 = vadd.f32 %v1693_v36, %v633_v58  ;;  %v517_v39 = vadd.f32 %v1449_v9, %v1693_v36  ;;  %v1340_v42 = vpack.c.bf16 %v818_v37, %v818_v37  ;;  %vm722_vm6 = vcmp.ge.f32.partialorder %v642_v33, 0.0 }
 0x114   :  { %1134 = vst.msk [vmem:[%s2045_s3 + $0x54] sm:$0xf] %vm1112_vm3, %v1335_v31  ;;  %v786_v43 = vmul.f32 0.2, %v642_v33  ;;  %vm688_vm7 = vcmp.ge.f32.partialorder %v506_v34, 0.0  ;;  %v645_v48 = vadd.f32 %v1481_v10, %v1693_v36  ;;  %v509_v49 = vadd.f32 %v1693_v36, %v508_v23 }
 0x115   :  { %1166 = vst.msk [vmem:[%s2045_s3 + $0xd4] sm:$0xf] %vm1112_vm3, %v1367_v35  ;;  %v752_v44 = vmul.f32 0.2, %v506_v34  ;;  %vm720_vm8 = vcmp.ge.f32.partialorder %v634_v38, 0.0  ;;  %vm691_vm9 = vcmp.ge.f32.partialorder %v517_v39, 0.0  ;;  %v637_v53 = vadd.f32 %v1693_v36, %v636_v24 }
 0x116   :  { %v784_v45 = vmul.f32 0.2, %v634_v38  ;;  %1139 = vst.msk [vmem:[%s2045_s3 + $0x68] sm:$0xf] %vm1112_vm3, %v1340_v42  ;;  %v850_v46 = vsel %vm722_vm6, %v642_v33, %v786_v43  ;;  %v755_v47 = vmul.f32 0.2, %v517_v39  ;;  %v530_v63 = vadd.f32 %v1452_v40, %v1693_v36 }
 0x117   :  { %v1372_v50 = vpack.c.bf16 %v850_v46, %v850_v46  ;;  %v816_v51 = vsel %vm688_vm7, %v506_v34, %v752_v44  ;;  %vm723_vm10 = vcmp.ge.f32.partialorder %v645_v48, 0.0  ;;  %v787_v60 = vmul.f32 0.2, %v645_v48 }
 0x118   :  { %v848_v52 = vsel %vm720_vm8, %v634_v38, %v784_v45  ;;  %v1338_v56 = vpack.c.bf16 %v816_v51, %v816_v51  ;;  %v819_v58 = vsel %vm691_vm9, %v517_v39, %v755_v47  ;;  %vm689_vm11 = vcmp.ge.f32.partialorder %v509_v49, 0.0 }
 0x119   :  { %v1370_v57 = vpack.c.bf16 %v848_v52, %v848_v52  ;;  %1171 = vst.msk [vmem:[%s2045_s3 + $0xe8] sm:$0xf] %vm1112_vm3, %v1372_v50  ;;  %v1341_v59 = vpack.c.bf16 %v819_v58, %v819_v58  ;;  %v753_v61 = vmul.f32 0.2, %v509_v49  ;;  %vm721_vm12 = vcmp.ge.f32.partialorder %v637_v53, 0.0 }
 0x11a   :  { %1137 = vst.msk [vmem:[%s2045_s3 + $0x60] sm:$0xf] %vm1112_vm3, %v1338_v56  ;;  %v785_v62 = vmul.f32 0.2, %v637_v53  ;;  %v658_v0 = vadd.f32 %v1484_v41, %v1693_v36  ;;  %v851_v1 = vsel %vm723_vm10, %v645_v48, %v787_v60  ;;  %v522_v3 = vadd.f32 %v1693_v36, %v521_v54 }
 0x11b   :  { %1169 = vst.msk [vmem:[%s2045_s3 + $0xe0] sm:$0xf] %vm1112_vm3, %v1370_v57  ;;  %1140 = vst.msk [vmem:[%s2045_s3 + $0x6c] sm:$0xf] %vm1112_vm3, %v1341_v59  ;;  %v817_v2 = vsel %vm689_vm11, %v509_v49, %v753_v61  ;;  %v650_v4 = vadd.f32 %v1693_v36, %v649_v55  ;;  %v1373_v7 = vpack.c.bf16 %v851_v1, %v851_v1  ;;  %vm694_vm13 = vcmp.ge.f32.partialorder %v530_v63, 0.0 }
 0x11c   :  { %v1339_v8 = vpack.c.bf16 %v817_v2, %v817_v2  ;;  %v849_v9 = vsel %vm721_vm12, %v637_v53, %v785_v62  ;;  %v758_v11 = vmul.f32 0.2, %v530_v63  ;;  %vm726_vm14 = vcmp.ge.f32.partialorder %v658_v0, 0.0 }
 0x11d   :  { %v1371_v10 = vpack.c.bf16 %v849_v9, %v849_v9  ;;  %v790_v12 = vmul.f32 0.2, %v658_v0  ;;  %1172 = vst.msk [vmem:[%s2045_s3 + $0xec] sm:$0xf] %vm1112_vm3, %v1373_v7  ;;  %vm692_vm15 = vcmp.ge.f32.partialorder %v522_v3, 0.0  ;;  %vm724_vm0 = vcmp.ge.f32.partialorder %v650_v4, 0.0 }
 0x11e   :  { %1138 = vst.msk [vmem:[%s2045_s3 + $0x64] sm:$0xf] %vm1112_vm3, %v1339_v8  ;;  %v756_v13 = vmul.f32 0.2, %v522_v3  ;;  %v788_v14 = vmul.f32 0.2, %v650_v4  ;;  %v822_v15 = vsel %vm694_vm13, %v530_v63, %v758_v11  ;;  %v533_v17 = vadd.f32 %v1453_v5, %v1693_v36 }
 0x11f   :  { %1170 = vst.msk [vmem:[%s2045_s3 + $0xe4] sm:$0xf] %vm1112_vm3, %v1371_v10  ;;  %v854_v16 = vsel %vm726_vm14, %v658_v0, %v790_v12  ;;  %v661_v18 = vadd.f32 %v1485_v6, %v1693_v36  ;;  %v1344_v21 = vpack.c.bf16 %v822_v15, %v822_v15  ;;  %v525_v29 = vadd.f32 %v1693_v36, %v524_v19 }
 0x120   :  { %v1376_v22 = vpack.c.bf16 %v854_v16, %v854_v16  ;;  %v820_v23 = vsel %vm692_vm15, %v522_v3, %v756_v13  ;;  %v852_v24 = vsel %vm724_vm0, %v650_v4, %v788_v14  ;;  %vm695_vm1 = vcmp.ge.f32.partialorder %v533_v17, 0.0 }
 0x121   :  { %v1342_v25 = vpack.c.bf16 %v820_v23, %v820_v23  ;;  %v1374_v26 = vpack.c.bf16 %v852_v24, %v852_v24  ;;  %v759_v27 = vmul.f32 0.2, %v533_v17  ;;  %1143 = vst.msk [vmem:[%s2045_s3 + $0x78] sm:$0xf] %vm1112_vm3, %v1344_v21  ;;  %vm727_vm2 = vcmp.ge.f32.partialorder %v661_v18, 0.0 }
 0x122   :  { %1175 = vst.msk [vmem:[%s2045_s3 + $0xf8] sm:$0xf] %vm1112_vm3, %v1376_v22  ;;  %v791_v28 = vmul.f32 0.2, %v661_v18  ;;  %v653_v30 = vadd.f32 %v1693_v36, %v652_v20  ;;  %vm693_vm4 = vcmp.ge.f32.partialorder %v525_v29, 0.0 }
 0x123   :  { %1141 = vst.msk [vmem:[%s2045_s3 + $0x70] sm:$0xf] %vm1112_vm3, %v1342_v25  ;;  %1173 = vst.msk [vmem:[%s2045_s3 + $0xf0] sm:$0xf] %vm1112_vm3, %v1374_v26  ;;  %v823_v31 = vsel %vm695_vm1, %v533_v17, %v759_v27  ;;  %v757_v34 = vmul.f32 0.2, %v525_v29 }
 0x124   :  { %v1345_v32 = vpack.c.bf16 %v823_v31, %v823_v31  ;;  %v855_v33 = vsel %vm727_vm2, %v661_v18, %v791_v28  ;;  %vm725_vm5 = vcmp.ge.f32.partialorder %v653_v30, 0.0  ;;  %v789_v37 = vmul.f32 0.2, %v653_v30 }
 0x125   :  { %v1377_v35 = vpack.c.bf16 %v855_v33, %v855_v33  ;;  %v821_v36 = vsel %vm693_vm4, %v525_v29, %v757_v34 }
 0x126   :  { %1144 = vst.msk [vmem:[%s2045_s3 + $0x7c] sm:$0xf] %vm1112_vm3, %v1345_v32  ;;  %v1343_v38 = vpack.c.bf16 %v821_v36, %v821_v36  ;;  %v853_v39 = vsel %vm725_vm5, %v653_v30, %v789_v37 }
 0x127   :  { %1176 = vst.msk [vmem:[%s2045_s3 + $0xfc] sm:$0xf] %vm1112_vm3, %v1377_v35  ;;  %v1375_v40 = vpack.c.bf16 %v853_v39, %v853_v39 }
 0x128   :  { %1142 = vst.msk [vmem:[%s2045_s3 + $0x74] sm:$0xf] %vm1112_vm3, %v1343_v38 }
 0x129   :  { %1174 = vst.msk [vmem:[%s2045_s3 + $0xf4] sm:$0xf] %vm1112_vm3, %v1375_v40 }

// kernel: discriminator_forward.6
= control target key start
LH: loop header
LB: loop body
LE: loop exit
PB: predicated region body
PF: predicated region fallthrough
CT: control target
= control target key end

     0   :  { %vm349_vm0 = vcmask 261120   ;;  %s1184_s1 = inlined_call_operand.vmem [shape: bf16[256,32], index: 1, kind: input, shape index: {}]   ;;  %s1185_s0 = inlined_call_operand.vmem [shape: bf16[128,256], index: 0, kind: input, shape index: {}]   ;;  %s1186_s2 = inlined_call_operand.vmem [shape: f32[1,32], index: 2, kind: input, shape index: {}]   ;;  %s1187_s3 = inlined_call_operand.vmem [shape: f32[1,32], index: 3, kind: input, shape index: {}]   ;;  %s1188_s4 = inlined_call_operand.vmem [shape: f32[1,32], index: 4, kind: input, shape index: {}]   ;;  %s1189_s5 = inlined_call_operand.vmem [shape: bf16[128,32], index: 5, kind: output, shape index: {}]  }
   0x1   :  { %v786_v0 = vld [vmem:[%s1184_s1 + $0x78] sm:$0xff]   ;;  %v788_v2 = vld [vmem:[%s1184_s1 + $0x70] sm:$0xff]   ;;  %v790_v4 = vld [vmem:[%s1184_s1 + $0x68] sm:$0xff]  }
   0x2   :  { %v787_v1 = vld [vmem:[%s1184_s1 + $0x38] sm:$0xff]   ;;  %706 = vmatprep.subr.bf16.mxu0 %v786_v0  ;;  %770 = vmatprep.subr.bf16.mxu1 %v786_v0  ;;  %v789_v3 = vld [vmem:[%s1184_s1 + $0x30] sm:$0xff]   ;;  %v791_v5 = vld [vmem:[%s1184_s1 + $0x28] sm:$0xff]  }
   0x3   :  { %707 = vmatpush3.bf16.msra.mxu0 %v787_v1  ;;  %778 = vmatpush3.bf16.msra.mxu1 %v787_v1  ;;  %v792_v6 = vld [vmem:[%s1184_s1 + $0x60] sm:$0xff]   ;;  %v794_v8 = vld [vmem:[%s1184_s1 + $0x58] sm:$0xff]   ;;  %v796_v10 = vld [vmem:[%s1184_s1 + $0x50] sm:$0xff]  }
   0x4   :  { %708 = vmatprep.subr.bf16.mxu0 %v788_v2  ;;  %771 = vmatprep.subr.bf16.mxu1 %v788_v2  ;;  %v793_v7 = vld [vmem:[%s1184_s1 + $0x20] sm:$0xff]   ;;  %v795_v9 = vld [vmem:[%s1184_s1 + $0x18] sm:$0xff]   ;;  %v797_v12 = vld [vmem:[%s1184_s1 + $0x10] sm:$0xff]  }
   0x5   :  { %v804_v11 = vld [vmem:[%s1185_s0 + $0x4] ss:$8 sps:$4 sm:$0xff]   ;;  %v802_v18 = vld [vmem:[%s1185_s0] ss:$8 sps:$4 sm:$0xff]   ;;  %v805_v20 = vld [vmem:[%s1185_s0 + $0x14] ss:$8 sps:$4 sm:$0xff]  }
   0x6   :  { %v810_v13 = vld [vmem:[%s1185_s0 + $0x44] ss:$8 sps:$4 sm:$0xff]   ;;  %284 = vmatprep.mubr.bf16.mxu0 %v804_v11  ;;  %v808_v19 = vld [vmem:[%s1185_s0 + $0x40] ss:$8 sps:$4 sm:$0xff]   ;;  %v814_v21 = vld [vmem:[%s1185_s0 + $0x54] ss:$8 sps:$4 sm:$0xff]  }
   0x7   :  { %709 = vmatpush3.bf16.msra.mxu0 %v789_v3  ;;  %779 = vmatpush3.bf16.msra.mxu1 %v789_v3  ;;  %v798_v14 = vld [vmem:[%s1184_s1 + $0x48] sm:$0xff]   ;;  %v800_v16 = vld [vmem:[%s1184_s1 + $0x40] sm:$0xff]   ;;  %v807_v22 = vld [vmem:[%s1185_s0 + $0x10] ss:$8 sps:$4 sm:$0xff]  }
   0x8   :  { %710 = vmatprep.subr.bf16.mxu0 %v790_v4  ;;  %772 = vmatprep.subr.bf16.mxu1 %v790_v4  ;;  %v799_v15 = vld [vmem:[%s1184_s1 + $0x8] sm:$0xff]   ;;  %v801_v17 = vld [vmem:[%s1184_s1] sm:$0xff]   ;;  %v816_v23 = vld [vmem:[%s1185_s0 + $0x50] ss:$8 sps:$4 sm:$0xff]  }
   0x9   :  { %316 = vmatprep.mubr.bf16.mxu1 %v810_v13  ;;  %v811_v24 = vld [vmem:[%s1185_s0 + $0x24] ss:$8 sps:$4 sm:$0xff]   ;;  %v813_v26 = vld [vmem:[%s1185_s0 + $0x20] ss:$8 sps:$4 sm:$0xff]   ;;  %v817_v28 = vld [vmem:[%s1185_s0 + $0x34] ss:$8 sps:$4 sm:$0xff]  }
   0xa   :  { %v820_v25 = vld [vmem:[%s1185_s0 + $0x64] ss:$8 sps:$4 sm:$0xff]   ;;  %v822_v27 = vld [vmem:[%s1185_s0 + $0x60] ss:$8 sps:$4 sm:$0xff]   ;;  %v823_v29 = vld [vmem:[%s1185_s0 + $0x74] ss:$8 sps:$4 sm:$0xff]  }
   0xb   :  { %711 = vmatpush3.bf16.msra.mxu0 %v791_v5  ;;  %780 = vmatpush3.bf16.msra.mxu1 %v791_v5  ;;  %v819_v30 = vld [vmem:[%s1185_s0 + $0x30] ss:$8 sps:$4 sm:$0xff]   ;;  %v957_v51 = vld [vmem:[%s1186_s2] ss:$0 sm:$0xff] }
   0xc   :  { %712 = vmatprep.subr.bf16.mxu0 %v792_v6  ;;  %773 = vmatprep.subr.bf16.mxu1 %v792_v6  ;;  %v825_v31 = vld [vmem:[%s1185_s0 + $0x70] ss:$8 sps:$4 sm:$0xff]  }
   0xf   :  { %713 = vmatpush3.bf16.msra.mxu0 %v793_v7  ;;  %781 = vmatpush3.bf16.msra.mxu1 %v793_v7 }
  0x10   :  { %714 = vmatprep.subr.bf16.mxu0 %v794_v8  ;;  %774 = vmatprep.subr.bf16.mxu1 %v794_v8 }
  0x13   :  { %715 = vmatpush3.bf16.msra.mxu0 %v795_v9  ;;  %782 = vmatpush3.bf16.msra.mxu1 %v795_v9 }
  0x14   :  { %716 = vmatprep.subr.bf16.mxu0 %v796_v10  ;;  %775 = vmatprep.subr.bf16.mxu1 %v796_v10 }
  0x17   :  { %717 = vmatpush3.bf16.msra.mxu0 %v797_v12  ;;  %783 = vmatpush3.bf16.msra.mxu1 %v797_v12 }
  0x18   :  { %718 = vmatprep.subr.bf16.mxu0 %v798_v14  ;;  %776 = vmatprep.subr.bf16.mxu1 %v798_v14 }
  0x1b   :  { %719 = vmatpush3.bf16.msra.mxu0 %v799_v15  ;;  %784 = vmatpush3.bf16.msra.mxu1 %v799_v15 }
  0x1c   :  { %720 = vmatprep.subr.bf16.mxu0 %v800_v16  ;;  %777 = vmatprep.subr.bf16.mxu1 %v800_v16 }
  0x1f   :  { %721 = vmatpush3.bf16.msra.mxu0 %v801_v17  ;;  %785 = vmatpush3.bf16.msra.mxu1 %v801_v17 }
  0x22   :  { %285 = vmatmul.mubr.bf16.vlgmr.msra.gmra.mxu0 %v802_v18  ;;  %317 = vmatmul.mubr.bf16.vlgmr.msra.gmra.mxu1 %v808_v19 }
  0x23   :  { %292 = vmatprep.mubr.bf16.mxu0 %v805_v20  ;;  %324 = vmatprep.mubr.bf16.mxu1 %v814_v21 }
  0x2a   :  { %293 = vmatmul.mubr.bf16.gmra.mxu0 %v807_v22  ;;  %325 = vmatmul.mubr.bf16.gmra.mxu1 %v816_v23 }
  0x2b   :  { %300 = vmatprep.mubr.bf16.mxu0 %v811_v24  ;;  %332 = vmatprep.mubr.bf16.mxu1 %v820_v25 }
  0x32   :  { %301 = vmatmul.mubr.bf16.gmra.mxu0 %v813_v26  ;;  %333 = vmatmul.mubr.bf16.gmra.mxu1 %v822_v27 }
  0x33   :  { %308 = vmatprep.mubr.bf16.mxu0 %v817_v28  ;;  %340 = vmatprep.mubr.bf16.mxu1 %v823_v29 }
  0x3a   :  { %309 = vmatmul.mubr.bf16.gmra.mxu0 %v819_v30  ;;  %341 = vmatmul.mubr.bf16.gmra.mxu1 %v825_v31 }
  0xe2   :  { %v722_v32 = vpop.f32.mrf.mxu0  ;;  %v746_v33 = vpop.f32.mrf.mxu1 }
  0xe4   :  { %v723_v34 = vpop.f32.mrf.mxu0  ;;  %v747_v35 = vpop.f32.mrf.mxu1 }
  0xe5   :  { %v724_v49 = vadd.f32 %v723_v34, %v722_v32  ;;  %v748_v18 = vadd.f32 %v747_v35, %v746_v33 }
  0xe6   :  { %v725_v36 = vpop.f32.mrf.mxu0  ;;  %v749_v37 = vpop.f32.mrf.mxu1 }
  0xe7   :  { %v963_v58 = vadd.f32 %v724_v49, %v957_v51  ;;  %v995_v28 = vadd.f32 %v748_v18, %v957_v51 }
  0xe8   :  { %v726_v38 = vpop.f32.mrf.mxu0  ;;  %v750_v39 = vpop.f32.mrf.mxu1 }
  0xe9   :  { %v727_v46 = vadd.f32 %v726_v38, %v725_v36  ;;  %v350_v2 = vsel %vm349_vm0, %v963_v58, 0.0  ;;  %v751_v23 = vadd.f32 %v750_v39, %v749_v37  ;;  %v365_v37 = vsel %vm349_vm0, %v995_v28, 0.0 }
  0xea   :  { %v728_v40 = vpop.f32.mrf.mxu0  ;;  %v752_v41 = vpop.f32.mrf.mxu1 }
  0xeb   :  { %v960_v54 = vadd.f32 %v727_v46, %v957_v51  ;;  %v999_v32 = vadd.f32 %v751_v23, %v957_v51 }
  0xec   :  { %v729_v42 = vpop.f32.mrf.mxu0  ;;  %v753_v43 = vpop.f32.mrf.mxu1 }
  0xed   :  { %v730_v50 = vadd.f32 %v729_v42, %v728_v40  ;;  %v351_v63 = vsel %vm349_vm0, %v960_v54, 0.0  ;;  %v754_v29 = vadd.f32 %v753_v43, %v752_v41  ;;  %v367_v41 = vsel %vm349_vm0, %v999_v32, 0.0 }
  0xee   :  { %v731_v44 = vpop.f32.mrf.mxu0  ;;  %v755_v45 = vpop.f32.mrf.mxu1  ;;  %v352_v6 = vadd.f32 %v351_v63, %v350_v2 }
  0xef   :  { %v966_v59 = vadd.f32 %v730_v50, %v957_v51  ;;  %v327_v38 = vadd.f32 %v754_v29, %v957_v51 }
  0xf0   :  { %v732_v47 = vpop.f32.mrf.mxu0  ;;  %v756_v48 = vpop.f32.mrf.mxu1 }
  0xf1   :  { %v733_v55 = vadd.f32 %v732_v47, %v731_v44  ;;  %v353_v3 = vsel %vm349_vm0, %v966_v59, 0.0  ;;  %v757_v33 = vadd.f32 %v756_v48, %v755_v45  ;;  %v369_v45 = vsel %vm349_vm0, %v327_v38, 0.0 }
  0xf2   :  { %v734_v52 = vpop.f32.mrf.mxu0  ;;  %v758_v53 = vpop.f32.mrf.mxu1  ;;  %v354_v11 = vadd.f32 %v353_v3, %v352_v6 }
  0xf3   :  { %v971_v0 = vadd.f32 %v733_v55, %v957_v51  ;;  %v330_v42 = vadd.f32 %v757_v33, %v957_v51 }
  0xf4   :  { %v735_v56 = vpop.f32.mrf.mxu0  ;;  %v759_v57 = vpop.f32.mrf.mxu1 }
  0xf5   :  { %v736_v60 = vadd.f32 %v735_v56, %v734_v52  ;;  %v355_v9 = vsel %vm349_vm0, %v971_v0, 0.0  ;;  %v760_v39 = vadd.f32 %v759_v57, %v758_v53  ;;  %v371_v50 = vsel %vm349_vm0, %v330_v42, 0.0 }
  0xf6   :  { %v737_v61 = vpop.f32.mrf.mxu0  ;;  %v761_v62 = vpop.f32.mrf.mxu1  ;;  %v356_v15 = vadd.f32 %v355_v9, %v354_v11 }
  0xf7   :  { %v978_v4 = vadd.f32 %v736_v60, %v957_v51  ;;  %v335_v47 = vadd.f32 %v760_v39, %v957_v51 }
  0xf8   :  { %v738_v1 = vpop.f32.mrf.mxu0  ;;  %v762_v8 = vpop.f32.mrf.mxu1 }
  0xf9   :  { %v739_v5 = vadd.f32 %v738_v1, %v737_v61  ;;  %v357_v13 = vsel %vm349_vm0, %v978_v4, 0.0  ;;  %v763_v43 = vadd.f32 %v762_v8, %v761_v62  ;;  %v373_v56 = vsel %vm349_vm0, %v335_v47, 0.0 }
  0xfa   :  { %v740_v7 = vpop.f32.mrf.mxu0  ;;  %v764_v17 = vpop.f32.mrf.mxu1  ;;  %v358_v21 = vadd.f32 %v357_v13, %v356_v15 }
  0xfb   :  { %v983_v10 = vadd.f32 %v739_v5, %v957_v51  ;;  %v338_v52 = vadd.f32 %v763_v43, %v957_v51 }
  0xfc   :  { %v741_v12 = vpop.f32.mrf.mxu0  ;;  %v765_v27 = vpop.f32.mrf.mxu1 }
  0xfd   :  { %v742_v14 = vadd.f32 %v741_v12, %v740_v7  ;;  %v359_v19 = vsel %vm349_vm0, %v983_v10, 0.0  ;;  %v766_v48 = vadd.f32 %v765_v27, %v764_v17  ;;  %v375_v61 = vsel %vm349_vm0, %v338_v52, 0.0 }
  0xfe   :  { %v743_v16 = vpop.f32.mrf.mxu0  ;;  %v360_v26 = vadd.f32 %v359_v19, %v358_v21  ;;  %v767_v36 = vpop.f32.mrf.mxu1 }
  0xff   :  { %v990_v20 = vadd.f32 %v742_v14, %v957_v51  ;;  %v343_v57 = vadd.f32 %v766_v48, %v957_v51 }
 0x100   :  { %v744_v22 = vpop.f32.mrf.mxu0  ;;  %v768_v46 = vpop.f32.mrf.mxu1 }
 0x101   :  { %v361_v24 = vsel %vm349_vm0, %v990_v20, 0.0  ;;  %v745_v25 = vadd.f32 %v744_v22, %v743_v16  ;;  %v769_v53 = vadd.f32 %v768_v46, %v767_v36  ;;  %v377_v1 = vsel %vm349_vm0, %v343_v57, 0.0 }
 0x102   :  { %v362_v31 = vadd.f32 %v361_v24, %v360_v26 }
 0x103   :  { %v314_v30 = vadd.f32 %v745_v25, %v957_v51  ;;  %v346_v62 = vadd.f32 %v769_v53, %v957_v51 }
 0x105   :  { %v363_v34 = vsel %vm349_vm0, %v314_v30, 0.0  ;;  %v379_v3 = vsel %vm349_vm0, %v346_v62, 0.0 }
 0x106   :  { %v364_v35 = vadd.f32 %v363_v34, %v362_v31 }
 0x108   :  { %v366_v40 = vadd.f32 %v365_v37, %v364_v35 }
 0x10a   :  { %v368_v44 = vadd.f32 %v367_v41, %v366_v40 }
 0x10c   :  { %v370_v49 = vadd.f32 %v369_v45, %v368_v44 }
 0x10e   :  { %v372_v55 = vadd.f32 %v371_v50, %v370_v49 }
 0x110   :  { %v374_v60 = vadd.f32 %v373_v56, %v372_v55 }
 0x112   :  { %v376_v63 = vadd.f32 %v375_v61, %v374_v60 }
 0x114   :  { %v378_v2 = vadd.f32 %v377_v1, %v376_v63 }
 0x116   :  { %v380_v5 = vadd.f32 %v379_v3, %v378_v2 }
 0x118   :  { %v381_v6 = vrot.slane %v380_v5, 4 }
 0x11a   :  { %v382_v7 = vadd.f32 %v381_v6, %v380_v5 }
 0x11c   :  { %v383_v8 = vrot.slane %v382_v7, 2 }
 0x11e   :  { %v384_v9 = vadd.f32 %v383_v8, %v382_v7 }
 0x120   :  { %v385_v11 = vrot.slane %v384_v9, 1 }
 0x122   :  { %v386_v12 = vadd.f32 %v385_v11, %v384_v9 }
 0x124   :  { %v387_v13 = vmul.f32 0.0078125, %v386_v12 }
 0x126   :  { %v1019_v14 = vsub.f32 %v963_v58, %v387_v13  ;;  %v1022_v15 = vsub.f32 %v960_v54, %v387_v13  ;;  %v1025_v51 = vsub.f32 %v966_v59, %v387_v13  ;;  %v1028_v16 = vsub.f32 %v971_v0, %v387_v13 }
 0x127   :  { %v1035_v19 = vsub.f32 %v978_v4, %v387_v13  ;;  %v1040_v54 = vsub.f32 %v983_v10, %v387_v13  ;;  %v1047_v23 = vsub.f32 %v990_v20, %v387_v13  ;;  %v1052_v26 = vsub.f32 %v314_v30, %v387_v13 }
 0x128   :  { %v404_v17 = vmul.f32 %v1019_v14, %v1019_v14  ;;  %v405_v18 = vmul.f32 %v1022_v15, %v1022_v15  ;;  %v406_v58 = vmul.f32 %v1025_v51, %v1025_v51  ;;  %v407_v59 = vmul.f32 %v1028_v16, %v1028_v16 }
 0x129   :  { %v408_v4 = vmul.f32 %v1035_v19, %v1035_v19  ;;  %v409_v10 = vmul.f32 %v1040_v54, %v1040_v54  ;;  %v1058_v31 = vsub.f32 %v995_v28, %v387_v13  ;;  %v410_v20 = vmul.f32 %v1047_v23, %v1047_v23 }
 0x12a   :  { %v420_v0 = vsel %vm349_vm0, %v404_v17, 0.0  ;;  %v421_v21 = vsel %vm349_vm0, %v405_v18, 0.0  ;;  %v423_v24 = vsel %vm349_vm0, %v406_v58, 0.0  ;;  %v425_v27 = vsel %vm349_vm0, %v407_v59, 0.0 }
 0x12b   :  { %v422_v22 = vadd.f32 %v421_v21, %v420_v0  ;;  %v427_v33 = vsel %vm349_vm0, %v408_v4, 0.0  ;;  %v1064_v35 = vsub.f32 %v999_v32, %v387_v13  ;;  %v411_v30 = vmul.f32 %v1052_v26, %v1052_v26 }
 0x12c   :  { %v429_v36 = vsel %vm349_vm0, %v409_v10, 0.0  ;;  %v1069_v39 = vsub.f32 %v327_v38, %v387_v13  ;;  %v412_v28 = vmul.f32 %v1058_v31, %v1058_v31  ;;  %v431_v40 = vsel %vm349_vm0, %v410_v20, 0.0 }
 0x12d   :  { %v424_v25 = vadd.f32 %v423_v24, %v422_v22  ;;  %v399_v43 = vsub.f32 %v330_v42, %v387_v13  ;;  %v413_v44 = vmul.f32 %v1064_v35, %v1064_v35  ;;  %v433_v32 = vsel %vm349_vm0, %v411_v30, 0.0 }
 0x12e   :  { %v400_v45 = vsub.f32 %v335_v47, %v387_v13  ;;  %v414_v48 = vmul.f32 %v1069_v39, %v1069_v39  ;;  %v435_v38 = vsel %vm349_vm0, %v412_v28, 0.0  ;;  %v401_v50 = vsub.f32 %v338_v52, %v387_v13 }
 0x12f   :  { %v426_v29 = vadd.f32 %v425_v27, %v424_v25  ;;  %v415_v53 = vmul.f32 %v399_v43, %v399_v43  ;;  %v437_v55 = vsel %vm349_vm0, %v413_v44, 0.0  ;;  %v402_v60 = vsub.f32 %v343_v57, %v387_v13  ;;  %v458_v25 = vld [vmem:[%s1187_s3] sm:$0x1] }
 0x130   :  { %v416_v42 = vmul.f32 %v400_v45, %v400_v45  ;;  %v439_v61 = vsel %vm349_vm0, %v414_v48, 0.0  ;;  %v403_v1 = vsub.f32 %v346_v62, %v387_v13  ;;  %v417_v2 = vmul.f32 %v401_v50, %v401_v50  ;;  %v673_v44 = vld [vmem:[%s1188_s4] ss:$0 sm:$0xff] }
 0x131   :  { %v428_v34 = vadd.f32 %v427_v33, %v426_v29  ;;  %v441_v47 = vsel %vm349_vm0, %v415_v53, 0.0  ;;  %v418_v5 = vmul.f32 %v402_v60, %v402_v60  ;;  %v463_v4 = vlaneseq }
 0x132   :  { %v443_v6 = vsel %vm349_vm0, %v416_v42, 0.0  ;;  %v419_v8 = vmul.f32 %v403_v1, %v403_v1  ;;  %v445_v52 = vsel %vm349_vm0, %v417_v2, 0.0 }
 0x133   :  { %v430_v37 = vadd.f32 %v429_v36, %v428_v34  ;;  %v447_v11 = vsel %vm349_vm0, %v418_v5, 0.0  ;;  %v464_v24 = vshrl.u32 %v463_v4, 7 }
 0x134   :  { %v449_v12 = vsel %vm349_vm0, %v419_v8, 0.0 }
 0x135   :  { %v432_v41 = vadd.f32 %v431_v40, %v430_v37  ;;  %v465_v10 = vsub.s32 0, %v464_v24 }
 0x137   :  { %v434_v46 = vadd.f32 %v433_v32, %v432_v41 }
 0x139   :  { %v436_v49 = vadd.f32 %v435_v38, %v434_v46 }
 0x13b   :  { %v438_v56 = vadd.f32 %v437_v55, %v436_v49 }
 0x13d   :  { %v440_v63 = vadd.f32 %v439_v61, %v438_v56 }
 0x13f   :  { %v442_v3 = vadd.f32 %v441_v47, %v440_v63 }
 0x141   :  { %v444_v7 = vadd.f32 %v443_v6, %v442_v3 }
 0x143   :  { %v446_v9 = vadd.f32 %v445_v52, %v444_v7 }
 0x145   :  { %v448_v57 = vadd.f32 %v447_v11, %v446_v9 }
 0x147   :  { %v450_v17 = vadd.f32 %v449_v12, %v448_v57 }
 0x149   :  { %v451_v18 = vrot.slane %v450_v17, 4 }
 0x14b   :  { %v452_v62 = vadd.f32 %v451_v18, %v450_v17 }
 0x14d   :  { %v453_v13 = vrot.slane %v452_v62, 2 }
 0x14f   :  { %v454_v58 = vadd.f32 %v453_v13, %v452_v62 }
 0x151   :  { %v455_v59 = vrot.slane %v454_v58, 1 }
 0x153   :  { %v456_v0 = vadd.f32 %v455_v59, %v454_v58 }
 0x155   :  { %v457_v21 = vmul.f32 0.0078125, %v456_v0 }
 0x157   :  { %v459_v22 = vadd.f32 1e-05, %v457_v21 }
 0x159   :  { %826 = vrsqrt.f32 %v459_v22 }
 0x166   :  { %v827_v27 = vpop.eup %826 }
 0x167   :  { %v461_v29 = vmul.f32 %v827_v27, %v458_v25 }
 0x169   :  { %v466_v20 = vrot.slane %v461_v29, %v465_v10 }
 0x16b   :  { %v468_v33 = vmul.f32 %v466_v20, %v1019_v14  ;;  %v469_v34 = vmul.f32 %v466_v20, %v1022_v15  ;;  %v470_v30 = vmul.f32 %v466_v20, %v1025_v51  ;;  %v471_v36 = vmul.f32 %v466_v20, %v1028_v16 }
 0x16c   :  { %v472_v37 = vmul.f32 %v466_v20, %v1035_v19  ;;  %v473_v28 = vmul.f32 %v466_v20, %v1040_v54  ;;  %v474_v40 = vmul.f32 %v466_v20, %v1047_v23  ;;  %v475_v41 = vmul.f32 %v466_v20, %v1052_v26 }
 0x16d   :  { %v476_v14 = vmul.f32 %v466_v20, %v1058_v31  ;;  %v477_v15 = vmul.f32 %v466_v20, %v1064_v35  ;;  %v478_v51 = vmul.f32 %v466_v20, %v1069_v39  ;;  %v479_v32 = vmul.f32 %v466_v20, %v399_v43 }
 0x16e   :  { %v480_v16 = vmul.f32 %v466_v20, %v400_v45  ;;  %v481_v46 = vmul.f32 %v466_v20, %v401_v50  ;;  %v482_v19 = vmul.f32 %v466_v20, %v402_v60  ;;  %v483_v48 = vmul.f32 %v466_v20, %v403_v1 }
 0x16f   :  { %v491_v54 = vadd.f32 %v673_v44, %v468_v33  ;;  %v492_v38 = vadd.f32 %v673_v44, %v469_v34  ;;  %v493_v23 = vadd.f32 %v673_v44, %v470_v30  ;;  %v494_v49 = vadd.f32 %v673_v44, %v471_v36 }
 0x170   :  { %v495_v26 = vadd.f32 %v673_v44, %v472_v37  ;;  %v496_v53 = vadd.f32 %v673_v44, %v473_v28  ;;  %v497_v55 = vadd.f32 %v673_v44, %v474_v40  ;;  %v498_v56 = vadd.f32 %v673_v44, %v475_v41 }
 0x171   :  { %v499_v42 = vadd.f32 %v673_v44, %v476_v14  ;;  %v500_v61 = vadd.f32 %v673_v44, %v477_v15  ;;  %v501_v31 = vadd.f32 %v673_v44, %v478_v51  ;;  %v502_v63 = vadd.f32 %v673_v44, %v479_v32 }
 0x172   :  { %v503_v35 = vadd.f32 %v673_v44, %v480_v16  ;;  %v504_v2 = vadd.f32 %v673_v44, %v481_v46  ;;  %v505_v39 = vadd.f32 %v673_v44, %v482_v19  ;;  %v506_v43 = vadd.f32 %v673_v44, %v483_v48 }
 0x173   :  { %vm508_vm2 = vcmp.ge.f32.partialorder %v492_v38, 0.0  ;;  %vm509_vm3 = vcmp.ge.f32.partialorder %v493_v23, 0.0  ;;  %vm510_vm4 = vcmp.ge.f32.partialorder %v494_v49, 0.0  ;;  %vm511_vm5 = vcmp.ge.f32.partialorder %v495_v26, 0.0 }
 0x174   :  { %vm512_vm6 = vcmp.ge.f32.partialorder %v496_v53, 0.0  ;;  %vm514_vm8 = vcmp.ge.f32.partialorder %v498_v56, 0.0  ;;  %vm515_vm9 = vcmp.ge.f32.partialorder %v499_v42, 0.0  ;;  %vm516_vm10 = vcmp.ge.f32.partialorder %v500_v61, 0.0 }
 0x175   :  { %vm517_vm11 = vcmp.ge.f32.partialorder %v501_v31, 0.0  ;;  %vm518_vm12 = vcmp.ge.f32.partialorder %v502_v63, 0.0  ;;  %vm519_vm13 = vcmp.ge.f32.partialorder %v503_v35, 0.0  ;;  %vm520_vm14 = vcmp.ge.f32.partialorder %v504_v2, 0.0 }
 0x176   :  { %vm521_vm15 = vcmp.ge.f32.partialorder %v505_v39, 0.0  ;;  %vm522_vm0 = vcmp.ge.f32.partialorder %v506_v43, 0.0  ;;  %v523_v45 = vmul.f32 0.2, %v491_v54  ;;  %v524_v50 = vmul.f32 0.2, %v492_v38 }
 0x177   :  { %v525_v60 = vmul.f32 0.2, %v493_v23  ;;  %v526_v1 = vmul.f32 0.2, %v494_v49  ;;  %v527_v47 = vmul.f32 0.2, %v495_v26 }
 0x178   :  { %v528_v3 = vmul.f32 0.2, %v496_v53  ;;  %v529_v5 = vmul.f32 0.2, %v497_v55  ;;  %v530_v6 = vmul.f32 0.2, %v498_v56  ;;  %v540_v57 = vsel %vm508_vm2, %v492_v38, %v524_v50 }
 0x179   :  { %v531_v7 = vmul.f32 0.2, %v499_v42  ;;  %vm1190_vm7 = vcmp.ge.f32.partialorder %v491_v54, 0.0  ;;  %v532_v52 = vmul.f32 0.2, %v500_v61  ;;  %v541_v62 = vsel %vm509_vm3, %v493_v23, %v525_v60 }
 0x17a   :  { %v539_v8 = vsel %vm1190_vm7, %v491_v54, %v523_v45  ;;  %v533_v9 = vmul.f32 0.2, %v501_v31  ;;  %v534_v11 = vmul.f32 0.2, %v502_v63  ;;  %v535_v12 = vmul.f32 0.2, %v503_v35 }
 0x17b   :  { %v536_v17 = vmul.f32 0.2, %v504_v2  ;;  %v537_v18 = vmul.f32 0.2, %v505_v39  ;;  %v538_v13 = vmul.f32 0.2, %v506_v43  ;;  %v542_v58 = vsel %vm510_vm4, %v494_v49, %v526_v1 }
 0x17c   :  { %v543_v59 = vsel %vm511_vm5, %v495_v26, %v527_v47  ;;  %v544_v0 = vsel %vm512_vm6, %v496_v53, %v528_v3  ;;  %vm1191_vm1 = vcmp.ge.f32.partialorder %v497_v55, 0.0  ;;  %v546_v22 = vsel %vm514_vm8, %v498_v56, %v530_v6 }
 0x17d   :  { %v545_v21 = vsel %vm1191_vm1, %v497_v55, %v529_v5  ;;  %v547_v4 = vsel %vm515_vm9, %v499_v42, %v531_v7  ;;  %v548_v24 = vsel %vm516_vm10, %v500_v61, %v532_v52  ;;  %v549_v25 = vsel %vm517_vm11, %v501_v31, %v533_v9 }
 0x17e   :  { %v550_v10 = vsel %vm518_vm12, %v502_v63, %v534_v11  ;;  %v551_v27 = vsel %vm519_vm13, %v503_v35, %v535_v12  ;;  %v552_v29 = vsel %vm520_vm14, %v504_v2, %v536_v17  ;;  %v553_v20 = vsel %vm521_vm15, %v505_v39, %v537_v18 }
 0x17f   :  { %v554_v33 = vsel %vm522_vm0, %v506_v43, %v538_v13  ;;  %v690_v34 = vpack.c.bf16 %v539_v8, %v539_v8  ;;  %v691_v30 = vpack.c.bf16 %v540_v57, %v540_v57  ;;  %v692_v36 = vpack.c.bf16 %v541_v62, %v541_v62 }
 0x180   :  { %v693_v37 = vpack.c.bf16 %v542_v58, %v542_v58  ;;  %v694_v28 = vpack.c.bf16 %v543_v59, %v543_v59  ;;  %v695_v40 = vpack.c.bf16 %v544_v0, %v544_v0  ;;  %v696_v41 = vpack.c.bf16 %v545_v21, %v545_v21 }
 0x181   :  { %v697_v44 = vpack.c.bf16 %v546_v22, %v546_v22  ;;  %v698_v14 = vpack.c.bf16 %v547_v4, %v547_v4  ;;  %v699_v15 = vpack.c.bf16 %v548_v24, %v548_v24  ;;  %vm1192_vm1 = vcmask 257024  }
 0x182   :  { %620 = vst.msk [vmem:[%s1189_s5] sm:$0xf] %vm1192_vm1, %v690_v34  ;;  %vm1193_vm2 = vmmov %vm1192_vm1  ;;  %v700_v51 = vpack.c.bf16 %v549_v25, %v549_v25  ;;  %v701_v32 = vpack.c.bf16 %v550_v10, %v550_v10  ;;  %v702_v16 = vpack.c.bf16 %v551_v27, %v551_v27  ;;  %v703_v46 = vpack.c.bf16 %v552_v29, %v552_v29 }
 0x183   :  { %621 = vst.msk [vmem:[%s1189_s5 + $0x4] sm:$0xf] %vm1193_vm2, %v691_v30  ;;  %vm1194_vm3 = vmmov %vm1192_vm1  ;;  %v704_v19 = vpack.c.bf16 %v553_v20, %v553_v20  ;;  %v705_v48 = vpack.c.bf16 %v554_v33, %v554_v33 }
 0x184   :  { %622 = vst.msk [vmem:[%s1189_s5 + $0x8] sm:$0xf] %vm1194_vm3, %v692_v36  ;;  %vm1195_vm4 = vmmov %vm1192_vm1 }
 0x185   :  { %623 = vst.msk [vmem:[%s1189_s5 + $0xc] sm:$0xf] %vm1195_vm4, %v693_v37  ;;  %vm1196_vm5 = vmmov %vm1192_vm1 }
 0x186   :  { %624 = vst.msk [vmem:[%s1189_s5 + $0x10] sm:$0xf] %vm1196_vm5, %v694_v28  ;;  %vm1197_vm6 = vmmov %vm1192_vm1 }
 0x187   :  { %625 = vst.msk [vmem:[%s1189_s5 + $0x14] sm:$0xf] %vm1197_vm6, %v695_v40  ;;  %vm1198_vm7 = vmmov %vm1192_vm1 }
 0x188   :  { %626 = vst.msk [vmem:[%s1189_s5 + $0x18] sm:$0xf] %vm1198_vm7, %v696_v41  ;;  %vm1199_vm8 = vmmov %vm1192_vm1 }
 0x189   :  { %627 = vst.msk [vmem:[%s1189_s5 + $0x1c] sm:$0xf] %vm1199_vm8, %v697_v44  ;;  %vm1200_vm9 = vmmov %vm1192_vm1 }
 0x18a   :  { %628 = vst.msk [vmem:[%s1189_s5 + $0x20] sm:$0xf] %vm1200_vm9, %v698_v14  ;;  %vm1201_vm10 = vmmov %vm1192_vm1 }
 0x18b   :  { %629 = vst.msk [vmem:[%s1189_s5 + $0x24] sm:$0xf] %vm1201_vm10, %v699_v15  ;;  %vm1202_vm11 = vmmov %vm1192_vm1 }
 0x18c   :  { %630 = vst.msk [vmem:[%s1189_s5 + $0x28] sm:$0xf] %vm1202_vm11, %v700_v51  ;;  %vm1203_vm12 = vmmov %vm1192_vm1 }
 0x18d   :  { %631 = vst.msk [vmem:[%s1189_s5 + $0x2c] sm:$0xf] %vm1203_vm12, %v701_v32  ;;  %vm1204_vm13 = vmmov %vm1192_vm1 }
 0x18e   :  { %632 = vst.msk [vmem:[%s1189_s5 + $0x30] sm:$0xf] %vm1204_vm13, %v702_v16  ;;  %vm1205_vm14 = vmmov %vm1192_vm1 }
 0x18f   :  { %633 = vst.msk [vmem:[%s1189_s5 + $0x34] sm:$0xf] %vm1205_vm14, %v703_v46  ;;  %vm1206_vm15 = vmmov %vm1192_vm1 }
 0x190   :  { %634 = vst.msk [vmem:[%s1189_s5 + $0x38] sm:$0xf] %vm1206_vm15, %v704_v19  ;;  %vm1207_vm0 = vmmov %vm1192_vm1 }
 0x191   :  { %635 = vst.msk [vmem:[%s1189_s5 + $0x3c] sm:$0xf] %vm1207_vm0, %v705_v48 }

// kernel: discriminator_forward.7
= control target key start
LH: loop header
LB: loop body
LE: loop exit
PB: predicated region body
PF: predicated region fallthrough
CT: control target
= control target key end

     0   :  { %vm430_vm0 = vcmask 523264   ;;  %vm520_vm5 = vcmask 519168   ;;  %s860_s1 = inlined_call_operand.vmem [shape: bf16[512,64], index: 1, kind: input, shape index: {}]   ;;  %s861_s0 = inlined_call_operand.vmem [shape: bf16[32,512], index: 0, kind: input, shape index: {}]   ;;  %s862_s2 = inlined_call_operand.vmem [shape: f32[1,64], index: 2, kind: input, shape index: {}]   ;;  %s863_s3 = inlined_call_operand.vmem [shape: f32[1,64], index: 3, kind: input, shape index: {}]   ;;  %s864_s4 = inlined_call_operand.vmem [shape: f32[1,64], index: 4, kind: input, shape index: {}]   ;;  %s865_s5 = inlined_call_operand.vmem [shape: bf16[32,64], index: 5, kind: output, shape index: {}]  }
   0x1   :  { %v635_v0 = vld [vmem:[%s860_s1 + $0x78] sm:$0xff]   ;;  %v639_v4 = vld [vmem:[%s860_s1 + $0x70] sm:$0xff]   ;;  %v643_v8 = vld [vmem:[%s860_s1 + $0x68] sm:$0xff]  }
   0x2   :  { %v636_v1 = vld [vmem:[%s860_s1 + $0xf8] sm:$0xff]   ;;  %579 = vmatprep.subr.bf16.mxu0 %v635_v0  ;;  %v640_v5 = vld [vmem:[%s860_s1 + $0xf0] sm:$0xff]   ;;  %v644_v9 = vld [vmem:[%s860_s1 + $0xe8] sm:$0xff]  }
   0x3   :  { %v637_v2 = vld [vmem:[%s860_s1 + $0x38] sm:$0xff]   ;;  %607 = vmatprep.subr.bf16.mxu1 %v636_v1  ;;  %v641_v6 = vld [vmem:[%s860_s1 + $0x30] sm:$0xff]   ;;  %v645_v10 = vld [vmem:[%s860_s1 + $0x28] sm:$0xff]  }
   0x4   :  { %v638_v3 = vld [vmem:[%s860_s1 + $0xb8] sm:$0xff]   ;;  %580 = vmatpush3.bf16.msra.mxu0 %v637_v2  ;;  %v642_v7 = vld [vmem:[%s860_s1 + $0xb0] sm:$0xff]   ;;  %v646_v11 = vld [vmem:[%s860_s1 + $0xa8] sm:$0xff]  }
   0x5   :  { %608 = vmatpush3.bf16.msra.mxu1 %v638_v3  ;;  %581 = vmatprep.subr.bf16.mxu0 %v639_v4  ;;  %v647_v12 = vld [vmem:[%s860_s1 + $0x60] sm:$0xff]   ;;  %v651_v16 = vld [vmem:[%s860_s1 + $0x58] sm:$0xff]   ;;  %v655_v20 = vld [vmem:[%s860_s1 + $0x50] sm:$0xff]  }
   0x6   :  { %609 = vmatprep.subr.bf16.mxu1 %v640_v5  ;;  %v648_v13 = vld [vmem:[%s860_s1 + $0xe0] sm:$0xff]   ;;  %v652_v17 = vld [vmem:[%s860_s1 + $0xd8] sm:$0xff]   ;;  %v656_v21 = vld [vmem:[%s860_s1 + $0xd0] sm:$0xff]  }
   0x7   :  { %v649_v14 = vld [vmem:[%s860_s1 + $0x20] sm:$0xff]   ;;  %v653_v18 = vld [vmem:[%s860_s1 + $0x18] sm:$0xff]   ;;  %v657_v22 = vld [vmem:[%s860_s1 + $0x10] sm:$0xff]  }
   0x8   :  { %582 = vmatpush3.bf16.msra.mxu0 %v641_v6  ;;  %v650_v15 = vld [vmem:[%s860_s1 + $0xa0] sm:$0xff]   ;;  %v654_v19 = vld [vmem:[%s860_s1 + $0x98] sm:$0xff]   ;;  %v658_v23 = vld [vmem:[%s860_s1 + $0x90] sm:$0xff]  }
   0x9   :  { %610 = vmatpush3.bf16.msra.mxu1 %v642_v7  ;;  %583 = vmatprep.subr.bf16.mxu0 %v643_v8  ;;  %v659_v24 = vld [vmem:[%s860_s1 + $0x48] sm:$0xff]   ;;  %v663_v28 = vld [vmem:[%s860_s1 + $0x40] sm:$0xff]  }
   0xa   :  { %611 = vmatprep.subr.bf16.mxu1 %v644_v9  ;;  %v660_v25 = vld [vmem:[%s860_s1 + $0xc8] sm:$0xff]   ;;  %v664_v29 = vld [vmem:[%s860_s1 + $0xc0] sm:$0xff]  }
   0xb   :  { %v661_v26 = vld [vmem:[%s860_s1 + $0x8] sm:$0xff]   ;;  %v665_v30 = vld [vmem:[%s860_s1] sm:$0xff]  }
   0xc   :  { %584 = vmatpush3.bf16.msra.mxu0 %v645_v10  ;;  %v662_v27 = vld [vmem:[%s860_s1 + $0x88] sm:$0xff]   ;;  %v666_v31 = vld [vmem:[%s860_s1 + $0x80] sm:$0xff]  }
   0xd   :  { %612 = vmatpush3.bf16.msra.mxu1 %v646_v11  ;;  %585 = vmatprep.subr.bf16.mxu0 %v647_v12  ;;  %v667_v32 = vld [vmem:[%s861_s0] ss:$16 sps:$4 sm:$0xff]   ;;  %v669_v33 = vld [vmem:[%s861_s0 + $0x4] ss:$16 sps:$4 sm:$0xff]   ;;  %v670_v34 = vld [vmem:[%s861_s0 + $0x8] ss:$16 sps:$4 sm:$0xff]  }
   0xe   :  { %613 = vmatprep.subr.bf16.mxu1 %v648_v13  ;;  %v672_v35 = vld [vmem:[%s861_s0 + $0xc] ss:$16 sps:$4 sm:$0xff]   ;;  %364 = vmatprep.mubr.bf16.mxu0 %v669_v33  ;;  %v673_v36 = vld [vmem:[%s861_s0 + $0x24] ss:$16 sps:$4 sm:$0xff]   ;;  %v677_v38 = vld [vmem:[%s861_s0 + $0x20] ss:$16 sps:$4 sm:$0xff]  }
   0xf   :  { %413 = vmatprep.mubr.bf16.mxu1 %v672_v35  ;;  %v675_v37 = vld [vmem:[%s861_s0 + $0x2c] ss:$16 sps:$4 sm:$0xff]   ;;  %v678_v39 = vld [vmem:[%s861_s0 + $0x28] ss:$16 sps:$4 sm:$0xff]   ;;  %v529_v47 = vld [vmem:[%s862_s2] ss:$0 sm:$0xff] }
  0x10   :  { %586 = vmatpush3.bf16.msra.mxu0 %v649_v14 }
  0x11   :  { %614 = vmatpush3.bf16.msra.mxu1 %v650_v15  ;;  %587 = vmatprep.subr.bf16.mxu0 %v651_v16 }
  0x12   :  { %615 = vmatprep.subr.bf16.mxu1 %v652_v17 }
  0x14   :  { %588 = vmatpush3.bf16.msra.mxu0 %v653_v18 }
  0x15   :  { %616 = vmatpush3.bf16.msra.mxu1 %v654_v19  ;;  %589 = vmatprep.subr.bf16.mxu0 %v655_v20 }
  0x16   :  { %617 = vmatprep.subr.bf16.mxu1 %v656_v21 }
  0x18   :  { %590 = vmatpush3.bf16.msra.mxu0 %v657_v22 }
  0x19   :  { %618 = vmatpush3.bf16.msra.mxu1 %v658_v23  ;;  %591 = vmatprep.subr.bf16.mxu0 %v659_v24 }
  0x1a   :  { %619 = vmatprep.subr.bf16.mxu1 %v660_v25 }
  0x1c   :  { %592 = vmatpush3.bf16.msra.mxu0 %v661_v26 }
  0x1d   :  { %620 = vmatpush3.bf16.msra.mxu1 %v662_v27  ;;  %593 = vmatprep.subr.bf16.mxu0 %v663_v28 }
  0x1e   :  { %621 = vmatprep.subr.bf16.mxu1 %v664_v29 }
  0x20   :  { %594 = vmatpush3.bf16.msra.mxu0 %v665_v30 }
  0x21   :  { %622 = vmatpush3.bf16.msra.mxu1 %v666_v31 }
  0x23   :  { %365 = vmatmul.mubr.bf16.vlgmr.msra.gmra.mxu0 %v667_v32 }
  0x24   :  { %414 = vmatmul.mubr.bf16.vlgmr.msra.gmra.mxu1 %v670_v34  ;;  %372 = vmatprep.mubr.bf16.mxu0 %v673_v36 }
  0x25   :  { %421 = vmatprep.mubr.bf16.mxu1 %v675_v37 }
  0x2b   :  { %373 = vmatmul.mubr.bf16.gmra.mxu0 %v677_v38 }
  0x2c   :  { %422 = vmatmul.mubr.bf16.gmra.mxu1 %v678_v39 }
  0xe3   :  { %v595_v40 = vpop.f32.mrf.mxu0 }
  0xe4   :  { %v623_v41 = vpop.f32.mrf.mxu1 }
  0xe5   :  { %v596_v42 = vpop.f32.mrf.mxu0 }
  0xe6   :  { %v624_v43 = vpop.f32.mrf.mxu1  ;;  %v597_v45 = vadd.f32 %v596_v42, %v595_v40 }
  0xe7   :  { %v598_v44 = vpop.f32.mrf.mxu0  ;;  %v625_v57 = vadd.f32 %v624_v43, %v623_v41 }
  0xe8   :  { %v626_v46 = vpop.f32.mrf.mxu1  ;;  %v367_v52 = vadd.f32 %v597_v45, %v529_v47 }
  0xe9   :  { %v599_v48 = vpop.f32.mrf.mxu0 }
  0xea   :  { %v600_v49 = vadd.f32 %v599_v48, %v598_v44  ;;  %v627_v50 = vpop.f32.mrf.mxu1  ;;  %v416_v62 = vadd.f32 %v625_v57, %v367_v52  ;;  %v467_v48 = vld [vmem:[%s863_s3] sm:$0x1] }
  0xeb   :  { %v601_v51 = vpop.f32.mrf.mxu0  ;;  %v628_v54 = vadd.f32 %v627_v50, %v626_v46  ;;  %v472_v46 = vlaneseq }
  0xec   :  { %v370_v53 = vadd.f32 %v600_v49, %v529_v47  ;;  %v629_v55 = vpop.f32.mrf.mxu1  ;;  %v431_v7 = vsel %vm430_vm0, %v416_v62, 0.0 }
  0xed   :  { %v602_v56 = vpop.f32.mrf.mxu0 }
  0xee   :  { %v419_v58 = vadd.f32 %v628_v54, %v370_v53  ;;  %v603_v59 = vadd.f32 %v602_v56, %v601_v51  ;;  %v630_v60 = vpop.f32.mrf.mxu1  ;;  %v570_v53 = vld [vmem:[%s864_s4] ss:$0 sm:$0xff] }
  0xef   :  { %v604_v61 = vpop.f32.mrf.mxu0  ;;  %v631_v0 = vadd.f32 %v630_v60, %v629_v55 }
  0xf0   :  { %v375_v63 = vadd.f32 %v603_v59, %v529_v47  ;;  %v632_v1 = vpop.f32.mrf.mxu1  ;;  %v432_v3 = vsel %vm430_vm0, %v419_v58, 0.0 }
  0xf1   :  { %v605_v2 = vpop.f32.mrf.mxu0  ;;  %v433_v11 = vadd.f32 %v432_v3, %v431_v7 }
  0xf2   :  { %v424_v4 = vadd.f32 %v631_v0, %v375_v63  ;;  %v606_v5 = vadd.f32 %v605_v2, %v604_v61  ;;  %v633_v6 = vpop.f32.mrf.mxu1 }
  0xf3   :  { %v634_v10 = vadd.f32 %v633_v6, %v632_v1 }
  0xf4   :  { %v434_v8 = vsel %vm430_vm0, %v424_v4, 0.0  ;;  %v378_v9 = vadd.f32 %v606_v5, %v529_v47  ;;  %v473_v47 = vshrl.u32 %v472_v46, 7 }
  0xf5   :  { %v435_v13 = vadd.f32 %v434_v8, %v433_v11 }
  0xf6   :  { %v427_v12 = vadd.f32 %v634_v10, %v378_v9  ;;  %v474_v49 = vsub.s32 0, %v473_v47 }
  0xf8   :  { %v436_v14 = vsel %vm430_vm0, %v427_v12, 0.0 }
  0xf9   :  { %v437_v15 = vadd.f32 %v436_v14, %v435_v13 }
  0xfb   :  { %v438_v16 = vrot.slane %v437_v15, 4 }
  0xfd   :  { %v439_v17 = vadd.f32 %v438_v16, %v437_v15 }
  0xff   :  { %v440_v18 = vrot.slane %v439_v17, 2 }
 0x101   :  { %v441_v19 = vadd.f32 %v440_v18, %v439_v17 }
 0x103   :  { %v442_v20 = vrot.slane %v441_v19, 1 }
 0x105   :  { %v443_v21 = vadd.f32 %v442_v20, %v441_v19 }
 0x107   :  { %v444_v22 = vmul.f32 0.03125, %v443_v21 }
 0x109   :  { %v445_v23 = vsub.f32 %v416_v62, %v444_v22  ;;  %v446_v24 = vsub.f32 %v419_v58, %v444_v22  ;;  %v447_v25 = vsub.f32 %v424_v4, %v444_v22  ;;  %v448_v26 = vsub.f32 %v427_v12, %v444_v22 }
 0x10b   :  { %v449_v27 = vmul.f32 %v445_v23, %v445_v23  ;;  %v450_v28 = vmul.f32 %v446_v24, %v446_v24  ;;  %v451_v29 = vmul.f32 %v447_v25, %v447_v25  ;;  %v452_v30 = vmul.f32 %v448_v26, %v448_v26 }
 0x10d   :  { %v453_v31 = vsel %vm430_vm0, %v449_v27, 0.0  ;;  %v454_v32 = vsel %vm430_vm0, %v450_v28, 0.0  ;;  %v456_v34 = vsel %vm430_vm0, %v451_v29, 0.0  ;;  %v458_v36 = vsel %vm430_vm0, %v452_v30, 0.0 }
 0x10e   :  { %v455_v33 = vadd.f32 %v454_v32, %v453_v31 }
 0x110   :  { %v457_v35 = vadd.f32 %v456_v34, %v455_v33 }
 0x112   :  { %v459_v37 = vadd.f32 %v458_v36, %v457_v35 }
 0x114   :  { %v460_v38 = vrot.slane %v459_v37, 4 }
 0x116   :  { %v461_v39 = vadd.f32 %v460_v38, %v459_v37 }
 0x118   :  { %v462_v40 = vrot.slane %v461_v39, 2 }
 0x11a   :  { %v463_v41 = vadd.f32 %v462_v40, %v461_v39 }
 0x11c   :  { %v464_v42 = vrot.slane %v463_v41, 1 }
 0x11e   :  { %v465_v43 = vadd.f32 %v464_v42, %v463_v41 }
 0x120   :  { %v466_v44 = vmul.f32 0.03125, %v465_v43 }
 0x122   :  { %v468_v45 = vadd.f32 1e-05, %v466_v44 }
 0x124   :  { %679 = vrsqrt.f32 %v468_v45 }
 0x131   :  { %v680_v50 = vpop.eup %679 }
 0x132   :  { %v470_v51 = vmul.f32 %v680_v50, %v467_v48 }
 0x134   :  { %v475_v52 = vrot.slane %v470_v51, %v474_v49 }
 0x136   :  { %v477_v54 = vmul.f32 %v475_v52, %v445_v23  ;;  %v478_v55 = vmul.f32 %v475_v52, %v446_v24  ;;  %v479_v56 = vmul.f32 %v475_v52, %v447_v25  ;;  %v480_v57 = vmul.f32 %v475_v52, %v448_v26 }
 0x138   :  { %v488_v58 = vadd.f32 %v570_v53, %v477_v54  ;;  %v489_v59 = vadd.f32 %v570_v53, %v478_v55  ;;  %v490_v60 = vadd.f32 %v570_v53, %v479_v56  ;;  %v491_v61 = vadd.f32 %v570_v53, %v480_v57 }
 0x13a   :  { %vm492_vm1 = vcmp.ge.f32.partialorder %v488_v58, 0.0  ;;  %vm493_vm2 = vcmp.ge.f32.partialorder %v489_v59, 0.0  ;;  %vm494_vm3 = vcmp.ge.f32.partialorder %v490_v60, 0.0  ;;  %vm495_vm4 = vcmp.ge.f32.partialorder %v491_v61, 0.0 }
 0x13b   :  { %v496_v62 = vmul.f32 0.2, %v488_v58  ;;  %v497_v63 = vmul.f32 0.2, %v489_v59  ;;  %v498_v0 = vmul.f32 0.2, %v490_v60 }
 0x13c   :  { %v499_v1 = vmul.f32 0.2, %v491_v61 }
 0x13d   :  { %v500_v2 = vsel %vm492_vm1, %v488_v58, %v496_v62  ;;  %v501_v3 = vsel %vm493_vm2, %v489_v59, %v497_v63  ;;  %v502_v4 = vsel %vm494_vm3, %v490_v60, %v498_v0 }
 0x13e   :  { %v503_v5 = vsel %vm495_vm4, %v491_v61, %v499_v1  ;;  %v575_v6 = vpack.c.bf16 %v500_v2, %v500_v2  ;;  %v576_v7 = vpack.c.bf16 %v501_v3, %v501_v3  ;;  %v577_v8 = vpack.c.bf16 %v502_v4, %v502_v4 }
 0x13f   :  { %v578_v9 = vpack.c.bf16 %v503_v5, %v503_v5 }
 0x140   :  { %521 = vst.msk [vmem:[%s865_s5] sm:$0xf] %vm520_vm5, %v575_v6  ;;  %522 = vst.msk [vmem:[%s865_s5 + $0x4] sm:$0xf] %vm520_vm5, %v576_v7 }
 0x141   :  { %523 = vst.msk [vmem:[%s865_s5 + $0x8] sm:$0xf] %vm520_vm5, %v577_v8  ;;  %524 = vst.msk [vmem:[%s865_s5 + $0xc] sm:$0xf] %vm520_vm5, %v578_v9 }

// kernel: discriminator_forward.8
= control target key start
LH: loop header
LB: loop body
LE: loop exit
PB: predicated region body
PF: predicated region fallthrough
CT: control target
= control target key end

     0   :  { %vm813_vm0 = vcmask 1041408   ;;  %s1445_s1 = inlined_call_operand.vmem [shape: bf16[1024,128], index: 1, kind: input, shape index: {}]   ;;  %s1446_s0 = inlined_call_operand.vmem [shape: bf16[18,1024], index: 0, kind: input, shape index: {}]   ;;  %s1447_s2 = inlined_call_operand.vmem [shape: f32[1,128], index: 2, kind: input, shape index: {}]   ;;  %s1448_s3 = inlined_call_operand.vmem [shape: f32[1,128], index: 3, kind: input, shape index: {}]   ;;  %s1449_s4 = inlined_call_operand.vmem [shape: f32[1,128], index: 4, kind: input, shape index: {}]   ;;  %s1450_s5 = inlined_call_operand.vmem [shape: bf16[18,128], index: 5, kind: output, shape index: {}]  }
   0x1   :  { %v1096_v0 = vld [vmem:[%s1445_s1 + $0x78] sm:$0xff]   ;;  %v1100_v4 = vld [vmem:[%s1445_s1 + $0x70] sm:$0xff]   ;;  %v1104_v8 = vld [vmem:[%s1445_s1 + $0x68] sm:$0xff]  }
   0x2   :  { %v1097_v1 = vld [vmem:[%s1445_s1 + $0xf8] sm:$0xff]   ;;  %984 = vmatprep.subr.bf16.mxu0 %v1096_v0  ;;  %v1101_v5 = vld [vmem:[%s1445_s1 + $0xf0] sm:$0xff]   ;;  %v1105_v9 = vld [vmem:[%s1445_s1 + $0xe8] sm:$0xff]  }
   0x3   :  { %v1098_v2 = vld [vmem:[%s1445_s1 + $0x38] sm:$0xff]   ;;  %1012 = vmatprep.subr.bf16.mxu1 %v1097_v1  ;;  %v1102_v6 = vld [vmem:[%s1445_s1 + $0x30] sm:$0xff]   ;;  %v1106_v10 = vld [vmem:[%s1445_s1 + $0x28] sm:$0xff]  }
   0x4   :  { %v1099_v3 = vld [vmem:[%s1445_s1 + $0xb8] sm:$0xff]   ;;  %985 = vmatpush3.bf16.msra.mxu0 %v1098_v2  ;;  %v1103_v7 = vld [vmem:[%s1445_s1 + $0xb0] sm:$0xff]   ;;  %v1107_v11 = vld [vmem:[%s1445_s1 + $0xa8] sm:$0xff]  }
   0x5   :  { %1013 = vmatpush3.bf16.msra.mxu1 %v1099_v3  ;;  %986 = vmatprep.subr.bf16.mxu0 %v1100_v4  ;;  %v1108_v12 = vld [vmem:[%s1445_s1 + $0x60] sm:$0xff]   ;;  %v1112_v16 = vld [vmem:[%s1445_s1 + $0x58] sm:$0xff]   ;;  %v1116_v20 = vld [vmem:[%s1445_s1 + $0x50] sm:$0xff]  }
   0x6   :  { %1014 = vmatprep.subr.bf16.mxu1 %v1101_v5  ;;  %v1109_v13 = vld [vmem:[%s1445_s1 + $0xe0] sm:$0xff]   ;;  %v1113_v17 = vld [vmem:[%s1445_s1 + $0xd8] sm:$0xff]   ;;  %v1117_v21 = vld [vmem:[%s1445_s1 + $0xd0] sm:$0xff]  }
   0x7   :  { %v1110_v14 = vld [vmem:[%s1445_s1 + $0x20] sm:$0xff]   ;;  %v1114_v18 = vld [vmem:[%s1445_s1 + $0x18] sm:$0xff]   ;;  %v1118_v22 = vld [vmem:[%s1445_s1 + $0x10] sm:$0xff]  }
   0x8   :  { %987 = vmatpush3.bf16.msra.mxu0 %v1102_v6  ;;  %v1111_v15 = vld [vmem:[%s1445_s1 + $0xa0] sm:$0xff]   ;;  %v1115_v19 = vld [vmem:[%s1445_s1 + $0x98] sm:$0xff]   ;;  %v1119_v23 = vld [vmem:[%s1445_s1 + $0x90] sm:$0xff]  }
   0x9   :  { %1015 = vmatpush3.bf16.msra.mxu1 %v1103_v7  ;;  %988 = vmatprep.subr.bf16.mxu0 %v1104_v8  ;;  %v1120_v24 = vld [vmem:[%s1445_s1 + $0x48] sm:$0xff]   ;;  %v1124_v28 = vld [vmem:[%s1445_s1 + $0x40] sm:$0xff]   ;;  %v1128_v40 = vld [vmem:[%s1445_s1 + $0x178] sm:$0xff]  }
   0xa   :  { %1016 = vmatprep.subr.bf16.mxu1 %v1105_v9  ;;  %v1121_v25 = vld [vmem:[%s1445_s1 + $0xc8] sm:$0xff]   ;;  %v1125_v29 = vld [vmem:[%s1445_s1 + $0xc0] sm:$0xff]   ;;  %v1129_v41 = vld [vmem:[%s1445_s1 + $0x1f8] sm:$0xff]  }
   0xb   :  { %v1122_v26 = vld [vmem:[%s1445_s1 + $0x8] sm:$0xff]   ;;  %v1126_v30 = vld [vmem:[%s1445_s1] sm:$0xff]   ;;  %v1130_v42 = vld [vmem:[%s1445_s1 + $0x138] sm:$0xff]  }
   0xc   :  { %989 = vmatpush3.bf16.msra.mxu0 %v1106_v10  ;;  %v1123_v27 = vld [vmem:[%s1445_s1 + $0x88] sm:$0xff]   ;;  %v1127_v31 = vld [vmem:[%s1445_s1 + $0x80] sm:$0xff]   ;;  %v1131_v43 = vld [vmem:[%s1445_s1 + $0x1b8] sm:$0xff]  }
   0xd   :  { %1017 = vmatpush3.bf16.msra.mxu1 %v1107_v11  ;;  %990 = vmatprep.subr.bf16.mxu0 %v1108_v12  ;;  %v21_v32 = vld [vmem:[%s1446_s0] sm:$0xff]  ;;  %v22_v34 = vld [vmem:[%s1446_s0 + $0x8] sm:$0xff]  ;;  %v1132_v44 = vld [vmem:[%s1445_s1 + $0x170] sm:$0xff]  }
   0xe   :  { %1018 = vmatprep.subr.bf16.mxu1 %v1109_v13  ;;  %v25_v33 = vld [vmem:[%s1446_s0 + $0x20] sm:$0xff]  ;;  %v26_v37 = vld [vmem:[%s1446_s0 + $0x28] sm:$0xff]  ;;  %v1133_v45 = vld [vmem:[%s1445_s1 + $0x1f0] sm:$0xff]  }
   0xf   :  { %v892_v35 = vcombine.low %v21_v32, %v25_v33  ;;  %v893_v36 = vcombine.high %v21_v32, %v25_v33  ;;  %v894_v38 = vcombine.low %v22_v34, %v26_v37  ;;  %v895_v39 = vcombine.high %v22_v34, %v26_v37  ;;  %v1134_v46 = vld [vmem:[%s1445_s1 + $0x130] sm:$0xff]   ;;  %v1136_v48 = vld [vmem:[%s1445_s1 + $0x168] sm:$0xff]   ;;  %v1140_v52 = vld [vmem:[%s1445_s1 + $0x160] sm:$0xff]  }
  0x10   :  { %991 = vmatpush3.bf16.msra.mxu0 %v1110_v14  ;;  %v1135_v47 = vld [vmem:[%s1445_s1 + $0x1b0] sm:$0xff]   ;;  %v1137_v49 = vld [vmem:[%s1445_s1 + $0x1e8] sm:$0xff]   ;;  %v1141_v53 = vld [vmem:[%s1445_s1 + $0x1e0] sm:$0xff]  }
  0x11   :  { %1019 = vmatpush3.bf16.msra.mxu1 %v1111_v15  ;;  %992 = vmatprep.subr.bf16.mxu0 %v1112_v16  ;;  %v1138_v50 = vld [vmem:[%s1445_s1 + $0x128] sm:$0xff]   ;;  %v1142_v54 = vld [vmem:[%s1445_s1 + $0x120] sm:$0xff]   ;;  %v1144_v56 = vld [vmem:[%s1445_s1 + $0x158] sm:$0xff]  }
  0x12   :  { %1020 = vmatprep.subr.bf16.mxu1 %v1113_v17  ;;  %652 = vmatprep.mubr.bf16.mxu0 %v893_v36  ;;  %v1139_v51 = vld [vmem:[%s1445_s1 + $0x1a8] sm:$0xff]   ;;  %v1143_v55 = vld [vmem:[%s1445_s1 + $0x1a0] sm:$0xff]   ;;  %v1145_v57 = vld [vmem:[%s1445_s1 + $0x1d8] sm:$0xff]  }
  0x13   :  { %700 = vmatprep.mubr.bf16.mxu1 %v895_v39  ;;  %v29_v58 = vld [vmem:[%s1446_s0 + $0x40] sm:$0x11]  ;;  %v1147_v60 = vld [vmem:[%s1445_s1 + $0x118] sm:$0xff]   ;;  %v30_v63 = vld [vmem:[%s1446_s0 + $0x48] sm:$0x11] }
  0x14   :  { %993 = vmatpush3.bf16.msra.mxu0 %v1114_v18  ;;  %v901_v59 = vcombine.high %v29_v58, %v29_v58  ;;  %v900_v61 = vcombine.low %v29_v58, %v29_v58  ;;  %v1148_v62 = vld [vmem:[%s1445_s1 + $0x198] sm:$0xff]   ;;  %v903_v0 = vcombine.high %v30_v63, %v30_v63  ;;  %v902_v1 = vcombine.low %v30_v63, %v30_v63  ;;  %v1152_v2 = vld [vmem:[%s1445_s1 + $0x150] sm:$0xff]   ;;  %v1156_v6 = vld [vmem:[%s1445_s1 + $0x148] sm:$0xff]  }
  0x15   :  { %1021 = vmatpush3.bf16.msra.mxu1 %v1115_v19  ;;  %994 = vmatprep.subr.bf16.mxu0 %v1116_v20  ;;  %v1153_v3 = vld [vmem:[%s1445_s1 + $0x1d0] sm:$0xff]   ;;  %v1157_v7 = vld [vmem:[%s1445_s1 + $0x1c8] sm:$0xff]   ;;  %v1160_v10 = vld [vmem:[%s1445_s1 + $0x140] sm:$0xff]  }
  0x16   :  { %1022 = vmatprep.subr.bf16.mxu1 %v1117_v21  ;;  %v1154_v4 = vld [vmem:[%s1445_s1 + $0x110] sm:$0xff]   ;;  %v1158_v8 = vld [vmem:[%s1445_s1 + $0x108] sm:$0xff]   ;;  %v1161_v11 = vld [vmem:[%s1445_s1 + $0x1c0] sm:$0xff]  }
  0x17   :  { %v1155_v5 = vld [vmem:[%s1445_s1 + $0x190] sm:$0xff]   ;;  %v1159_v9 = vld [vmem:[%s1445_s1 + $0x188] sm:$0xff]   ;;  %v1162_v12 = vld [vmem:[%s1445_s1 + $0x100] sm:$0xff]  }
  0x18   :  { %995 = vmatpush3.bf16.msra.mxu0 %v1118_v22  ;;  %v1163_v13 = vld [vmem:[%s1445_s1 + $0x180] sm:$0xff]   ;;  %v23_v14 = vld [vmem:[%s1446_s0 + $0x10] sm:$0xff]  ;;  %v24_v16 = vld [vmem:[%s1446_s0 + $0x18] sm:$0xff] }
  0x19   :  { %1023 = vmatpush3.bf16.msra.mxu1 %v1119_v23  ;;  %996 = vmatprep.subr.bf16.mxu0 %v1120_v24  ;;  %v27_v15 = vld [vmem:[%s1446_s0 + $0x30] sm:$0xff]  ;;  %v28_v19 = vld [vmem:[%s1446_s0 + $0x38] sm:$0xff] }
  0x1a   :  { %1024 = vmatprep.subr.bf16.mxu1 %v1121_v25  ;;  %v896_v17 = vcombine.low %v23_v14, %v27_v15  ;;  %v897_v18 = vcombine.high %v23_v14, %v27_v15  ;;  %v31_v20 = vld [vmem:[%s1446_s0 + $0x50] sm:$0x11]  ;;  %v32_v21 = vld [vmem:[%s1446_s0 + $0x58] sm:$0x11]  ;;  %v898_v22 = vcombine.low %v24_v16, %v28_v19  ;;  %v899_v23 = vcombine.high %v24_v16, %v28_v19 }
  0x1b   :  { %v905_v24 = vcombine.high %v31_v20, %v31_v20  ;;  %v907_v25 = vcombine.high %v32_v21, %v32_v21 }
  0x1c   :  { %997 = vmatpush3.bf16.msra.mxu0 %v1122_v26  ;;  %v904_v26 = vcombine.low %v31_v20, %v31_v20 }
  0x1d   :  { %1025 = vmatpush3.bf16.msra.mxu1 %v1123_v27  ;;  %998 = vmatprep.subr.bf16.mxu0 %v1124_v28  ;;  %v906_v27 = vcombine.low %v32_v21, %v32_v21 }
  0x1e   :  { %1026 = vmatprep.subr.bf16.mxu1 %v1125_v29 }
  0x20   :  { %999 = vmatpush3.bf16.msra.mxu0 %v1126_v30 }
  0x21   :  { %1027 = vmatpush3.bf16.msra.mxu1 %v1127_v31  ;;  %1040 = vmatprep.subr.bf16.mxu0 %v1128_v40 }
  0x22   :  { %1068 = vmatprep.subr.bf16.mxu1 %v1129_v41 }
  0x23   :  { %653 = vmatmul.mubr.bf16.vlgmr.msra.gmra.mxu0 %v892_v35 }
  0x24   :  { %701 = vmatmul.mubr.bf16.vlgmr.msra.gmra.mxu1 %v894_v38  ;;  %1041 = vmatpush3.bf16.msra.mxu0 %v1130_v42 }
  0x25   :  { %1069 = vmatpush3.bf16.msra.mxu1 %v1131_v43  ;;  %1042 = vmatprep.subr.bf16.mxu0 %v1132_v44 }
  0x26   :  { %1070 = vmatprep.subr.bf16.mxu1 %v1133_v45  ;;  %660 = vmatprep.mubr.bf16.mxu0 %v901_v59 }
  0x27   :  { %708 = vmatprep.mubr.bf16.mxu1 %v903_v0 }
  0x28   :  { %1043 = vmatpush3.bf16.msra.mxu0 %v1134_v46 }
  0x29   :  { %1071 = vmatpush3.bf16.msra.mxu1 %v1135_v47  ;;  %1044 = vmatprep.subr.bf16.mxu0 %v1136_v48  ;;  %v891_v47 = vld [vmem:[%s1447_s2] ss:$0 sm:$0xff] }
  0x2a   :  { %1072 = vmatprep.subr.bf16.mxu1 %v1137_v49 }
  0x2b   :  { %661 = vmatmul.mubr.bf16.gmra.mxu0 %v900_v61 }
  0x2c   :  { %1045 = vmatpush3.bf16.msra.mxu0 %v1138_v50  ;;  %709 = vmatmul.mubr.bf16.gmra.mxu1 %v902_v1 }
  0x2d   :  { %1073 = vmatpush3.bf16.msra.mxu1 %v1139_v51  ;;  %1046 = vmatprep.subr.bf16.mxu0 %v1140_v52 }
  0x2e   :  { %1074 = vmatprep.subr.bf16.mxu1 %v1141_v53  ;;  %748 = vmatprep.mubr.bf16.mxu0 %v897_v18 }
  0x2f   :  { %796 = vmatprep.mubr.bf16.mxu1 %v899_v23 }
  0x30   :  { %1047 = vmatpush3.bf16.msra.mxu0 %v1142_v54 }
  0x31   :  { %1075 = vmatpush3.bf16.msra.mxu1 %v1143_v55  ;;  %1048 = vmatprep.subr.bf16.mxu0 %v1144_v56 }
  0x32   :  { %1076 = vmatprep.subr.bf16.mxu1 %v1145_v57 }
  0x34   :  { %1049 = vmatpush3.bf16.msra.mxu0 %v1147_v60 }
  0x35   :  { %1077 = vmatpush3.bf16.msra.mxu1 %v1148_v62  ;;  %1050 = vmatprep.subr.bf16.mxu0 %v1152_v2 }
  0x36   :  { %1078 = vmatprep.subr.bf16.mxu1 %v1153_v3 }
  0x38   :  { %1051 = vmatpush3.bf16.msra.mxu0 %v1154_v4 }
  0x39   :  { %1079 = vmatpush3.bf16.msra.mxu1 %v1155_v5  ;;  %1052 = vmatprep.subr.bf16.mxu0 %v1156_v6 }
  0x3a   :  { %1080 = vmatprep.subr.bf16.mxu1 %v1157_v7 }
  0x3c   :  { %1053 = vmatpush3.bf16.msra.mxu0 %v1158_v8 }
  0x3d   :  { %1081 = vmatpush3.bf16.msra.mxu1 %v1159_v9  ;;  %1054 = vmatprep.subr.bf16.mxu0 %v1160_v10 }
  0x3e   :  { %1082 = vmatprep.subr.bf16.mxu1 %v1161_v11 }
  0x40   :  { %1055 = vmatpush3.bf16.msra.mxu0 %v1162_v12 }
  0x41   :  { %1083 = vmatpush3.bf16.msra.mxu1 %v1163_v13 }
  0x43   :  { %749 = vmatmul.mubr.bf16.vlgmr.msra.gmra.mxu0 %v896_v17 }
  0x44   :  { %797 = vmatmul.mubr.bf16.vlgmr.msra.gmra.mxu1 %v898_v22  ;;  %756 = vmatprep.mubr.bf16.mxu0 %v905_v24 }
  0x45   :  { %804 = vmatprep.mubr.bf16.mxu1 %v907_v25 }
  0x4b   :  { %757 = vmatmul.mubr.bf16.gmra.mxu0 %v904_v26 }
  0x4c   :  { %805 = vmatmul.mubr.bf16.gmra.mxu1 %v906_v27 }
  0xe3   :  { %v1000_v28 = vpop.f32.mrf.mxu0 }
  0xe4   :  { %v1028_v29 = vpop.f32.mrf.mxu1 }
  0xe5   :  { %v1001_v30 = vpop.f32.mrf.mxu0 }
  0xe6   :  { %v1029_v31 = vpop.f32.mrf.mxu1  ;;  %v1002_v45 = vadd.f32 %v1001_v30, %v1000_v28 }
  0xe7   :  { %v1003_v32 = vpop.f32.mrf.mxu0  ;;  %v1030_v54 = vadd.f32 %v1029_v31, %v1028_v29 }
  0xe8   :  { %v1031_v33 = vpop.f32.mrf.mxu1  ;;  %v655_v53 = vadd.f32 %v1002_v45, %v891_v47 }
  0xe9   :  { %v1004_v34 = vpop.f32.mrf.mxu0 }
  0xea   :  { %v1032_v35 = vpop.f32.mrf.mxu1  ;;  %v1005_v44 = vadd.f32 %v1004_v34, %v1003_v32  ;;  %v703_v1 = vadd.f32 %v1030_v54, %v655_v53 }
  0xeb   :  { %v1006_v36 = vpop.f32.mrf.mxu0  ;;  %v1033_v56 = vadd.f32 %v1032_v35, %v1031_v33 }
  0xec   :  { %v1034_v38 = vpop.f32.mrf.mxu1  ;;  %v658_v50 = vadd.f32 %v1005_v44, %v891_v47 }
  0xed   :  { %v1007_v37 = vpop.f32.mrf.mxu0 }
  0xee   :  { %v1035_v40 = vpop.f32.mrf.mxu1  ;;  %v1008_v51 = vadd.f32 %v1007_v37, %v1006_v36  ;;  %v706_v60 = vadd.f32 %v1033_v56, %v658_v50  ;;  %v839_v50 = vld [vmem:[%s1448_s3] sm:$0x1] }
  0xef   :  { %v1009_v39 = vpop.f32.mrf.mxu0  ;;  %v1036_v62 = vadd.f32 %v1035_v40, %v1034_v38 }
  0xf0   :  { %v1037_v42 = vpop.f32.mrf.mxu1  ;;  %v663_v61 = vadd.f32 %v1008_v51, %v891_v47 }
  0xf1   :  { %v1010_v41 = vpop.f32.mrf.mxu0 }
  0xf2   :  { %v1038_v43 = vpop.f32.mrf.mxu1  ;;  %v711_v8 = vadd.f32 %v1036_v62, %v663_v61 }
 0x103   :  { %v1056_v46 = vpop.f32.mrf.mxu0 }
 0x104   :  { %v1084_v48 = vpop.f32.mrf.mxu1 }
 0x105   :  { %v1057_v49 = vpop.f32.mrf.mxu0 }
 0x106   :  { %v1085_v52 = vpop.f32.mrf.mxu1  ;;  %v1058_v58 = vadd.f32 %v1057_v49, %v1056_v46 }
 0x107   :  { %v1059_v55 = vpop.f32.mrf.mxu0  ;;  %v1086_v11 = vadd.f32 %v1085_v52, %v1084_v48  ;;  %v844_v48 = vlaneseq }
 0x108   :  { %v1087_v57 = vpop.f32.mrf.mxu1  ;;  %v751_v5 = vadd.f32 %v1058_v58, %v703_v1 }
 0x109   :  { %v1060_v59 = vpop.f32.mrf.mxu0  ;;  %v845_v49 = vshrl.u32 %v844_v48, 7 }
 0x10a   :  { %v1061_v63 = vadd.f32 %v1060_v59, %v1059_v55  ;;  %v1088_v0 = vpop.f32.mrf.mxu1  ;;  %v799_v17 = vadd.f32 %v1086_v11, %v751_v5  ;;  %v972_v55 = vld [vmem:[%s1449_s4] ss:$0 sm:$0xff] }
 0x10b   :  { %v1062_v2 = vpop.f32.mrf.mxu0  ;;  %v1089_v6 = vadd.f32 %v1088_v0, %v1087_v57  ;;  %v846_v51 = vsub.s32 0, %v845_v49 }
 0x10c   :  { %v754_v3 = vadd.f32 %v1061_v63, %v706_v60  ;;  %v1090_v4 = vpop.f32.mrf.mxu1 }
 0x10d   :  { %v1063_v7 = vpop.f32.mrf.mxu0 }
 0x10e   :  { %v1064_v9 = vadd.f32 %v1063_v7, %v1062_v2  ;;  %v1091_v10 = vpop.f32.mrf.mxu1  ;;  %v802_v12 = vadd.f32 %v1089_v6, %v754_v3 }
 0x10f   :  { %v1065_v13 = vpop.f32.mrf.mxu0  ;;  %v1092_v15 = vadd.f32 %v1091_v10, %v1090_v4 }
 0x110   :  { %v759_v14 = vadd.f32 %v1064_v9, %v711_v8  ;;  %v1093_v16 = vpop.f32.mrf.mxu1  ;;  %v812_v21 = vadd.f32 %v802_v12, %v799_v17 }
 0x111   :  { %v1066_v18 = vpop.f32.mrf.mxu0 }
 0x112   :  { %v807_v19 = vadd.f32 %v1092_v15, %v759_v14  ;;  %v1094_v20 = vpop.f32.mrf.mxu1 }
 0x114   :  { %v814_v22 = vsel %vm813_vm0, %v807_v19, 0.0 }
 0x115   :  { %v815_v23 = vadd.f32 %v814_v22, %v812_v21 }
 0x117   :  { %v816_v24 = vrot.slane %v815_v23, 4 }
 0x119   :  { %v817_v25 = vadd.f32 %v816_v24, %v815_v23 }
 0x11b   :  { %v818_v26 = vrot.slane %v817_v25, 2 }
 0x11d   :  { %v819_v27 = vadd.f32 %v818_v26, %v817_v25 }
 0x11f   :  { %v820_v28 = vrot.slane %v819_v27, 1 }
 0x121   :  { %v821_v29 = vadd.f32 %v820_v28, %v819_v27 }
 0x123   :  { %v822_v30 = vmul.f32 0.055555556, %v821_v29 }
 0x125   :  { %v823_v31 = vsub.f32 %v799_v17, %v822_v30  ;;  %v824_v32 = vsub.f32 %v802_v12, %v822_v30  ;;  %v825_v33 = vsub.f32 %v807_v19, %v822_v30 }
 0x127   :  { %v826_v34 = vmul.f32 %v823_v31, %v823_v31  ;;  %v827_v35 = vmul.f32 %v824_v32, %v824_v32  ;;  %v828_v36 = vmul.f32 %v825_v33, %v825_v33 }
 0x129   :  { %v829_v37 = vadd.f32 %v827_v35, %v826_v34  ;;  %v830_v38 = vsel %vm813_vm0, %v828_v36, 0.0 }
 0x12b   :  { %v831_v39 = vadd.f32 %v830_v38, %v829_v37 }
 0x12d   :  { %v832_v40 = vrot.slane %v831_v39, 4 }
 0x12f   :  { %v833_v41 = vadd.f32 %v832_v40, %v831_v39 }
 0x131   :  { %v834_v42 = vrot.slane %v833_v41, 2 }
 0x133   :  { %v835_v43 = vadd.f32 %v834_v42, %v833_v41 }
 0x135   :  { %v836_v44 = vrot.slane %v835_v43, 1 }
 0x137   :  { %v837_v45 = vadd.f32 %v836_v44, %v835_v43 }
 0x139   :  { %v838_v46 = vmul.f32 0.055555556, %v837_v45 }
 0x13b   :  { %v840_v47 = vadd.f32 1e-05, %v838_v46 }
 0x13d   :  { %1168 = vrsqrt.f32 %v840_v47 }
 0x14a   :  { %v1169_v52 = vpop.eup %1168 }
 0x14b   :  { %v842_v53 = vmul.f32 %v1169_v52, %v839_v50 }
 0x14d   :  { %v847_v54 = vrot.slane %v842_v53, %v846_v51 }
 0x14f   :  { %v849_v56 = vmul.f32 %v847_v54, %v823_v31  ;;  %v850_v57 = vmul.f32 %v847_v54, %v824_v32  ;;  %v851_v58 = vmul.f32 %v847_v54, %v825_v33 }
 0x151   :  { %v859_v59 = vadd.f32 %v972_v55, %v849_v56  ;;  %v860_v60 = vadd.f32 %v972_v55, %v850_v57  ;;  %v861_v61 = vadd.f32 %v972_v55, %v851_v58 }
 0x153   :  { %vm862_vm1 = vcmp.ge.f32.partialorder %v859_v59, 0.0  ;;  %vm863_vm2 = vcmp.ge.f32.partialorder %v860_v60, 0.0  ;;  %vm864_vm3 = vcmp.ge.f32.partialorder %v861_v61, 0.0  ;;  %v865_v62 = vmul.f32 0.2, %v859_v59 }
 0x154   :  { %v866_v63 = vmul.f32 0.2, %v860_v60  ;;  %v867_v0 = vmul.f32 0.2, %v861_v61 }
 0x155   :  { %v868_v1 = vsel %vm862_vm1, %v859_v59, %v865_v62 }
 0x156   :  { %v869_v2 = vsel %vm863_vm2, %v860_v60, %v866_v63  ;;  %v870_v3 = vsel %vm864_vm3, %v861_v61, %v867_v0 }
 0x157   :  { %v978_v4 = vpack.c.bf16 %v870_v3, %v870_v3  ;;  %v982_v5 = vpack.c.bf16 %v869_v2, %v868_v1 }
 0x159   :  { %983 = vst [vmem:[%s1450_s5] sm:$0xff] %v982_v5   ;;  %886 = vst [vmem:[%s1450_s5 + $0x8] sm:$0x1] %v978_v4 }

// kernel: discriminator_forward.9
= control target key start
LH: loop header
LB: loop body
LE: loop exit
PB: predicated region body
PF: predicated region fallthrough
CT: control target
= control target key end

     0   :  { %s2345_s1 = inlined_call_operand.vmem [shape: bf16[2048,128], index: 1, kind: input, shape index: {}]   ;;  %s2346_s0 = inlined_call_operand.vmem [shape: bf16[8,2048], index: 0, kind: input, shape index: {}]   ;;  %s2347_s2 = inlined_call_operand.vmem [shape: f32[1,128], index: 2, kind: input, shape index: {}]   ;;  %s2348_s3 = inlined_call_operand.vmem [shape: f32[8,128], index: 3, kind: output, shape index: {}]  }
   0x1   :  { %v1763_v0 = vld [vmem:[%s2345_s1 + $0x78] sm:$0xff]   ;;  %v1767_v4 = vld [vmem:[%s2345_s1 + $0x70] sm:$0xff]   ;;  %v1771_v8 = vld [vmem:[%s2345_s1 + $0x68] sm:$0xff]  }
   0x2   :  { %v1764_v1 = vld [vmem:[%s2345_s1 + $0xf8] sm:$0xff]   ;;  %1587 = vmatprep.subr.bf16.mxu0 %v1763_v0  ;;  %v1768_v5 = vld [vmem:[%s2345_s1 + $0xf0] sm:$0xff]   ;;  %v1772_v9 = vld [vmem:[%s2345_s1 + $0xe8] sm:$0xff]  }
   0x3   :  { %v1765_v2 = vld [vmem:[%s2345_s1 + $0x38] sm:$0xff]   ;;  %1609 = vmatprep.subr.bf16.mxu1 %v1764_v1  ;;  %v1769_v6 = vld [vmem:[%s2345_s1 + $0x30] sm:$0xff]   ;;  %v1773_v10 = vld [vmem:[%s2345_s1 + $0x28] sm:$0xff]  }
   0x4   :  { %v1766_v3 = vld [vmem:[%s2345_s1 + $0xb8] sm:$0xff]   ;;  %1588 = vmatpush3.bf16.msra.mxu0 %v1765_v2  ;;  %v1770_v7 = vld [vmem:[%s2345_s1 + $0xb0] sm:$0xff]   ;;  %v1774_v11 = vld [vmem:[%s2345_s1 + $0xa8] sm:$0xff]  }
   0x5   :  { %1610 = vmatpush3.bf16.msra.mxu1 %v1766_v3  ;;  %1589 = vmatprep.subr.bf16.mxu0 %v1767_v4  ;;  %v1775_v12 = vld [vmem:[%s2345_s1 + $0x60] sm:$0xff]   ;;  %v1779_v16 = vld [vmem:[%s2345_s1 + $0x58] sm:$0xff]   ;;  %v1783_v20 = vld [vmem:[%s2345_s1 + $0x50] sm:$0xff]  }
   0x6   :  { %1611 = vmatprep.subr.bf16.mxu1 %v1768_v5  ;;  %v1776_v13 = vld [vmem:[%s2345_s1 + $0xe0] sm:$0xff]   ;;  %v1780_v17 = vld [vmem:[%s2345_s1 + $0xd8] sm:$0xff]   ;;  %v1784_v21 = vld [vmem:[%s2345_s1 + $0xd0] sm:$0xff]  }
   0x7   :  { %v1777_v14 = vld [vmem:[%s2345_s1 + $0x20] sm:$0xff]   ;;  %v1781_v18 = vld [vmem:[%s2345_s1 + $0x18] sm:$0xff]   ;;  %v1785_v22 = vld [vmem:[%s2345_s1 + $0x10] sm:$0xff]  }
   0x8   :  { %1590 = vmatpush3.bf16.msra.mxu0 %v1769_v6  ;;  %v1778_v15 = vld [vmem:[%s2345_s1 + $0xa0] sm:$0xff]   ;;  %v1782_v19 = vld [vmem:[%s2345_s1 + $0x98] sm:$0xff]   ;;  %v1786_v23 = vld [vmem:[%s2345_s1 + $0x90] sm:$0xff]  }
   0x9   :  { %1612 = vmatpush3.bf16.msra.mxu1 %v1770_v7  ;;  %1591 = vmatprep.subr.bf16.mxu0 %v1771_v8  ;;  %v1787_v24 = vld [vmem:[%s2345_s1 + $0x48] sm:$0xff]   ;;  %v1791_v28 = vld [vmem:[%s2345_s1 + $0x40] sm:$0xff]   ;;  %v1799_v38 = vld [vmem:[%s2345_s1 + $0x178] sm:$0xff]  }
   0xa   :  { %1613 = vmatprep.subr.bf16.mxu1 %v1772_v9  ;;  %v1788_v25 = vld [vmem:[%s2345_s1 + $0xc8] sm:$0xff]   ;;  %v1792_v29 = vld [vmem:[%s2345_s1 + $0xc0] sm:$0xff]   ;;  %v1800_v39 = vld [vmem:[%s2345_s1 + $0x1f8] sm:$0xff]  }
   0xb   :  { %v1789_v26 = vld [vmem:[%s2345_s1 + $0x8] sm:$0xff]   ;;  %v1793_v30 = vld [vmem:[%s2345_s1] sm:$0xff]   ;;  %v1801_v40 = vld [vmem:[%s2345_s1 + $0x138] sm:$0xff]  }
   0xc   :  { %1592 = vmatpush3.bf16.msra.mxu0 %v1773_v10  ;;  %v1790_v27 = vld [vmem:[%s2345_s1 + $0x88] sm:$0xff]   ;;  %v1794_v31 = vld [vmem:[%s2345_s1 + $0x80] sm:$0xff]   ;;  %v1802_v41 = vld [vmem:[%s2345_s1 + $0x1b8] sm:$0xff]  }
   0xd   :  { %1614 = vmatpush3.bf16.msra.mxu1 %v1774_v11  ;;  %1593 = vmatprep.subr.bf16.mxu0 %v1775_v12  ;;  %v15_v32 = vld [vmem:[%s2346_s0] sm:$0xff]  ;;  %v16_v33 = vld [vmem:[%s2346_s0 + $0x8] sm:$0xff]  ;;  %v1803_v42 = vld [vmem:[%s2345_s1 + $0x170] sm:$0xff]  }
   0xe   :  { %1615 = vmatprep.subr.bf16.mxu1 %v1776_v13  ;;  %v1442_v34 = vcombine.low %v15_v32, %v15_v32  ;;  %v1443_v35 = vcombine.high %v15_v32, %v15_v32  ;;  %v1444_v36 = vcombine.low %v16_v33, %v16_v33  ;;  %v1445_v37 = vcombine.high %v16_v33, %v16_v33  ;;  %v1804_v43 = vld [vmem:[%s2345_s1 + $0x1f0] sm:$0xff]   ;;  %v1807_v46 = vld [vmem:[%s2345_s1 + $0x168] sm:$0xff]   ;;  %v1811_v50 = vld [vmem:[%s2345_s1 + $0x160] sm:$0xff]  }
   0xf   :  { %v1805_v44 = vld [vmem:[%s2345_s1 + $0x130] sm:$0xff]   ;;  %v1808_v47 = vld [vmem:[%s2345_s1 + $0x1e8] sm:$0xff]   ;;  %v1812_v51 = vld [vmem:[%s2345_s1 + $0x1e0] sm:$0xff]  }
  0x10   :  { %1594 = vmatpush3.bf16.msra.mxu0 %v1777_v14  ;;  %1142 = vmatprep.mubr.bf16.mxu0 %v1443_v35  ;;  %v1806_v45 = vld [vmem:[%s2345_s1 + $0x1b0] sm:$0xff]   ;;  %v1809_v48 = vld [vmem:[%s2345_s1 + $0x128] sm:$0xff]   ;;  %v1813_v52 = vld [vmem:[%s2345_s1 + $0x120] sm:$0xff]  }
  0x11   :  { %1616 = vmatpush3.bf16.msra.mxu1 %v1778_v15  ;;  %1595 = vmatprep.subr.bf16.mxu0 %v1779_v16  ;;  %v1810_v49 = vld [vmem:[%s2345_s1 + $0x1a8] sm:$0xff]   ;;  %v1814_v53 = vld [vmem:[%s2345_s1 + $0x1a0] sm:$0xff]   ;;  %v1815_v54 = vld [vmem:[%s2345_s1 + $0x158] sm:$0xff]  }
  0x12   :  { %1617 = vmatprep.subr.bf16.mxu1 %v1780_v17  ;;  %1182 = vmatprep.mubr.bf16.mxu1 %v1445_v37  ;;  %v1816_v55 = vld [vmem:[%s2345_s1 + $0x1d8] sm:$0xff]   ;;  %v1819_v58 = vld [vmem:[%s2345_s1 + $0x150] sm:$0xff]   ;;  %v1823_v62 = vld [vmem:[%s2345_s1 + $0x148] sm:$0xff]  }
  0x13   :  { %v1817_v56 = vld [vmem:[%s2345_s1 + $0x118] sm:$0xff]   ;;  %v1820_v59 = vld [vmem:[%s2345_s1 + $0x1d0] sm:$0xff]   ;;  %v1824_v63 = vld [vmem:[%s2345_s1 + $0x1c8] sm:$0xff]  }
  0x14   :  { %1596 = vmatpush3.bf16.msra.mxu0 %v1781_v18  ;;  %v1818_v57 = vld [vmem:[%s2345_s1 + $0x198] sm:$0xff]   ;;  %v1821_v60 = vld [vmem:[%s2345_s1 + $0x110] sm:$0xff]   ;;  %v1825_v0 = vld [vmem:[%s2345_s1 + $0x108] sm:$0xff]  }
  0x15   :  { %1618 = vmatpush3.bf16.msra.mxu1 %v1782_v19  ;;  %1597 = vmatprep.subr.bf16.mxu0 %v1783_v20  ;;  %v1822_v61 = vld [vmem:[%s2345_s1 + $0x190] sm:$0xff]   ;;  %v1826_v1 = vld [vmem:[%s2345_s1 + $0x188] sm:$0xff]   ;;  %v1827_v2 = vld [vmem:[%s2345_s1 + $0x140] sm:$0xff]  }
  0x16   :  { %1619 = vmatprep.subr.bf16.mxu1 %v1784_v21  ;;  %v1828_v3 = vld [vmem:[%s2345_s1 + $0x1c0] sm:$0xff]   ;;  %v17_v6 = vld [vmem:[%s2346_s0 + $0x10] sm:$0xff]  ;;  %v18_v9 = vld [vmem:[%s2346_s0 + $0x18] sm:$0xff] }
  0x17   :  { %v1829_v4 = vld [vmem:[%s2345_s1 + $0x100] sm:$0xff]   ;;  %v1446_v7 = vcombine.low %v17_v6, %v17_v6  ;;  %v1447_v8 = vcombine.high %v17_v6, %v17_v6  ;;  %v1448_v10 = vcombine.low %v18_v9, %v18_v9  ;;  %v1449_v11 = vcombine.high %v18_v9, %v18_v9  ;;  %v1835_v12 = vld [vmem:[%s2345_s1 + $0x278] sm:$0xff]   ;;  %v1839_v16 = vld [vmem:[%s2345_s1 + $0x270] sm:$0xff]  }
  0x18   :  { %1598 = vmatpush3.bf16.msra.mxu0 %v1785_v22  ;;  %v1830_v5 = vld [vmem:[%s2345_s1 + $0x180] sm:$0xff]   ;;  %v1836_v13 = vld [vmem:[%s2345_s1 + $0x2f8] sm:$0xff]   ;;  %v1840_v17 = vld [vmem:[%s2345_s1 + $0x2f0] sm:$0xff]  }
  0x19   :  { %1620 = vmatpush3.bf16.msra.mxu1 %v1786_v23  ;;  %1599 = vmatprep.subr.bf16.mxu0 %v1787_v24  ;;  %v1837_v14 = vld [vmem:[%s2345_s1 + $0x238] sm:$0xff]   ;;  %v1841_v18 = vld [vmem:[%s2345_s1 + $0x230] sm:$0xff]   ;;  %v1843_v20 = vld [vmem:[%s2345_s1 + $0x268] sm:$0xff]  }
  0x1a   :  { %1621 = vmatprep.subr.bf16.mxu1 %v1788_v25  ;;  %v1838_v15 = vld [vmem:[%s2345_s1 + $0x2b8] sm:$0xff]   ;;  %v1842_v19 = vld [vmem:[%s2345_s1 + $0x2b0] sm:$0xff]   ;;  %v1844_v21 = vld [vmem:[%s2345_s1 + $0x2e8] sm:$0xff]  }
  0x1b   :  { %v1845_v22 = vld [vmem:[%s2345_s1 + $0x228] sm:$0xff]   ;;  %v1847_v24 = vld [vmem:[%s2345_s1 + $0x260] sm:$0xff]   ;;  %v1855_v32 = vld [vmem:[%s2345_s1 + $0x250] sm:$0xff]  }
  0x1c   :  { %1600 = vmatpush3.bf16.msra.mxu0 %v1789_v26  ;;  %v1846_v23 = vld [vmem:[%s2345_s1 + $0x2a8] sm:$0xff]   ;;  %v1848_v25 = vld [vmem:[%s2345_s1 + $0x2e0] sm:$0xff]   ;;  %v1856_v33 = vld [vmem:[%s2345_s1 + $0x2d0] sm:$0xff]  }
  0x1d   :  { %1622 = vmatpush3.bf16.msra.mxu1 %v1790_v27  ;;  %1601 = vmatprep.subr.bf16.mxu0 %v1791_v28  ;;  %v1849_v26 = vld [vmem:[%s2345_s1 + $0x220] sm:$0xff]   ;;  %v1851_v28 = vld [vmem:[%s2345_s1 + $0x258] sm:$0xff]   ;;  %v1858_v35 = vld [vmem:[%s2345_s1 + $0x290] sm:$0xff]  }
  0x1e   :  { %1623 = vmatprep.subr.bf16.mxu1 %v1792_v29  ;;  %v1850_v27 = vld [vmem:[%s2345_s1 + $0x2a0] sm:$0xff]   ;;  %v1852_v29 = vld [vmem:[%s2345_s1 + $0x2d8] sm:$0xff]   ;;  %v1860_v37 = vld [vmem:[%s2345_s1 + $0x2c8] sm:$0xff]  }
  0x1f   :  { %v1891_v6 = vld [vmem:[%s2345_s1 + $0x350] sm:$0xff]  }
  0x20   :  { %1602 = vmatpush3.bf16.msra.mxu0 %v1793_v30  ;;  %v1853_v30 = vld [vmem:[%s2345_s1 + $0x218] sm:$0xff]   ;;  %v1894_v9 = vld [vmem:[%s2345_s1 + $0x390] sm:$0xff]  }
  0x21   :  { %1624 = vmatpush3.bf16.msra.mxu1 %v1794_v31  ;;  %1631 = vmatprep.subr.bf16.mxu0 %v1799_v38  ;;  %v1854_v31 = vld [vmem:[%s2345_s1 + $0x298] sm:$0xff]   ;;  %v1861_v38 = vld [vmem:[%s2345_s1 + $0x208] sm:$0xff]  }
  0x22   :  { %1653 = vmatprep.subr.bf16.mxu1 %v1800_v39  ;;  %v1862_v39 = vld [vmem:[%s2345_s1 + $0x288] sm:$0xff]  }
  0x23   :  { %1143 = vmatmul.mubr.bf16.vlgmr.msra.gmra.mxu0 %v1442_v34  ;;  %v1857_v34 = vld [vmem:[%s2345_s1 + $0x210] sm:$0xff]  }
  0x24   :  { %1183 = vmatmul.mubr.bf16.vlgmr.msra.gmra.mxu1 %v1444_v36  ;;  %1632 = vmatpush3.bf16.msra.mxu0 %v1801_v40  ;;  %v1859_v36 = vld [vmem:[%s2345_s1 + $0x248] sm:$0xff]   ;;  %v1863_v40 = vld [vmem:[%s2345_s1 + $0x240] sm:$0xff]  }
  0x25   :  { %1654 = vmatpush3.bf16.msra.mxu1 %v1802_v41  ;;  %1633 = vmatprep.subr.bf16.mxu0 %v1803_v42  ;;  %v1864_v41 = vld [vmem:[%s2345_s1 + $0x2c0] sm:$0xff]  }
  0x26   :  { %1655 = vmatprep.subr.bf16.mxu1 %v1804_v43  ;;  %1222 = vmatprep.mubr.bf16.mxu0 %v1447_v8  ;;  %v1865_v42 = vld [vmem:[%s2345_s1 + $0x200] sm:$0xff]   ;;  %v1893_v8 = vld [vmem:[%s2345_s1 + $0x310] sm:$0xff]  }
  0x27   :  { %1262 = vmatprep.mubr.bf16.mxu1 %v1449_v11  ;;  %v1866_v43 = vld [vmem:[%s2345_s1 + $0x280] sm:$0xff]   ;;  %v1896_v11 = vld [vmem:[%s2345_s1 + $0x3c8] sm:$0xff]  }
  0x28   :  { %1634 = vmatpush3.bf16.msra.mxu0 %v1805_v44  ;;  %v19_v44 = vld [vmem:[%s2346_s0 + $0x20] sm:$0xff] }
  0x29   :  { %1656 = vmatpush3.bf16.msra.mxu1 %v1806_v45  ;;  %1635 = vmatprep.subr.bf16.mxu0 %v1807_v46  ;;  %v20_v45 = vld [vmem:[%s2346_s0 + $0x28] sm:$0xff]  ;;  %v1450_v46 = vcombine.low %v19_v44, %v19_v44 }
  0x2a   :  { %1657 = vmatprep.subr.bf16.mxu1 %v1808_v47  ;;  %v1451_v47 = vcombine.high %v19_v44, %v19_v44 }
  0x2c   :  { %1636 = vmatpush3.bf16.msra.mxu0 %v1809_v48  ;;  %v1452_v48 = vcombine.low %v20_v45, %v20_v45 }
  0x2d   :  { %1658 = vmatpush3.bf16.msra.mxu1 %v1810_v49  ;;  %1637 = vmatprep.subr.bf16.mxu0 %v1811_v50  ;;  %v1453_v49 = vcombine.high %v20_v45, %v20_v45  ;;  %v1871_v50 = vld [vmem:[%s2345_s1 + $0x378] sm:$0xff]  }
  0x2e   :  { %1659 = vmatprep.subr.bf16.mxu1 %v1812_v51  ;;  %v1872_v51 = vld [vmem:[%s2345_s1 + $0x3f8] sm:$0xff]  }
  0x30   :  { %1638 = vmatpush3.bf16.msra.mxu0 %v1813_v52  ;;  %v1873_v52 = vld [vmem:[%s2345_s1 + $0x338] sm:$0xff]  }
  0x31   :  { %1660 = vmatpush3.bf16.msra.mxu1 %v1814_v53  ;;  %1639 = vmatprep.subr.bf16.mxu0 %v1815_v54  ;;  %v1874_v53 = vld [vmem:[%s2345_s1 + $0x3b8] sm:$0xff]   ;;  %v1875_v54 = vld [vmem:[%s2345_s1 + $0x370] sm:$0xff]  }
  0x32   :  { %1661 = vmatprep.subr.bf16.mxu1 %v1816_v55  ;;  %v1876_v55 = vld [vmem:[%s2345_s1 + $0x3f0] sm:$0xff]  }
  0x34   :  { %1640 = vmatpush3.bf16.msra.mxu0 %v1817_v56  ;;  %v1877_v56 = vld [vmem:[%s2345_s1 + $0x330] sm:$0xff]  }
  0x35   :  { %1662 = vmatpush3.bf16.msra.mxu1 %v1818_v57  ;;  %1641 = vmatprep.subr.bf16.mxu0 %v1819_v58  ;;  %v1878_v57 = vld [vmem:[%s2345_s1 + $0x3b0] sm:$0xff]   ;;  %v1879_v58 = vld [vmem:[%s2345_s1 + $0x368] sm:$0xff]  }
  0x36   :  { %1663 = vmatprep.subr.bf16.mxu1 %v1820_v59  ;;  %v1880_v59 = vld [vmem:[%s2345_s1 + $0x3e8] sm:$0xff]  }
  0x38   :  { %1642 = vmatpush3.bf16.msra.mxu0 %v1821_v60  ;;  %v1881_v60 = vld [vmem:[%s2345_s1 + $0x328] sm:$0xff]  }
  0x39   :  { %1664 = vmatpush3.bf16.msra.mxu1 %v1822_v61  ;;  %1643 = vmatprep.subr.bf16.mxu0 %v1823_v62  ;;  %v1882_v61 = vld [vmem:[%s2345_s1 + $0x3a8] sm:$0xff]   ;;  %v1883_v62 = vld [vmem:[%s2345_s1 + $0x360] sm:$0xff]  }
  0x3a   :  { %1665 = vmatprep.subr.bf16.mxu1 %v1824_v63  ;;  %v1884_v63 = vld [vmem:[%s2345_s1 + $0x3e0] sm:$0xff]  }
  0x3c   :  { %1644 = vmatpush3.bf16.msra.mxu0 %v1825_v0  ;;  %v1885_v0 = vld [vmem:[%s2345_s1 + $0x320] sm:$0xff]  }
  0x3d   :  { %1666 = vmatpush3.bf16.msra.mxu1 %v1826_v1  ;;  %1645 = vmatprep.subr.bf16.mxu0 %v1827_v2  ;;  %v1886_v1 = vld [vmem:[%s2345_s1 + $0x3a0] sm:$0xff]   ;;  %v1887_v2 = vld [vmem:[%s2345_s1 + $0x358] sm:$0xff]  }
  0x3e   :  { %1667 = vmatprep.subr.bf16.mxu1 %v1828_v3  ;;  %v1888_v3 = vld [vmem:[%s2345_s1 + $0x3d8] sm:$0xff]  }
  0x40   :  { %1646 = vmatpush3.bf16.msra.mxu0 %v1829_v4  ;;  %v1889_v4 = vld [vmem:[%s2345_s1 + $0x318] sm:$0xff]  }
  0x41   :  { %1668 = vmatpush3.bf16.msra.mxu1 %v1830_v5  ;;  %1675 = vmatprep.subr.bf16.mxu0 %v1835_v12  ;;  %v1890_v5 = vld [vmem:[%s2345_s1 + $0x398] sm:$0xff]   ;;  %v1897_v12 = vld [vmem:[%s2345_s1 + $0x308] sm:$0xff]  }
  0x42   :  { %1697 = vmatprep.subr.bf16.mxu1 %v1836_v13  ;;  %v1898_v13 = vld [vmem:[%s2345_s1 + $0x388] sm:$0xff]  }
  0x43   :  { %1223 = vmatmul.mubr.bf16.vlgmr.msra.gmra.mxu0 %v1446_v7  ;;  %v1892_v7 = vld [vmem:[%s2345_s1 + $0x3d0] sm:$0xff]  }
  0x44   :  { %1263 = vmatmul.mubr.bf16.vlgmr.msra.gmra.mxu1 %v1448_v10  ;;  %1676 = vmatpush3.bf16.msra.mxu0 %v1837_v14  ;;  %v1895_v10 = vld [vmem:[%s2345_s1 + $0x348] sm:$0xff]   ;;  %v1899_v14 = vld [vmem:[%s2345_s1 + $0x340] sm:$0xff]  }
  0x45   :  { %1698 = vmatpush3.bf16.msra.mxu1 %v1838_v15  ;;  %1677 = vmatprep.subr.bf16.mxu0 %v1839_v16  ;;  %v1900_v15 = vld [vmem:[%s2345_s1 + $0x3c0] sm:$0xff]  }
  0x46   :  { %1699 = vmatprep.subr.bf16.mxu1 %v1840_v17  ;;  %1302 = vmatprep.mubr.bf16.mxu0 %v1451_v47  ;;  %v1901_v16 = vld [vmem:[%s2345_s1 + $0x300] sm:$0xff]  }
  0x47   :  { %1342 = vmatprep.mubr.bf16.mxu1 %v1453_v49  ;;  %v1902_v17 = vld [vmem:[%s2345_s1 + $0x380] sm:$0xff]  }
  0x48   :  { %1678 = vmatpush3.bf16.msra.mxu0 %v1841_v18  ;;  %v21_v18 = vld [vmem:[%s2346_s0 + $0x30] sm:$0xff] }
  0x49   :  { %1700 = vmatpush3.bf16.msra.mxu1 %v1842_v19  ;;  %1679 = vmatprep.subr.bf16.mxu0 %v1843_v20  ;;  %v22_v19 = vld [vmem:[%s2346_s0 + $0x38] sm:$0xff]  ;;  %v1454_v20 = vcombine.low %v21_v18, %v21_v18 }
  0x4a   :  { %1701 = vmatprep.subr.bf16.mxu1 %v1844_v21  ;;  %v1455_v21 = vcombine.high %v21_v18, %v21_v18 }
  0x4c   :  { %1680 = vmatpush3.bf16.msra.mxu0 %v1845_v22  ;;  %v1456_v22 = vcombine.low %v22_v19, %v22_v19 }
  0x4d   :  { %1702 = vmatpush3.bf16.msra.mxu1 %v1846_v23  ;;  %1681 = vmatprep.subr.bf16.mxu0 %v1847_v24  ;;  %v1457_v23 = vcombine.high %v22_v19, %v22_v19 }
  0x4e   :  { %1703 = vmatprep.subr.bf16.mxu1 %v1848_v25 }
  0x50   :  { %1682 = vmatpush3.bf16.msra.mxu0 %v1849_v26  ;;  %v1441_v26 = vld [vmem:[%s2347_s2] ss:$0 sm:$0xff] }
  0x51   :  { %1704 = vmatpush3.bf16.msra.mxu1 %v1850_v27  ;;  %1683 = vmatprep.subr.bf16.mxu0 %v1851_v28 }
  0x52   :  { %1705 = vmatprep.subr.bf16.mxu1 %v1852_v29 }
  0x54   :  { %1684 = vmatpush3.bf16.msra.mxu0 %v1853_v30 }
  0x55   :  { %1706 = vmatpush3.bf16.msra.mxu1 %v1854_v31  ;;  %1685 = vmatprep.subr.bf16.mxu0 %v1855_v32 }
  0x56   :  { %1707 = vmatprep.subr.bf16.mxu1 %v1856_v33 }
  0x58   :  { %1686 = vmatpush3.bf16.msra.mxu0 %v1857_v34 }
  0x59   :  { %1708 = vmatpush3.bf16.msra.mxu1 %v1858_v35  ;;  %1687 = vmatprep.subr.bf16.mxu0 %v1859_v36 }
  0x5a   :  { %1709 = vmatprep.subr.bf16.mxu1 %v1860_v37 }
  0x5c   :  { %1688 = vmatpush3.bf16.msra.mxu0 %v1861_v38 }
  0x5d   :  { %1710 = vmatpush3.bf16.msra.mxu1 %v1862_v39  ;;  %1689 = vmatprep.subr.bf16.mxu0 %v1863_v40 }
  0x5e   :  { %1711 = vmatprep.subr.bf16.mxu1 %v1864_v41 }
  0x60   :  { %1690 = vmatpush3.bf16.msra.mxu0 %v1865_v42 }
  0x61   :  { %1712 = vmatpush3.bf16.msra.mxu1 %v1866_v43  ;;  %1719 = vmatprep.subr.bf16.mxu0 %v1871_v50 }
  0x62   :  { %1741 = vmatprep.subr.bf16.mxu1 %v1872_v51 }
  0x63   :  { %1303 = vmatmul.mubr.bf16.vlgmr.msra.gmra.mxu0 %v1450_v46 }
  0x64   :  { %1343 = vmatmul.mubr.bf16.vlgmr.msra.gmra.mxu1 %v1452_v48  ;;  %1720 = vmatpush3.bf16.msra.mxu0 %v1873_v52 }
  0x65   :  { %1742 = vmatpush3.bf16.msra.mxu1 %v1874_v53  ;;  %1721 = vmatprep.subr.bf16.mxu0 %v1875_v54 }
  0x66   :  { %1743 = vmatprep.subr.bf16.mxu1 %v1876_v55  ;;  %1382 = vmatprep.mubr.bf16.mxu0 %v1455_v21 }
  0x67   :  { %1422 = vmatprep.mubr.bf16.mxu1 %v1457_v23 }
  0x68   :  { %1722 = vmatpush3.bf16.msra.mxu0 %v1877_v56 }
  0x69   :  { %1744 = vmatpush3.bf16.msra.mxu1 %v1878_v57  ;;  %1723 = vmatprep.subr.bf16.mxu0 %v1879_v58 }
  0x6a   :  { %1745 = vmatprep.subr.bf16.mxu1 %v1880_v59 }
  0x6c   :  { %1724 = vmatpush3.bf16.msra.mxu0 %v1881_v60 }
  0x6d   :  { %1746 = vmatpush3.bf16.msra.mxu1 %v1882_v61  ;;  %1725 = vmatprep.subr.bf16.mxu0 %v1883_v62 }
  0x6e   :  { %1747 = vmatprep.subr.bf16.mxu1 %v1884_v63 }
  0x70   :  { %1726 = vmatpush3.bf16.msra.mxu0 %v1885_v0 }
  0x71   :  { %1748 = vmatpush3.bf16.msra.mxu1 %v1886_v1  ;;  %1727 = vmatprep.subr.bf16.mxu0 %v1887_v2 }
  0x72   :  { %1749 = vmatprep.subr.bf16.mxu1 %v1888_v3 }
  0x74   :  { %1728 = vmatpush3.bf16.msra.mxu0 %v1889_v4 }
  0x75   :  { %1750 = vmatpush3.bf16.msra.mxu1 %v1890_v5  ;;  %1729 = vmatprep.subr.bf16.mxu0 %v1891_v6 }
  0x76   :  { %1751 = vmatprep.subr.bf16.mxu1 %v1892_v7 }
  0x78   :  { %1730 = vmatpush3.bf16.msra.mxu0 %v1893_v8 }
  0x79   :  { %1752 = vmatpush3.bf16.msra.mxu1 %v1894_v9  ;;  %1731 = vmatprep.subr.bf16.mxu0 %v1895_v10 }
  0x7a   :  { %1753 = vmatprep.subr.bf16.mxu1 %v1896_v11 }
  0x7c   :  { %1732 = vmatpush3.bf16.msra.mxu0 %v1897_v12 }
  0x7d   :  { %1754 = vmatpush3.bf16.msra.mxu1 %v1898_v13  ;;  %1733 = vmatprep.subr.bf16.mxu0 %v1899_v14 }
  0x7e   :  { %1755 = vmatprep.subr.bf16.mxu1 %v1900_v15 }
  0x80   :  { %1734 = vmatpush3.bf16.msra.mxu0 %v1901_v16 }
  0x81   :  { %1756 = vmatpush3.bf16.msra.mxu1 %v1902_v17 }
  0x83   :  { %1383 = vmatmul.mubr.bf16.vlgmr.msra.gmra.mxu0 %v1454_v20 }
  0x84   :  { %1423 = vmatmul.mubr.bf16.vlgmr.msra.gmra.mxu1 %v1456_v22 }
  0xe3   :  { %v1603_v24 = vpop.f32.mrf.mxu0 }
  0xe4   :  { %v1625_v25 = vpop.f32.mrf.mxu1 }
  0xe5   :  { %v1604_v27 = vpop.f32.mrf.mxu0 }
  0xe6   :  { %v1626_v28 = vpop.f32.mrf.mxu1  ;;  %v1605_v29 = vadd.f32 %v1604_v27, %v1603_v24 }
  0xe7   :  { %v1627_v30 = vadd.f32 %v1626_v28, %v1625_v25  ;;  %v1606_v31 = vpop.f32.mrf.mxu0 }
  0xe8   :  { %v1628_v32 = vpop.f32.mrf.mxu1  ;;  %v1145_v33 = vadd.f32 %v1605_v29, %v1441_v26 }
  0xe9   :  { %v1607_v34 = vpop.f32.mrf.mxu0 }
  0xea   :  { %v1629_v35 = vpop.f32.mrf.mxu1  ;;  %v1185_v36 = vadd.f32 %v1627_v30, %v1145_v33 }
 0x103   :  { %v1647_v37 = vpop.f32.mrf.mxu0 }
 0x104   :  { %v1669_v38 = vpop.f32.mrf.mxu1 }
 0x105   :  { %v1648_v39 = vpop.f32.mrf.mxu0 }
 0x106   :  { %v1670_v40 = vpop.f32.mrf.mxu1  ;;  %v1649_v53 = vadd.f32 %v1648_v39, %v1647_v37 }
 0x107   :  { %v1650_v41 = vpop.f32.mrf.mxu0  ;;  %v1671_v55 = vadd.f32 %v1670_v40, %v1669_v38 }
 0x108   :  { %v1672_v42 = vpop.f32.mrf.mxu1  ;;  %v1225_v54 = vadd.f32 %v1649_v53, %v1185_v36 }
 0x109   :  { %v1651_v43 = vpop.f32.mrf.mxu0 }
 0x10a   :  { %v1673_v44 = vpop.f32.mrf.mxu1  ;;  %v1265_v57 = vadd.f32 %v1671_v55, %v1225_v54 }
 0x123   :  { %v1691_v45 = vpop.f32.mrf.mxu0 }
 0x124   :  { %v1713_v46 = vpop.f32.mrf.mxu1 }
 0x125   :  { %v1692_v47 = vpop.f32.mrf.mxu0 }
 0x126   :  { %v1714_v48 = vpop.f32.mrf.mxu1  ;;  %v1693_v56 = vadd.f32 %v1692_v47, %v1691_v45 }
 0x127   :  { %v1694_v49 = vpop.f32.mrf.mxu0  ;;  %v1715_v59 = vadd.f32 %v1714_v48, %v1713_v46 }
 0x128   :  { %v1716_v50 = vpop.f32.mrf.mxu1  ;;  %v1305_v58 = vadd.f32 %v1693_v56, %v1265_v57 }
 0x129   :  { %v1695_v51 = vpop.f32.mrf.mxu0 }
 0x12a   :  { %v1717_v52 = vpop.f32.mrf.mxu1  ;;  %v1345_v63 = vadd.f32 %v1715_v59, %v1305_v58 }
 0x143   :  { %v1735_v60 = vpop.f32.mrf.mxu0 }
 0x144   :  { %v1757_v61 = vpop.f32.mrf.mxu1 }
 0x145   :  { %v1736_v62 = vpop.f32.mrf.mxu0 }
 0x146   :  { %v1737_v0 = vadd.f32 %v1736_v62, %v1735_v60  ;;  %v1758_v1 = vpop.f32.mrf.mxu1 }
 0x147   :  { %v1738_v2 = vpop.f32.mrf.mxu0  ;;  %v1759_v4 = vadd.f32 %v1758_v1, %v1757_v61 }
 0x148   :  { %v1385_v3 = vadd.f32 %v1737_v0, %v1345_v63  ;;  %v1760_v5 = vpop.f32.mrf.mxu1 }
 0x149   :  { %v1739_v6 = vpop.f32.mrf.mxu0 }
 0x14a   :  { %v1425_v7 = vadd.f32 %v1759_v4, %v1385_v3  ;;  %v1761_v8 = vpop.f32.mrf.mxu1 }
 0x14c   :  { %v1586_v9 = vmul.f32 -1.442695, %v1425_v7 }
 0x14e   :  { %1907 = vpow2.f32 %v1586_v9 }
 0x15b   :  { %v1908_v10 = vpop.eup %1907 }
 0x15c   :  { %v1433_v11 = vadd.f32 1.0, %v1908_v10 }
 0x15e   :  { %1909 = vrcp.f32 %v1433_v11 }
 0x16b   :  { %v1910_v12 = vpop.eup %1909 }
 0x16c   :  { %1436 = vst [vmem:[%s2348_s3] sm:$0xff] %v1910_v12 }

</bundles_post_ra>
